<compile_context>
chip_gen: v7x
topology: tpu7x:2x2x1
jax: 0.10.0
libtpu: 0.0.40
codegen_flags: <defaults>
</compile_context>

<pallas_src>
import functools

import jax
import jax.numpy as jnp
from jax import lax
from jax.experimental import pallas as pl
from jax.experimental.pallas import tpu as pltpu

LN_EPS = 1e-5  # PyTorch nn.LayerNorm default


def _cdiv(a, b):
    return -(-a // b)


def _bf16_valu_supported():
    """bf16 elementwise VALU exists on v6e/v7x; v2-v5 keep LayerNorm elementwise in f32."""
    try:
        kind = jax.devices()[0].device_kind.lower()
    except Exception:
        return True
    return not any(t in kind for t in ("v2", "v3", "v4", "v5"))


# ----------------------------------------------------------------------------- kernel
def _make_kernel(input_size, hidden, ln_in_bf16):
    H = hidden
    fins = (input_size, H, H, H, H, H // 2)
    fouts = (H, H, H, H, H // 2, H // 4)
    B7_ROW = 3 * 6          # vec row 18: fc7 bias
    W7_ROW = 3 * 6 + 1      # vec row 19: fc7 weight row

    def kernel(x_ref, w1_ref, wstk_ref, vec_ref, o_ref):
        h = x_ref[...]                                   # bf16 (tb, input_size)
        for li in range(6):
            fin, fout = fins[li], fouts[li]
            if li == 0:
                w = w1_ref[...]                          # bf16 (input_size, H)
            else:
                w = wstk_ref[li - 1, :fin, :fout]        # bf16 slice of packed stack
            # MXU matmul: bf16 operands, f32 accumulation.
            y = jnp.dot(h, w, preferred_element_type=jnp.float32)
            r = 3 * li
            b = vec_ref[r:r + 1, :fout]                  # (1, fout) f32
            g = vec_ref[r + 1:r + 2, :fout]
            be = vec_ref[r + 2:r + 3, :fout]
            y = y + b
            # LayerNorm statistics in f32.
            mu = jnp.mean(y, axis=-1, keepdims=True)
            d = y - mu
            var = jnp.mean(d * d, axis=-1, keepdims=True)
            s = g * lax.rsqrt(var + LN_EPS)              # gamma folded into inv-std
            # Elementwise normalize/affine/ReLU (dropout p=0.0 -> identity);
            # next matmul wants bf16 anyway.
            if ln_in_bf16:
                h = jnp.maximum(d.astype(jnp.bfloat16) * s.astype(jnp.bfloat16)
                                + be.astype(jnp.bfloat16), 0.0)
            else:
                h = jnp.maximum(d * s + be, 0.0).astype(jnp.bfloat16)

        # fc7 head (H//4 -> 1): VPU multiply + lane reduction, not an N=1 MXU matmul.
        w7 = vec_ref[W7_ROW:W7_ROW + 1, :fouts[-1]]      # (1, H//4) f32
        b7 = vec_ref[B7_ROW:B7_ROW + 1, :1]              # (1, 1) f32
        out = jnp.sum(h.astype(jnp.float32) * w7, axis=-1, keepdims=True) + b7
        o_ref[...] = out.astype(o_ref.dtype)             # (tb, 1) f32 — no lane slab

    return kernel


# ----------------------------------------------------------------------------- tiling
def _choose_tile(B, input_size, hidden, block_b, param_bytes):
    tiles = max(1, _cdiv(B, 128))              # number of 128-row groups
    max_tiles = max(1, block_b // 128)
    n_steps = _cdiv(tiles, max_tiles)
    if tiles >= 2 and n_steps < 2:
        n_steps = 2                            # give v7x's 2nd TensorCore work
    tb_tiles = _cdiv(tiles, n_steps)

    def footprint(t):
        tb = t * 128
        return (2 * tb * input_size * 2        # bf16 x, double-buffered
                + 2 * tb * 4                   # f32 out, double-buffered
                + 4 * tb * hidden * 4          # live f32 temporaries (headroom)
                + 2 * param_bytes)             # resident weights / vectors

    # Keep the per-step footprint well under the ~32 MiB scoped VMEM default (v7x incl.).
    while tb_tiles > 1 and footprint(tb_tiles) > 20 * 1024 * 1024:
        tb_tiles = _cdiv(tb_tiles, 2)
    n_steps = _cdiv(tiles, tb_tiles)
    if tiles >= 2 and n_steps < 2:
        n_steps = 2
    tb = tb_tiles * 128
    return tb, n_steps * tb


# ----------------------------------------------------------------------------- wrapper
@functools.partial(jax.jit, static_argnames=("block_b", "ln_in_bf16"))
def trajectory_reward_net(x, w1, w_stack, vecs, *, block_b=2048, ln_in_bf16=None):
    """x: (B, input_size). w1: (input_size, H) bf16. w_stack: (5, H, H) bf16 (fc2..fc6,
    zero-padded). vecs: (20, H) f32 = [b,gamma,beta]*6 + [b7] + [w7 row]. Returns (B,1) f32."""
    if ln_in_bf16 is None:
        ln_in_bf16 = _bf16_valu_supported()

    B, input_size = x.shape
    H = int(w1.shape[1])

    param_bytes = (w1.size * w1.dtype.itemsize
                   + w_stack.size * w_stack.dtype.itemsize
                   + vecs.size * vecs.dtype.itemsize)
    tb, Bp = _choose_tile(B, input_size, H, block_b, param_bytes)

    xp = x.astype(jnp.bfloat16)                 # halves x HBM read + VMEM double-buffer
    if Bp != B:
        # Zero-padded rows run through LayerNorm (finite values even if a bias row were
        # constant: rsqrt(eps) scaling); they are sliced off below, so this is benign.
        xp = jnp.pad(xp, ((0, Bp - B), (0, 0)))

    mm_flops = 2 * Bp * (input_size * H + 3 * H * H + H * (H // 2)
                         + (H // 2) * (H // 4) + (H // 4))
    bytes_accessed = Bp * input_size * 2 + param_bytes + Bp * 4
    cost = pl.CostEstimate(flops=int(mm_flops), transcendentals=int(6 * Bp),
                           bytes_accessed=int(bytes_accessed))

    out = pl.pallas_call(
        _make_kernel(input_size, H, bool(ln_in_bf16)),
        out_shape=jax.ShapeDtypeStruct((Bp, 1), jnp.float32),   # output dtype pinned to f32
        grid=(Bp // tb,),
        in_specs=[
            pl.BlockSpec((tb, input_size), lambda i: (i, 0)),
            # Whole-array blocks with constant index_maps: DMA'd once, reused across steps.
            pl.BlockSpec(w1.shape, lambda i: (0, 0)),
            pl.BlockSpec(w_stack.shape, lambda i: (0, 0, 0)),
            pl.BlockSpec(vecs.shape, lambda i: (0, 0)),
        ],
        out_specs=pl.BlockSpec((tb, 1), lambda i: (i, 0)),
        compiler_params=pltpu.CompilerParams(
            dimension_semantics=("parallel",)),   # shard batch axis across TCs on v7x
        cost_estimate=cost,
    )(xp, w1, w_stack, vecs)
    return out[:B]


# ----------------------------------------------------------------------------- params
def init_params(key, input_size, hidden_size=128, dtype=jnp.float32):
    """PyTorch-style init, natural layout: [w(fin,fout), b(1,fout), (gamma, beta)]*."""
    H = hidden_size
    dims = [(input_size, H), (H, H), (H, H), (H, H),
            (H, H // 2), (H // 2, H // 4), (H // 4, 1)]
    params = []
    for i, (fin, fout) in enumerate(dims):
        key, kw, kb = jax.random.split(key, 3)
        bound = 1.0 / float(fin) ** 0.5
        params.append(jax.random.uniform(kw, (fin, fout), dtype, -bound, bound))
        params.append(jax.random.uniform(kb, (1, fout), dtype, -bound, bound))
        if i < 6:
            params.append(jnp.ones((1, fout), dtype))   # gamma
            params.append(jnp.zeros((1, fout), dtype))  # beta
    return params


def pack_params(raw, hidden_size, mm_dtype=jnp.bfloat16):
    """Natural params -> kernel layout:
       w1 (input_size,H) bf16; w_stack (5,H,H) bf16 (fc2..fc6, zero-padded);
       vecs (20,H) f32 = [b,gamma,beta]*6 + [b7] + [w7 row]."""
    H = hidden_size
    idx = 0
    w1 = None
    stack, vec_rows = [], []
    for li in range(7):
        w, b = raw[idx], raw[idx + 1]
        idx += 2
        if li < 6:
            g, be = raw[idx], raw[idx + 1]
            idx += 2
            fin, fout = w.shape
            if li == 0:
                w1 = w.astype(mm_dtype)                   # cast once on host, not per layer
            else:
                stack.append(jnp.zeros((H, H), mm_dtype).at[:fin, :fout]
                             .set(w.astype(mm_dtype)))
            for v in (b, g, be):
                vec_rows.append(jnp.pad(v.astype(jnp.float32),
                                        ((0, 0), (0, H - v.shape[1]))))
        else:
            vec_rows.append(jnp.pad(b.astype(jnp.float32), ((0, 0), (0, H - 1))))
            w7_row = w.T.astype(jnp.float32)              # (1, H//4) f32 (VPU head)
            vec_rows.append(jnp.pad(w7_row, ((0, 0), (0, H - w7_row.shape[1]))))
    return w1, jnp.stack(stack, axis=0), jnp.concatenate(vec_rows, axis=0)


# ----------------------------------------------------------------------------- references
def reference_forward_f32(x, raw):
    """Pure-f32 reference mirroring the PyTorch forward."""
    idx = 0
    h = x.astype(jnp.float32)
    for layer in range(7):
        w, b = raw[idx], raw[idx + 1]
        idx += 2
        h = jnp.dot(h, w, precision=lax.Precision.HIGHEST) + b
        if layer < 6:
            g, be = raw[idx], raw[idx + 1]
            idx += 2
            mu = jnp.mean(h, axis=-1, keepdims=True)
            var = jnp.mean((h - mu) ** 2, axis=-1, keepdims=True)
            h = jnp.maximum((h - mu) / jnp.sqrt(var + LN_EPS) * g + be, 0.0)
    return h


def reference_forward_mixed(x, raw, ln_in_bf16):
    """Mirrors the kernel's precision policy (bf16 MXU + bf16/f32 LN elementwise, f32 head)."""
    idx = 0
    h = x.astype(jnp.bfloat16)
    for layer in range(7):
        w, b = raw[idx], raw[idx + 1]
        idx += 2
        if layer < 6:
            g, be = raw[idx], raw[idx + 1]
            idx += 2
            y = jnp.dot(h, w.astype(jnp.bfloat16), preferred_element_type=jnp.float32) + b
            mu = jnp.mean(y, axis=-1, keepdims=True)
            d = y - mu
            var = jnp.mean(d * d, axis=-1, keepdims=True)
            s = g * lax.rsqrt(var + LN_EPS)
            if ln_in_bf16:
                h = jnp.maximum(d.astype(jnp.bfloat16) * s.astype(jnp.bfloat16)
                                + be.astype(jnp.bfloat16), 0.0)
            else:
                h = jnp.maximum(d * s + be, 0.0).astype(jnp.bfloat16)
        else:
            h = jnp.sum(h.astype(jnp.float32) * w.T, axis=-1, keepdims=True) + b
    return h


# ----------------------------------------------------------------------------- demo
if __name__ == "__main__":
    # Small shapes consistent with the module: batch=2, input_size=16, hidden=32.
    B, INPUT_SIZE, HIDDEN = 2, 16, 32

    key = jax.random.PRNGKey(0)
    kx, kp, kx2 = jax.random.split(key, 3)

    raw = init_params(kp, INPUT_SIZE, HIDDEN)
    w1, w_stack, vecs = pack_params(raw, HIDDEN)
    ln_bf16 = _bf16_valu_supported()

    x = jax.random.normal(kx, (B, INPUT_SIZE), jnp.float32)
    out = jax.block_until_ready(
        trajectory_reward_net(x, w1, w_stack, vecs, ln_in_bf16=ln_bf16))
    assert out.shape == (B, 1), out.shape
    assert out.dtype == jnp.float32, out.dtype
    assert jnp.allclose(out, reference_forward_mixed(x, raw, ln_bf16), atol=3e-2, rtol=3e-2)
    assert jnp.allclose(out, reference_forward_f32(x, raw), atol=2e-1, rtol=2e-1)

    # Exercise the multi-step batch-tiled grid + batch-padding path (3 grid steps).
    B2 = 300
    x2 = jax.random.normal(kx2, (B2, INPUT_SIZE), jnp.float32)
    out2 = jax.block_until_ready(
        trajectory_reward_net(x2, w1, w_stack, vecs, block_b=128, ln_in_bf16=ln_bf16))
    assert out2.shape == (B2, 1), out2.shape
    assert jnp.allclose(out2, reference_forward_mixed(x2, raw, ln_bf16), atol=3e-2, rtol=3e-2)

    print("KERNEL_OK")
</pallas_src>

<mosaic_0001>
module attributes {stable_mosaic.version = 11 : i64} {
  func.func @kernel(%arg0: i32, %arg1: memref<128x16xbf16, #tpu.memory_space<vmem>>, %arg2: memref<16x32xbf16, #tpu.memory_space<vmem>>, %arg3: memref<5x32x32xbf16, #tpu.memory_space<vmem>>, %arg4: memref<20x32xf32, #tpu.memory_space<vmem>>, %arg5: memref<128x1xf32, #tpu.memory_space<vmem>>) attributes {dimension_semantics = [#tpu.dimension_semantics<parallel>], iteration_bounds = array<i64: 1>, scalar_prefetch = 0 : i64, scratch_operands = 0 : i64, tpu.core_type = #tpu.core_type<tc>, window_params = [{transform_indices = @transform_0, window_bounds = array<i64: 128, 16>}, {pipeline_mode = #tpu.pipeline_mode<synchronous>, transform_indices = @transform_1, window_bounds = array<i64: 16, 32>}, {pipeline_mode = #tpu.pipeline_mode<synchronous>, transform_indices = @transform_2, window_bounds = array<i64: 5, 32, 32>}, {pipeline_mode = #tpu.pipeline_mode<synchronous>, transform_indices = @transform_3, window_bounds = array<i64: 20, 32>}, {transform_indices = @transform_4, window_bounds = array<i64: 128, 1>}]} {
    %c0 = arith.constant 0 : index
    %c0_0 = arith.constant 0 : index
    %0 = vector.load %arg1[%c0, %c0_0] : memref<128x16xbf16, #tpu.memory_space<vmem>>, vector<128x16xbf16>
    %c0_1 = arith.constant 0 : index
    %c0_2 = arith.constant 0 : index
    %1 = vector.load %arg2[%c0_1, %c0_2] : memref<16x32xbf16, #tpu.memory_space<vmem>>, vector<16x32xbf16>
    %cst = arith.constant dense<0.000000e+00> : vector<128x32xf32>
    %2 = tpu.matmul %0, %1, %cst {dimension_numbers = #tpu.dot_dimension_numbers<[1], [0], [0], [1], [0, 0, 1, 1], [], []>} : vector<128x16xbf16>, vector<16x32xbf16>, vector<128x32xf32> -> vector<128x32xf32>
    %c0_3 = arith.constant 0 : index
    %c0_4 = arith.constant 0 : index
    %3 = vector.load %arg4[%c0_3, %c0_4] : memref<20x32xf32, #tpu.memory_space<vmem>>, vector<1x32xf32>
    %c1 = arith.constant 1 : index
    %c0_5 = arith.constant 0 : index
    %4 = vector.load %arg4[%c1, %c0_5] : memref<20x32xf32, #tpu.memory_space<vmem>>, vector<1x32xf32>
    %c2 = arith.constant 2 : index
    %c0_6 = arith.constant 0 : index
    %5 = vector.load %arg4[%c2, %c0_6] : memref<20x32xf32, #tpu.memory_space<vmem>>, vector<1x32xf32>
    %6 = vector.broadcast %3 : vector<1x32xf32> to vector<128x32xf32>
    %7 = arith.addf %2, %6 : vector<128x32xf32>
    %cst_7 = arith.constant dense<0.000000e+00> : vector<128xf32>
    %8 = vector.multi_reduction <add>, %7, %cst_7 [1] : vector<128x32xf32> to vector<128xf32>
    %9 = vector.shape_cast %8 : vector<128xf32> to vector<128x1xf32>
    %cst_8 = arith.constant 3.200000e+01 : f32
    %10 = vector.broadcast %cst_8 : f32 to vector<128x1xf32>
    %11 = arith.divf %9, %10 : vector<128x1xf32>
    %12 = vector.broadcast %11 : vector<128x1xf32> to vector<128x32xf32>
    %13 = arith.subf %7, %12 : vector<128x32xf32>
    %14 = arith.mulf %13, %13 : vector<128x32xf32>
    %cst_9 = arith.constant dense<0.000000e+00> : vector<128xf32>
    %15 = vector.multi_reduction <add>, %14, %cst_9 [1] : vector<128x32xf32> to vector<128xf32>
    %16 = vector.shape_cast %15 : vector<128xf32> to vector<128x1xf32>
    %cst_10 = arith.constant 3.200000e+01 : f32
    %17 = vector.broadcast %cst_10 : f32 to vector<128x1xf32>
    %18 = arith.divf %16, %17 : vector<128x1xf32>
    %cst_11 = arith.constant 9.99999974E-6 : f32
    %19 = vector.broadcast %cst_11 : f32 to vector<128x1xf32>
    %20 = arith.addf %18, %19 : vector<128x1xf32>
    %21 = math.rsqrt %20 : vector<128x1xf32>
    %22 = vector.broadcast %4 : vector<1x32xf32> to vector<128x32xf32>
    %23 = vector.broadcast %21 : vector<128x1xf32> to vector<128x32xf32>
    %24 = arith.mulf %22, %23 : vector<128x32xf32>
    %25 = arith.truncf %13 : vector<128x32xf32> to vector<128x32xbf16>
    %26 = arith.truncf %24 : vector<128x32xf32> to vector<128x32xbf16>
    %27 = arith.mulf %25, %26 : vector<128x32xbf16>
    %28 = arith.truncf %5 : vector<1x32xf32> to vector<1x32xbf16>
    %29 = vector.broadcast %28 : vector<1x32xbf16> to vector<128x32xbf16>
    %30 = arith.addf %27, %29 : vector<128x32xbf16>
    %cst_12 = arith.constant 0.000000e+00 : bf16
    %31 = vector.broadcast %cst_12 : bf16 to vector<128x32xbf16>
    %32 = arith.maximumf %30, %31 : vector<128x32xbf16>
    %c0_13 = arith.constant 0 : index
    %c0_14 = arith.constant 0 : index
    %c0_15 = arith.constant 0 : index
    %33 = vector.load %arg3[%c0_13, %c0_14, %c0_15] : memref<5x32x32xbf16, #tpu.memory_space<vmem>>, vector<1x32x32xbf16>
    %34 = vector.shape_cast %33 : vector<1x32x32xbf16> to vector<32x32xbf16>
    %cst_16 = arith.constant dense<0.000000e+00> : vector<128x32xf32>
    %35 = tpu.matmul %32, %34, %cst_16 {dimension_numbers = #tpu.dot_dimension_numbers<[1], [0], [0], [1], [0, 0, 1, 1], [], []>} : vector<128x32xbf16>, vector<32x32xbf16>, vector<128x32xf32> -> vector<128x32xf32>
    %c3 = arith.constant 3 : index
    %c0_17 = arith.constant 0 : index
    %36 = vector.load %arg4[%c3, %c0_17] : memref<20x32xf32, #tpu.memory_space<vmem>>, vector<1x32xf32>
    %c4 = arith.constant 4 : index
    %c0_18 = arith.constant 0 : index
    %37 = vector.load %arg4[%c4, %c0_18] : memref<20x32xf32, #tpu.memory_space<vmem>>, vector<1x32xf32>
    %c5 = arith.constant 5 : index
    %c0_19 = arith.constant 0 : index
    %38 = vector.load %arg4[%c5, %c0_19] : memref<20x32xf32, #tpu.memory_space<vmem>>, vector<1x32xf32>
    %39 = vector.broadcast %36 : vector<1x32xf32> to vector<128x32xf32>
    %40 = arith.addf %35, %39 : vector<128x32xf32>
    %cst_20 = arith.constant dense<0.000000e+00> : vector<128xf32>
    %41 = vector.multi_reduction <add>, %40, %cst_20 [1] : vector<128x32xf32> to vector<128xf32>
    %42 = vector.shape_cast %41 : vector<128xf32> to vector<128x1xf32>
    %cst_21 = arith.constant 3.200000e+01 : f32
    %43 = vector.broadcast %cst_21 : f32 to vector<128x1xf32>
    %44 = arith.divf %42, %43 : vector<128x1xf32>
    %45 = vector.broadcast %44 : vector<128x1xf32> to vector<128x32xf32>
    %46 = arith.subf %40, %45 : vector<128x32xf32>
    %47 = arith.mulf %46, %46 : vector<128x32xf32>
    %cst_22 = arith.constant dense<0.000000e+00> : vector<128xf32>
    %48 = vector.multi_reduction <add>, %47, %cst_22 [1] : vector<128x32xf32> to vector<128xf32>
    %49 = vector.shape_cast %48 : vector<128xf32> to vector<128x1xf32>
    %cst_23 = arith.constant 3.200000e+01 : f32
    %50 = vector.broadcast %cst_23 : f32 to vector<128x1xf32>
    %51 = arith.divf %49, %50 : vector<128x1xf32>
    %cst_24 = arith.constant 9.99999974E-6 : f32
    %52 = vector.broadcast %cst_24 : f32 to vector<128x1xf32>
    %53 = arith.addf %51, %52 : vector<128x1xf32>
    %54 = math.rsqrt %53 : vector<128x1xf32>
    %55 = vector.broadcast %37 : vector<1x32xf32> to vector<128x32xf32>
    %56 = vector.broadcast %54 : vector<128x1xf32> to vector<128x32xf32>
    %57 = arith.mulf %55, %56 : vector<128x32xf32>
    %58 = arith.truncf %46 : vector<128x32xf32> to vector<128x32xbf16>
    %59 = arith.truncf %57 : vector<128x32xf32> to vector<128x32xbf16>
    %60 = arith.mulf %58, %59 : vector<128x32xbf16>
    %61 = arith.truncf %38 : vector<1x32xf32> to vector<1x32xbf16>
    %62 = vector.broadcast %61 : vector<1x32xbf16> to vector<128x32xbf16>
    %63 = arith.addf %60, %62 : vector<128x32xbf16>
    %cst_25 = arith.constant 0.000000e+00 : bf16
    %64 = vector.broadcast %cst_25 : bf16 to vector<128x32xbf16>
    %65 = arith.maximumf %63, %64 : vector<128x32xbf16>
    %c1_26 = arith.constant 1 : index
    %c0_27 = arith.constant 0 : index
    %c0_28 = arith.constant 0 : index
    %66 = vector.load %arg3[%c1_26, %c0_27, %c0_28] : memref<5x32x32xbf16, #tpu.memory_space<vmem>>, vector<1x32x32xbf16>
    %67 = vector.shape_cast %66 : vector<1x32x32xbf16> to vector<32x32xbf16>
    %cst_29 = arith.constant dense<0.000000e+00> : vector<128x32xf32>
    %68 = tpu.matmul %65, %67, %cst_29 {dimension_numbers = #tpu.dot_dimension_numbers<[1], [0], [0], [1], [0, 0, 1, 1], [], []>} : vector<128x32xbf16>, vector<32x32xbf16>, vector<128x32xf32> -> vector<128x32xf32>
    %c6 = arith.constant 6 : index
    %c0_30 = arith.constant 0 : index
    %69 = vector.load %arg4[%c6, %c0_30] : memref<20x32xf32, #tpu.memory_space<vmem>>, vector<1x32xf32>
    %c7 = arith.constant 7 : index
    %c0_31 = arith.constant 0 : index
    %70 = vector.load %arg4[%c7, %c0_31] : memref<20x32xf32, #tpu.memory_space<vmem>>, vector<1x32xf32>
    %c8 = arith.constant 8 : index
    %c0_32 = arith.constant 0 : index
    %71 = vector.load %arg4[%c8, %c0_32] : memref<20x32xf32, #tpu.memory_space<vmem>>, vector<1x32xf32>
    %72 = vector.broadcast %69 : vector<1x32xf32> to vector<128x32xf32>
    %73 = arith.addf %68, %72 : vector<128x32xf32>
    %cst_33 = arith.constant dense<0.000000e+00> : vector<128xf32>
    %74 = vector.multi_reduction <add>, %73, %cst_33 [1] : vector<128x32xf32> to vector<128xf32>
    %75 = vector.shape_cast %74 : vector<128xf32> to vector<128x1xf32>
    %cst_34 = arith.constant 3.200000e+01 : f32
    %76 = vector.broadcast %cst_34 : f32 to vector<128x1xf32>
    %77 = arith.divf %75, %76 : vector<128x1xf32>
    %78 = vector.broadcast %77 : vector<128x1xf32> to vector<128x32xf32>
    %79 = arith.subf %73, %78 : vector<128x32xf32>
    %80 = arith.mulf %79, %79 : vector<128x32xf32>
    %cst_35 = arith.constant dense<0.000000e+00> : vector<128xf32>
    %81 = vector.multi_reduction <add>, %80, %cst_35 [1] : vector<128x32xf32> to vector<128xf32>
    %82 = vector.shape_cast %81 : vector<128xf32> to vector<128x1xf32>
    %cst_36 = arith.constant 3.200000e+01 : f32
    %83 = vector.broadcast %cst_36 : f32 to vector<128x1xf32>
    %84 = arith.divf %82, %83 : vector<128x1xf32>
    %cst_37 = arith.constant 9.99999974E-6 : f32
    %85 = vector.broadcast %cst_37 : f32 to vector<128x1xf32>
    %86 = arith.addf %84, %85 : vector<128x1xf32>
    %87 = math.rsqrt %86 : vector<128x1xf32>
    %88 = vector.broadcast %70 : vector<1x32xf32> to vector<128x32xf32>
    %89 = vector.broadcast %87 : vector<128x1xf32> to vector<128x32xf32>
    %90 = arith.mulf %88, %89 : vector<128x32xf32>
    %91 = arith.truncf %79 : vector<128x32xf32> to vector<128x32xbf16>
    %92 = arith.truncf %90 : vector<128x32xf32> to vector<128x32xbf16>
    %93 = arith.mulf %91, %92 : vector<128x32xbf16>
    %94 = arith.truncf %71 : vector<1x32xf32> to vector<1x32xbf16>
    %95 = vector.broadcast %94 : vector<1x32xbf16> to vector<128x32xbf16>
    %96 = arith.addf %93, %95 : vector<128x32xbf16>
    %cst_38 = arith.constant 0.000000e+00 : bf16
    %97 = vector.broadcast %cst_38 : bf16 to vector<128x32xbf16>
    %98 = arith.maximumf %96, %97 : vector<128x32xbf16>
    %c2_39 = arith.constant 2 : index
    %c0_40 = arith.constant 0 : index
    %c0_41 = arith.constant 0 : index
    %99 = vector.load %arg3[%c2_39, %c0_40, %c0_41] : memref<5x32x32xbf16, #tpu.memory_space<vmem>>, vector<1x32x32xbf16>
    %100 = vector.shape_cast %99 : vector<1x32x32xbf16> to vector<32x32xbf16>
    %cst_42 = arith.constant dense<0.000000e+00> : vector<128x32xf32>
    %101 = tpu.matmul %98, %100, %cst_42 {dimension_numbers = #tpu.dot_dimension_numbers<[1], [0], [0], [1], [0, 0, 1, 1], [], []>} : vector<128x32xbf16>, vector<32x32xbf16>, vector<128x32xf32> -> vector<128x32xf32>
    %c9 = arith.constant 9 : index
    %c0_43 = arith.constant 0 : index
    %102 = vector.load %arg4[%c9, %c0_43] : memref<20x32xf32, #tpu.memory_space<vmem>>, vector<1x32xf32>
    %c10 = arith.constant 10 : index
    %c0_44 = arith.constant 0 : index
    %103 = vector.load %arg4[%c10, %c0_44] : memref<20x32xf32, #tpu.memory_space<vmem>>, vector<1x32xf32>
    %c11 = arith.constant 11 : index
    %c0_45 = arith.constant 0 : index
    %104 = vector.load %arg4[%c11, %c0_45] : memref<20x32xf32, #tpu.memory_space<vmem>>, vector<1x32xf32>
    %105 = vector.broadcast %102 : vector<1x32xf32> to vector<128x32xf32>
    %106 = arith.addf %101, %105 : vector<128x32xf32>
    %cst_46 = arith.constant dense<0.000000e+00> : vector<128xf32>
    %107 = vector.multi_reduction <add>, %106, %cst_46 [1] : vector<128x32xf32> to vector<128xf32>
    %108 = vector.shape_cast %107 : vector<128xf32> to vector<128x1xf32>
    %cst_47 = arith.constant 3.200000e+01 : f32
    %109 = vector.broadcast %cst_47 : f32 to vector<128x1xf32>
    %110 = arith.divf %108, %109 : vector<128x1xf32>
    %111 = vector.broadcast %110 : vector<128x1xf32> to vector<128x32xf32>
    %112 = arith.subf %106, %111 : vector<128x32xf32>
    %113 = arith.mulf %112, %112 : vector<128x32xf32>
    %cst_48 = arith.constant dense<0.000000e+00> : vector<128xf32>
    %114 = vector.multi_reduction <add>, %113, %cst_48 [1] : vector<128x32xf32> to vector<128xf32>
    %115 = vector.shape_cast %114 : vector<128xf32> to vector<128x1xf32>
    %cst_49 = arith.constant 3.200000e+01 : f32
    %116 = vector.broadcast %cst_49 : f32 to vector<128x1xf32>
    %117 = arith.divf %115, %116 : vector<128x1xf32>
    %cst_50 = arith.constant 9.99999974E-6 : f32
    %118 = vector.broadcast %cst_50 : f32 to vector<128x1xf32>
    %119 = arith.addf %117, %118 : vector<128x1xf32>
    %120 = math.rsqrt %119 : vector<128x1xf32>
    %121 = vector.broadcast %103 : vector<1x32xf32> to vector<128x32xf32>
    %122 = vector.broadcast %120 : vector<128x1xf32> to vector<128x32xf32>
    %123 = arith.mulf %121, %122 : vector<128x32xf32>
    %124 = arith.truncf %112 : vector<128x32xf32> to vector<128x32xbf16>
    %125 = arith.truncf %123 : vector<128x32xf32> to vector<128x32xbf16>
    %126 = arith.mulf %124, %125 : vector<128x32xbf16>
    %127 = arith.truncf %104 : vector<1x32xf32> to vector<1x32xbf16>
    %128 = vector.broadcast %127 : vector<1x32xbf16> to vector<128x32xbf16>
    %129 = arith.addf %126, %128 : vector<128x32xbf16>
    %cst_51 = arith.constant 0.000000e+00 : bf16
    %130 = vector.broadcast %cst_51 : bf16 to vector<128x32xbf16>
    %131 = arith.maximumf %129, %130 : vector<128x32xbf16>
    %c3_52 = arith.constant 3 : index
    %c0_53 = arith.constant 0 : index
    %c0_54 = arith.constant 0 : index
    %132 = vector.load %arg3[%c3_52, %c0_53, %c0_54] : memref<5x32x32xbf16, #tpu.memory_space<vmem>>, vector<1x32x16xbf16>
    %133 = vector.shape_cast %132 : vector<1x32x16xbf16> to vector<32x16xbf16>
    %cst_55 = arith.constant dense<0.000000e+00> : vector<128x16xf32>
    %134 = tpu.matmul %131, %133, %cst_55 {dimension_numbers = #tpu.dot_dimension_numbers<[1], [0], [0], [1], [0, 0, 1, 1], [], []>} : vector<128x32xbf16>, vector<32x16xbf16>, vector<128x16xf32> -> vector<128x16xf32>
    %c12 = arith.constant 12 : index
    %c0_56 = arith.constant 0 : index
    %135 = vector.load %arg4[%c12, %c0_56] : memref<20x32xf32, #tpu.memory_space<vmem>>, vector<1x16xf32>
    %c13 = arith.constant 13 : index
    %c0_57 = arith.constant 0 : index
    %136 = vector.load %arg4[%c13, %c0_57] : memref<20x32xf32, #tpu.memory_space<vmem>>, vector<1x16xf32>
    %c14 = arith.constant 14 : index
    %c0_58 = arith.constant 0 : index
    %137 = vector.load %arg4[%c14, %c0_58] : memref<20x32xf32, #tpu.memory_space<vmem>>, vector<1x16xf32>
    %138 = vector.broadcast %135 : vector<1x16xf32> to vector<128x16xf32>
    %139 = arith.addf %134, %138 : vector<128x16xf32>
    %cst_59 = arith.constant dense<0.000000e+00> : vector<128xf32>
    %140 = vector.multi_reduction <add>, %139, %cst_59 [1] : vector<128x16xf32> to vector<128xf32>
    %141 = vector.shape_cast %140 : vector<128xf32> to vector<128x1xf32>
    %cst_60 = arith.constant 1.600000e+01 : f32
    %142 = vector.broadcast %cst_60 : f32 to vector<128x1xf32>
    %143 = arith.divf %141, %142 : vector<128x1xf32>
    %144 = vector.broadcast %143 : vector<128x1xf32> to vector<128x16xf32>
    %145 = arith.subf %139, %144 : vector<128x16xf32>
    %146 = arith.mulf %145, %145 : vector<128x16xf32>
    %cst_61 = arith.constant dense<0.000000e+00> : vector<128xf32>
    %147 = vector.multi_reduction <add>, %146, %cst_61 [1] : vector<128x16xf32> to vector<128xf32>
    %148 = vector.shape_cast %147 : vector<128xf32> to vector<128x1xf32>
    %cst_62 = arith.constant 1.600000e+01 : f32
    %149 = vector.broadcast %cst_62 : f32 to vector<128x1xf32>
    %150 = arith.divf %148, %149 : vector<128x1xf32>
    %cst_63 = arith.constant 9.99999974E-6 : f32
    %151 = vector.broadcast %cst_63 : f32 to vector<128x1xf32>
    %152 = arith.addf %150, %151 : vector<128x1xf32>
    %153 = math.rsqrt %152 : vector<128x1xf32>
    %154 = vector.broadcast %136 : vector<1x16xf32> to vector<128x16xf32>
    %155 = vector.broadcast %153 : vector<128x1xf32> to vector<128x16xf32>
    %156 = arith.mulf %154, %155 : vector<128x16xf32>
    %157 = arith.truncf %145 : vector<128x16xf32> to vector<128x16xbf16>
    %158 = arith.truncf %156 : vector<128x16xf32> to vector<128x16xbf16>
    %159 = arith.mulf %157, %158 : vector<128x16xbf16>
    %160 = arith.truncf %137 : vector<1x16xf32> to vector<1x16xbf16>
    %161 = vector.broadcast %160 : vector<1x16xbf16> to vector<128x16xbf16>
    %162 = arith.addf %159, %161 : vector<128x16xbf16>
    %cst_64 = arith.constant 0.000000e+00 : bf16
    %163 = vector.broadcast %cst_64 : bf16 to vector<128x16xbf16>
    %164 = arith.maximumf %162, %163 : vector<128x16xbf16>
    %c4_65 = arith.constant 4 : index
    %c0_66 = arith.constant 0 : index
    %c0_67 = arith.constant 0 : index
    %165 = vector.load %arg3[%c4_65, %c0_66, %c0_67] : memref<5x32x32xbf16, #tpu.memory_space<vmem>>, vector<1x16x8xbf16>
    %166 = vector.shape_cast %165 : vector<1x16x8xbf16> to vector<16x8xbf16>
    %cst_68 = arith.constant dense<0.000000e+00> : vector<128x8xf32>
    %167 = tpu.matmul %164, %166, %cst_68 {dimension_numbers = #tpu.dot_dimension_numbers<[1], [0], [0], [1], [0, 0, 1, 1], [], []>} : vector<128x16xbf16>, vector<16x8xbf16>, vector<128x8xf32> -> vector<128x8xf32>
    %c15 = arith.constant 15 : index
    %c0_69 = arith.constant 0 : index
    %168 = vector.load %arg4[%c15, %c0_69] : memref<20x32xf32, #tpu.memory_space<vmem>>, vector<1x8xf32>
    %c16 = arith.constant 16 : index
    %c0_70 = arith.constant 0 : index
    %169 = vector.load %arg4[%c16, %c0_70] : memref<20x32xf32, #tpu.memory_space<vmem>>, vector<1x8xf32>
    %c17 = arith.constant 17 : index
    %c0_71 = arith.constant 0 : index
    %170 = vector.load %arg4[%c17, %c0_71] : memref<20x32xf32, #tpu.memory_space<vmem>>, vector<1x8xf32>
    %171 = vector.broadcast %168 : vector<1x8xf32> to vector<128x8xf32>
    %172 = arith.addf %167, %171 : vector<128x8xf32>
    %cst_72 = arith.constant dense<0.000000e+00> : vector<128xf32>
    %173 = vector.multi_reduction <add>, %172, %cst_72 [1] : vector<128x8xf32> to vector<128xf32>
    %174 = vector.shape_cast %173 : vector<128xf32> to vector<128x1xf32>
    %cst_73 = arith.constant 8.000000e+00 : f32
    %175 = vector.broadcast %cst_73 : f32 to vector<128x1xf32>
    %176 = arith.divf %174, %175 : vector<128x1xf32>
    %177 = vector.broadcast %176 : vector<128x1xf32> to vector<128x8xf32>
    %178 = arith.subf %172, %177 : vector<128x8xf32>
    %179 = arith.mulf %178, %178 : vector<128x8xf32>
    %cst_74 = arith.constant dense<0.000000e+00> : vector<128xf32>
    %180 = vector.multi_reduction <add>, %179, %cst_74 [1] : vector<128x8xf32> to vector<128xf32>
    %181 = vector.shape_cast %180 : vector<128xf32> to vector<128x1xf32>
    %cst_75 = arith.constant 8.000000e+00 : f32
    %182 = vector.broadcast %cst_75 : f32 to vector<128x1xf32>
    %183 = arith.divf %181, %182 : vector<128x1xf32>
    %cst_76 = arith.constant 9.99999974E-6 : f32
    %184 = vector.broadcast %cst_76 : f32 to vector<128x1xf32>
    %185 = arith.addf %183, %184 : vector<128x1xf32>
    %186 = math.rsqrt %185 : vector<128x1xf32>
    %187 = vector.broadcast %169 : vector<1x8xf32> to vector<128x8xf32>
    %188 = vector.broadcast %186 : vector<128x1xf32> to vector<128x8xf32>
    %189 = arith.mulf %187, %188 : vector<128x8xf32>
    %190 = arith.truncf %178 : vector<128x8xf32> to vector<128x8xbf16>
    %191 = arith.truncf %189 : vector<128x8xf32> to vector<128x8xbf16>
    %192 = arith.mulf %190, %191 : vector<128x8xbf16>
    %193 = arith.truncf %170 : vector<1x8xf32> to vector<1x8xbf16>
    %194 = vector.broadcast %193 : vector<1x8xbf16> to vector<128x8xbf16>
    %195 = arith.addf %192, %194 : vector<128x8xbf16>
    %cst_77 = arith.constant 0.000000e+00 : bf16
    %196 = vector.broadcast %cst_77 : bf16 to vector<128x8xbf16>
    %197 = arith.maximumf %195, %196 : vector<128x8xbf16>
    %c19 = arith.constant 19 : index
    %c0_78 = arith.constant 0 : index
    %198 = vector.load %arg4[%c19, %c0_78] : memref<20x32xf32, #tpu.memory_space<vmem>>, vector<1x8xf32>
    %c18 = arith.constant 18 : index
    %c0_79 = arith.constant 0 : index
    %199 = vector.load %arg4[%c18, %c0_79] : memref<20x32xf32, #tpu.memory_space<vmem>>, vector<1x1xf32>
    %200 = arith.extf %197 : vector<128x8xbf16> to vector<128x8xf32>
    %201 = vector.broadcast %198 : vector<1x8xf32> to vector<128x8xf32>
    %202 = arith.mulf %200, %201 : vector<128x8xf32>
    %cst_80 = arith.constant dense<0.000000e+00> : vector<128xf32>
    %203 = vector.multi_reduction <add>, %202, %cst_80 [1] : vector<128x8xf32> to vector<128xf32>
    %204 = vector.shape_cast %203 : vector<128xf32> to vector<128x1xf32>
    %205 = vector.broadcast %199 : vector<1x1xf32> to vector<128x1xf32>
    %206 = arith.addf %204, %205 : vector<128x1xf32>
    %c0_81 = arith.constant 0 : index
    %c0_82 = arith.constant 0 : index
    %207 = vector.load %arg5[%c0_81, %c0_82] : memref<128x1xf32, #tpu.memory_space<vmem>>, vector<128x1xf32>
    tpu.vector_store %arg5[%c0_81, %c0_82], %206 {strides = array<i32>} : memref<128x1xf32, #tpu.memory_space<vmem>>, vector<128x1xf32>,
    return
  }
  func.func @transform_0(%arg0: i32) -> (i32, i32) {
    %c0_i32 = arith.constant 0 : i32
    %c0_i32_0 = arith.constant 0 : i32
    return %arg0, %c0_i32 : i32, i32
  }
  func.func @transform_1(%arg0: i32) -> (i32, i32) {
    %c0_i32 = arith.constant 0 : i32
    %c0_i32_0 = arith.constant 0 : i32
    %c0_i32_1 = arith.constant 0 : i32
    return %c0_i32, %c0_i32_0 : i32, i32
  }
  func.func @transform_2(%arg0: i32) -> (i32, i32, i32) {
    %c0_i32 = arith.constant 0 : i32
    %c0_i32_0 = arith.constant 0 : i32
    %c0_i32_1 = arith.constant 0 : i32
    %c0_i32_2 = arith.constant 0 : i32
    return %c0_i32, %c0_i32_0, %c0_i32_1 : i32, i32, i32
  }
  func.func @transform_3(%arg0: i32) -> (i32, i32) {
    %c0_i32 = arith.constant 0 : i32
    %c0_i32_0 = arith.constant 0 : i32
    %c0_i32_1 = arith.constant 0 : i32
    return %c0_i32, %c0_i32_0 : i32, i32
  }
  func.func @transform_4(%arg0: i32) -> (i32, i32) {
    %c0_i32 = arith.constant 0 : i32
    %c0_i32_0 = arith.constant 0 : i32
    return %arg0, %c0_i32 : i32, i32
  }
}

</mosaic_0001>

<bundles_post_ra>
// kernel: trajectory_reward_net.1
= control target key start
LH: loop header
LB: loop body
LE: loop exit
PB: predicated region body
PF: predicated region fallthrough
CT: control target
= control target key end

     0   :  { %9 = vsyncpa [#allocation3], 0  ;;  %s3126_s15 = smov [#allocation2]   ;;  %s4824_s0 = inlined_call_operand.vmem [shape: bf16[128,16], index: 0, kind: input, shape index: {}]   ;;  %s4825_s1 = inlined_call_operand.vmem [shape: bf16[16,32], index: 1, kind: input, shape index: {}]   ;;  %s4826_s2 = inlined_call_operand.hbm [shape: bf16[5,32,32], index: 2, kind: input, shape index: {}]   ;;  %s4827_s3 = inlined_call_operand.vmem [shape: f32[20,32], index: 3, kind: input, shape index: {}]   ;;  %s4828_s4 = inlined_call_operand.vmem [shape: f32[128,1], index: 4, kind: output, shape index: {}]  }
   0x1   :  { %s19_s16 = sshll.u32 %s3126_s15, 4  ;;  %s3102_s19 = scalar_lea.hbm %s4826_s2, 1280  ;;  %s20_s16 = int_to_ptr.vmem [resolvable:$true] %s19_s16 }
   0x2   :  { %p3103_p0 = scmp.ne.s32.totalorder %s4826_s2, %s3102_s19  ;;  %p3106_p1 = scmp.lt.u32.totalorder %s3102_s19, %s4826_s2 }
   0x4   :  { %p3108_p2 = pnand %p3106_p1, %p3103_p0 }
   0x6   :  { %3111 = shalt.err (!%p3108_p2)
}
   0x7   :  { %s3112_s24 = scalar_lea.vmem %s20_s16, 1280  ;;  %p3117_p4 = scmp.lt.s32.totalorder %s20_s16, %s20_s16 }
   0x8   :  { %p3113_p3 = scmp.ne.s32.totalorder %s20_s16, %s3112_s24  ;;  %p3118_p5 = scmp.lt.s32.totalorder %s3112_s24, %s3112_s24 }
   0xa   :  { %p3119_p6 = por %p3118_p5, %p3117_p4 }
   0xc   :  { %p3120_p7 = pnand %p3119_p6, %p3113_p3 }
   0xe   :  { %3123 = shalt.err (!%p3120_p7)
}
   0xf   :  { %s3127_s25 = smov 64   ;;  %s3128_s26 = smov 4  }
  0x10   :  { %25 = dma.hbm_to_vmem [thread:$0]  %s4826_s2, 1280, %s20_s16, [#allocation3], %s3127_s25, %s3127_s25, %s3128_s26  }
  0x11   :  { %3124 = dma.done.wait [#allocation3], 1280  }
  0x12   :  { %3125 = vsyncadd [#allocation3], 4294966016  ;;  %v2892_v0 = vld [vmem:[%s4825_s1] sm:$0xff]   ;;  %vm103_vm0 = vcmask 130048   ;;  %v2894_v2 = vld [vmem:[%s4824_s0 + $0x8] sm:$0xff]   ;;  %vm225_vm1 = vcmask 261120  }
  0x13   :  { %v2893_v1 = vld [vmem:[%s4824_s0] sm:$0xff]   ;;  %2772 = vmatprep.subr.bf16.mxu0 %v2892_v0  ;;  %v2895_v3 = vld [vmem:[%s4824_s0 + $0x10] sm:$0xff]   ;;  %v2896_v4 = vld [vmem:[%s4824_s0 + $0x18] sm:$0xff]   ;;  %vm2244_vm2 = vcmask 64512   ;;  %vm2612_vm3 = vcmask 7168  }
  0x14   :  { %2773 = vmatpush3.bf16.msra.mxu0 %v2892_v0  ;;  %2774 = vmatprep.mubr.msk.bf16.mxu0 %vm103_vm0, %v2893_v1  ;;  %v2897_v5 = vld [vmem:[%s4824_s0 + $0x20] sm:$0xff]   ;;  %v2898_v6 = vld [vmem:[%s4824_s0 + $0x28] sm:$0xff]   ;;  %v2899_v7 = vld [vmem:[%s4824_s0 + $0x30] sm:$0xff]  }
  0x15   :  { %v2900_v8 = vld [vmem:[%s4824_s0 + $0x38] sm:$0xff]   ;;  %v2634_v9 = vld [vmem:[%s4827_s3] ss:$0 sm:$0xff] }
  0x17   :  { %2775 = vmatmul.mubr.msk.bf16.vlgmr.msra.gmra.mrb[0].mxu0 %vm103_vm0, %v2894_v2 }
  0x18   :  { %2778 = vmatprep.mubr.msk.bf16.mxu0 %vm103_vm0, %v2895_v3 }
  0x1f   :  { %2779 = vmatmul.mubr.msk.bf16.gmra.mrb[4].mxu0 %vm103_vm0, %v2896_v4 }
  0x20   :  { %2782 = vmatprep.mubr.msk.bf16.mxu0 %vm103_vm0, %v2897_v5 }
  0x27   :  { %2783 = vmatmul.mubr.msk.bf16.gmra.mrb[8].mxu0 %vm103_vm0, %v2898_v6 }
  0x28   :  { %2786 = vmatprep.mubr.msk.bf16.mxu0 %vm103_vm0, %v2899_v7 }
  0x2f   :  { %2787 = vmatmul.mubr.msk.bf16.gmra.mrb[12].mxu0 %vm103_vm0, %v2900_v8 }
  0xea   :  { %v2776_v10 = vpop.f32.mrb[0].mxu0 }
  0xeb   :  { %v3205_v11 = vadd.f32 %v2776_v10, %v2634_v9  ;;  %v162_v12 = vpop.f32.mrb[1].mxu0 }
  0xec   :  { %v3207_v13 = vadd.f32 %v2634_v9, %v162_v12  ;;  %v2777_v14 = vpop.f32.mrb[2].mxu0 }
  0xed   :  { %v3209_v15 = vadd.f32 %v2777_v14, %v2634_v9  ;;  %v165_v16 = vpop.f32.mrb[3].mxu0  ;;  %v232_v17 = vsel %vm225_vm1, %v3205_v11, 0.0 }
  0xee   :  { %v3213_v18 = vadd.f32 %v2634_v9, %v165_v16  ;;  %233 = vadd.xlane.f32.xlu1 %v232_v17  ;;  %v226_v19 = vsel %vm225_vm1, %v3207_v13, 0.0 }
  0xef   :  { %227 = vadd.xlane.f32.xlu0 %v226_v19  ;;  %v235_v20 = vsel %vm225_vm1, %v3209_v15, 0.0 }
  0xf0   :  { %v229_v22 = vsel %vm225_vm1, %v3213_v18, 0.0 }
  0xf2   :  { %236 = vadd.xlane.f32.xlu1 %v235_v20  ;;  %v2780_v21 = vpop.f32.mrb[4].mxu0 }
  0xf3   :  { %v178_v23 = vpop.f32.mrb[5].mxu0  ;;  %230 = vadd.xlane.f32.xlu0 %v229_v22  ;;  %v3223_v27 = vadd.f32 %v2780_v21, %v2634_v9 }
  0xf4   :  { %v3221_v24 = vadd.f32 %v2634_v9, %v178_v23  ;;  %v2781_v25 = vpop.f32.mrb[6].mxu0 }
  0xf5   :  { %v181_v26 = vpop.f32.mrb[7].mxu0  ;;  %v3229_v30 = vadd.f32 %v2781_v25, %v2634_v9  ;;  %v244_v33 = vsel %vm225_vm1, %v3223_v27, 0.0 }
  0xf6   :  { %v3225_v28 = vadd.f32 %v2634_v9, %v181_v26  ;;  %v238_v29 = vsel %vm225_vm1, %v3221_v24, 0.0 }
  0xf7   :  { %239 = vadd.xlane.f32.xlu0 %v238_v29  ;;  %v247_v37 = vsel %vm225_vm1, %v3229_v30, 0.0 }
  0xf8   :  { %v241_v31 = vsel %vm225_vm1, %v3225_v28, 0.0 }
  0xf9   :  { %242 = vadd.xlane.f32.xlu1 %v241_v31 }
  0xfa   :  { %v2784_v32 = vpop.f32.mrb[8].mxu0 }
  0xfb   :  { %v194_v34 = vpop.f32.mrb[9].mxu0  ;;  %245 = vadd.xlane.f32.xlu0 %v244_v33  ;;  %v3239_v39 = vadd.f32 %v2784_v32, %v2634_v9 }
  0xfc   :  { %v3235_v35 = vadd.f32 %v2634_v9, %v194_v34  ;;  %v2785_v36 = vpop.f32.mrb[10].mxu0 }
  0xfd   :  { %v197_v38 = vpop.f32.mrb[11].mxu0  ;;  %248 = vadd.xlane.f32.xlu1 %v247_v37  ;;  %v3245_v42 = vadd.f32 %v2785_v36, %v2634_v9  ;;  %v256_v45 = vsel %vm225_vm1, %v3239_v39, 0.0 }
  0xfe   :  { %v3241_v40 = vadd.f32 %v2634_v9, %v197_v38  ;;  %v250_v41 = vsel %vm225_vm1, %v3235_v35, 0.0 }
  0xff   :  { %251 = vadd.xlane.f32.xlu0 %v250_v41  ;;  %v259_v49 = vsel %vm225_vm1, %v3245_v42, 0.0 }
 0x100   :  { %v253_v43 = vsel %vm225_vm1, %v3241_v40, 0.0 }
 0x101   :  { %254 = vadd.xlane.f32.xlu1 %v253_v43 }
 0x102   :  { %v2788_v44 = vpop.f32.mrb[12].mxu0 }
 0x103   :  { %v210_v46 = vpop.f32.mrb[13].mxu0  ;;  %257 = vadd.xlane.f32.xlu0 %v256_v45  ;;  %v3255_v51 = vadd.f32 %v2788_v44, %v2634_v9 }
 0x104   :  { %v3251_v47 = vadd.f32 %v2634_v9, %v210_v46  ;;  %v2789_v48 = vpop.f32.mrb[14].mxu0 }
 0x105   :  { %v213_v50 = vpop.f32.mrb[15].mxu0  ;;  %260 = vadd.xlane.f32.xlu1 %v259_v49  ;;  %v3261_v54 = vadd.f32 %v2789_v48, %v2634_v9  ;;  %v268_v56 = vsel %vm225_vm1, %v3255_v51, 0.0 }
 0x106   :  { %v3257_v52 = vadd.f32 %v2634_v9, %v213_v50  ;;  %v262_v53 = vsel %vm225_vm1, %v3251_v47, 0.0 }
 0x107   :  { %263 = vadd.xlane.f32.xlu0 %v262_v53  ;;  %v271_v57 = vsel %vm225_vm1, %v3261_v54, 0.0 }
 0x108   :  { %v265_v55 = vsel %vm225_vm1, %v3257_v52, 0.0 }
 0x109   :  { %266 = vadd.xlane.f32.xlu1 %v265_v55 }
 0x10b   :  { %269 = vadd.xlane.f32.xlu0 %v268_v56 }
 0x10d   :  { %272 = vadd.xlane.f32.xlu1 %v271_v57 }
 0x17b   :  { %v234_v58 = vpop.xlane.xlu1 %233 }
 0x17c   :  { %v277_v59 = vmul.f32 0.03125, %v234_v58  ;;  %v228_v60 = vpop.xlane.xlu0 %227 }
 0x17d   :  { %v275_v61 = vmul.f32 0.03125, %v228_v60 }
 0x17e   :  { %v3270_v62 = vsub.f32 %v3205_v11, %v277_v59 }
 0x17f   :  { %v3273_v63 = vsub.f32 %v3207_v13, %v275_v61  ;;  %v237_v0 = vpop.xlane.xlu1 %236 }
 0x180   :  { %v278_v1 = vmul.f32 0.03125, %v237_v0  ;;  %v231_v2 = vpop.xlane.xlu0 %230  ;;  %v309_v8 = vmul.f32 %v3270_v62, %v3270_v62 }
 0x181   :  { %v276_v3 = vmul.f32 0.03125, %v231_v2  ;;  %v307_v4 = vmul.f32 %v3273_v63, %v3273_v63 }
 0x182   :  { %v3278_v5 = vsub.f32 %v3209_v15, %v278_v1 }
 0x183   :  { %v3281_v6 = vsub.f32 %v3213_v18, %v276_v3  ;;  %v323_v7 = vsel %vm225_vm1, %v307_v4, 0.0  ;;  %v329_v18 = vsel %vm225_vm1, %v309_v8, 0.0 }
 0x184   :  { %v440_v9 = vpack.c.bf16 %v3278_v5, %v3270_v62  ;;  %324 = vadd.xlane.f32.xlu0 %v323_v7  ;;  %v240_v10 = vpop.xlane.xlu0 %239  ;;  %v310_v15 = vmul.f32 %v3278_v5, %v3278_v5 }
 0x185   :  { %v439_v11 = vpack.c.bf16 %v3281_v6, %v3273_v63  ;;  %v279_v12 = vmul.f32 0.03125, %v240_v10  ;;  %v308_v13 = vmul.f32 %v3281_v6, %v3281_v6 }
 0x186   :  { %v243_v14 = vpop.xlane.xlu1 %242  ;;  %v332_v26 = vsel %vm225_vm1, %v310_v15, 0.0 }
 0x187   :  { %v3295_v16 = vsub.f32 %v3221_v24, %v279_v12  ;;  %v280_v17 = vmul.f32 0.03125, %v243_v14  ;;  %v326_v19 = vsel %vm225_vm1, %v308_v13, 0.0 }
 0x188   :  { %330 = vadd.xlane.f32.xlu0 %v329_v18  ;;  %327 = vadd.xlane.f32.xlu1 %v326_v19  ;;  %v246_v20 = vpop.xlane.xlu0 %245 }
 0x189   :  { %v3300_v21 = vsub.f32 %v3225_v28, %v280_v17  ;;  %v281_v22 = vmul.f32 0.03125, %v246_v20  ;;  %v311_v23 = vmul.f32 %v3295_v16, %v3295_v16 }
 0x18a   :  { %v249_v25 = vpop.xlane.xlu1 %248 }
 0x18b   :  { %v441_v24 = vpack.c.bf16 %v3300_v21, %v3295_v16  ;;  %v3308_v29 = vsub.f32 %v3223_v27, %v281_v22  ;;  %v282_v31 = vmul.f32 0.03125, %v249_v25  ;;  %v335_v32 = vsel %vm225_vm1, %v311_v23, 0.0 }
 0x18c   :  { %333 = vadd.xlane.f32.xlu1 %v332_v26  ;;  %336 = vadd.xlane.f32.xlu0 %v335_v32  ;;  %v252_v28 = vpop.xlane.xlu0 %251  ;;  %v312_v33 = vmul.f32 %v3300_v21, %v3300_v21  ;;  %v2902_v32 = vld [vmem:[#allocation2 + $0x8] sm:$0xff]  }
 0x18d   :  { %v3314_v34 = vsub.f32 %v3229_v30, %v282_v31  ;;  %v283_v36 = vmul.f32 0.03125, %v252_v28  ;;  %v313_v37 = vmul.f32 %v3308_v29, %v3308_v29 }
 0x18e   :  { %v255_v38 = vpop.xlane.xlu1 %254  ;;  %v338_v27 = vsel %vm225_vm1, %v312_v33, 0.0 }
 0x18f   :  { %v442_v41 = vpack.c.bf16 %v3314_v34, %v3308_v29  ;;  %v3322_v43 = vsub.f32 %v3235_v35, %v283_v36  ;;  %v284_v44 = vmul.f32 0.03125, %v255_v38  ;;  %v341_v45 = vsel %vm225_vm1, %v313_v37, 0.0 }
 0x190   :  { %339 = vadd.xlane.f32.xlu1 %v338_v27  ;;  %342 = vadd.xlane.f32.xlu0 %v341_v45  ;;  %v258_v30 = vpop.xlane.xlu0 %257  ;;  %v314_v46 = vmul.f32 %v3314_v34, %v3314_v34 }
 0x191   :  { %v3328_v48 = vsub.f32 %v3241_v40, %v284_v44  ;;  %v285_v49 = vmul.f32 0.03125, %v258_v30  ;;  %v315_v50 = vmul.f32 %v3322_v43, %v3322_v43 }
 0x192   :  { %v261_v53 = vpop.xlane.xlu1 %260  ;;  %v344_v35 = vsel %vm225_vm1, %v314_v46, 0.0 }
 0x193   :  { %v443_v55 = vpack.c.bf16 %v3328_v48, %v3322_v43  ;;  %v3336_v56 = vsub.f32 %v3239_v39, %v285_v49  ;;  %v286_v57 = vmul.f32 0.03125, %v261_v53  ;;  %v347_v58 = vsel %vm225_vm1, %v315_v50, 0.0 }
 0x194   :  { %345 = vadd.xlane.f32.xlu1 %v344_v35  ;;  %348 = vadd.xlane.f32.xlu0 %v347_v58  ;;  %v264_v40 = vpop.xlane.xlu0 %263  ;;  %v316_v59 = vmul.f32 %v3328_v48, %v3328_v48  ;;  %v467_v35 = vlaneseq }
 0x195   :  { %v3342_v60 = vsub.f32 %v3245_v42, %v286_v57  ;;  %v287_v61 = vmul.f32 0.03125, %v264_v40  ;;  %v317_v0 = vmul.f32 %v3336_v56, %v3336_v56  ;;  %v52_v40 = vld [vmem:[%s4827_s3 + $0x2] sm:$0x1] }
 0x196   :  { %v267_v1 = vpop.xlane.xlu1 %266  ;;  %v350_v39 = vsel %vm225_vm1, %v316_v59, 0.0 }
 0x197   :  { %v444_v2 = vpack.c.bf16 %v3342_v60, %v3336_v56  ;;  %v3350_v3 = vsub.f32 %v3251_v47, %v287_v61  ;;  %v288_v4 = vmul.f32 0.03125, %v267_v1  ;;  %v353_v7 = vsel %vm225_vm1, %v317_v0, 0.0 }
 0x198   :  { %351 = vadd.xlane.f32.xlu1 %v350_v39  ;;  %354 = vadd.xlane.f32.xlu0 %v353_v7  ;;  %v270_v42 = vpop.xlane.xlu0 %269  ;;  %v318_v8 = vmul.f32 %v3342_v60, %v3342_v60  ;;  %v463_v39 = vpack.c.bf16 %v52_v40, %v52_v40 }
 0x199   :  { %v3356_v10 = vsub.f32 %v3257_v52, %v288_v4  ;;  %v289_v12 = vmul.f32 0.03125, %v270_v42  ;;  %v319_v13 = vmul.f32 %v3350_v3, %v3350_v3  ;;  %v468_v4 = vshrl.u32 %v467_v35, 7 }
 0x19a   :  { %v273_v14 = vpop.xlane.xlu1 %272  ;;  %v356_v47 = vsel %vm225_vm1, %v318_v8, 0.0 }
 0x19b   :  { %v445_v15 = vpack.c.bf16 %v3356_v10, %v3350_v3  ;;  %v3364_v17 = vsub.f32 %v3255_v51, %v289_v12  ;;  %v290_v18 = vmul.f32 0.03125, %v273_v14  ;;  %v359_v19 = vsel %vm225_vm1, %v319_v13, 0.0  ;;  %v3387_v14 = vld [vmem:[%s4827_s3 + $0x1] ss:$0 sm:$0xff]  ;;  %v2653_v3 = vld [vmem:[%s4827_s3 + $0x3] ss:$0 sm:$0xff] }
 0x19c   :  { %357 = vadd.xlane.f32.xlu1 %v356_v47  ;;  %360 = vadd.xlane.f32.xlu0 %v359_v19  ;;  %v320_v52 = vmul.f32 %v3356_v10, %v3356_v10  ;;  %v465_v19 = vpack.i.b16 %v463_v39, %v463_v39 }
 0x19d   :  { %v3370_v20 = vsub.f32 %v3261_v54, %v290_v18  ;;  %v321_v22 = vmul.f32 %v3364_v17, %v3364_v17  ;;  %v2901_v54 = vld [vmem:[#allocation2] sm:$0xff]  }
 0x19e   :  { %v362_v51 = vsel %vm225_vm1, %v320_v52, 0.0  ;;  %2790 = vmatprep.subr.bf16.mxu1 %v2901_v54  ;;  %v3389_v52 = vsub.s32 0, %v468_v4 }
 0x19f   :  { %v446_v23 = vpack.c.bf16 %v3370_v20, %v3364_v17  ;;  %v365_v25 = vsel %vm225_vm1, %v321_v22, 0.0  ;;  %v322_v26 = vmul.f32 %v3370_v20, %v3370_v20  ;;  %2791 = vmatpush3.bf16.msra.mxu1 %v2901_v54 }
 0x1a0   :  { %363 = vadd.xlane.f32.xlu1 %v362_v51  ;;  %366 = vadd.xlane.f32.xlu0 %v365_v25 }
 0x1a1   :  { %v368_v31 = vsel %vm225_vm1, %v322_v26, 0.0  ;;  %2792 = vmatprep.subr.bf16.mxu1 %v2902_v32 }
 0x1a3   :  { %2793 = vmatpush3.bf16.msra.mxu1 %v2902_v32 }
 0x1a4   :  { %369 = vadd.xlane.f32.xlu1 %v368_v31 }
 0x211   :  { %v325_v28 = vpop.xlane.xlu0 %324 }
 0x212   :  { %v371_v33 = vmul.f32 0.03125, %v325_v28 }
 0x214   :  { %v387_v36 = vadd.f32 1e-05, %v371_v33 }
 0x215   :  { %v328_v37 = vpop.xlane.xlu1 %327  ;;  %v331_v38 = vpop.xlane.xlu0 %330 }
 0x216   :  { %v372_v27 = vmul.f32 0.03125, %v328_v37  ;;  %v373_v44 = vmul.f32 0.03125, %v331_v38  ;;  %2910 = vrsqrt.f32 %v387_v36  ;;  %v3394_v38 = vrot.slane %v465_v19, %v3389_v52 }
 0x218   :  { %v388_v45 = vadd.f32 1e-05, %v372_v27  ;;  %v389_v30 = vadd.f32 1e-05, %v373_v44 }
 0x219   :  { %v334_v46 = vpop.xlane.xlu1 %333  ;;  %v337_v49 = vpop.xlane.xlu0 %336 }
 0x21a   :  { %2912 = vrsqrt.f32 %v388_v45  ;;  %v374_v50 = vmul.f32 0.03125, %v334_v46  ;;  %v375_v53 = vmul.f32 0.03125, %v337_v49 }
 0x21b   :  { %2914 = vrsqrt.f32 %v389_v30 }
 0x21c   :  { %v390_v57 = vadd.f32 1e-05, %v374_v50  ;;  %v391_v58 = vadd.f32 1e-05, %v375_v53 }
 0x21d   :  { %v340_v59 = vpop.xlane.xlu1 %339  ;;  %v343_v61 = vpop.xlane.xlu0 %342 }
 0x21e   :  { %2916 = vrsqrt.f32 %v390_v57  ;;  %v376_v0 = vmul.f32 0.03125, %v340_v59  ;;  %v377_v1 = vmul.f32 0.03125, %v343_v61 }
 0x21f   :  { %2918 = vrsqrt.f32 %v391_v58 }
 0x220   :  { %v392_v7 = vadd.f32 1e-05, %v376_v0  ;;  %v393_v42 = vadd.f32 1e-05, %v377_v1  ;;  %v2911_v13 = vpop.eup %2910 }
 0x221   :  { %v346_v8 = vpop.xlane.xlu1 %345  ;;  %v349_v12 = vpop.xlane.xlu0 %348  ;;  %v423_v54 = vmul.f32 %v2911_v13, %v3387_v14 }
 0x222   :  { %2920 = vrsqrt.f32 %v392_v7  ;;  %v378_v47 = vmul.f32 0.03125, %v346_v8  ;;  %v379_v18 = vmul.f32 0.03125, %v349_v12  ;;  %v3129_v8 = vmov 0  }
 0x223   :  { %2922 = vrsqrt.f32 %v393_v42 }
 0x224   :  { %v2913_v22 = vpop.eup %2912  ;;  %v394_v51 = vadd.f32 1e-05, %v378_v47  ;;  %v395_v25 = vadd.f32 1e-05, %v379_v18 }
 0x225   :  { %v352_v26 = vpop.xlane.xlu1 %351  ;;  %v355_v31 = vpop.xlane.xlu0 %354  ;;  %v424_v32 = vmul.f32 %v2913_v22, %v3387_v14 }
 0x226   :  { %v2915_v28 = vpop.eup %2914  ;;  %2924 = vrsqrt.f32 %v394_v51  ;;  %v380_v33 = vmul.f32 0.03125, %v352_v26  ;;  %v381_v36 = vmul.f32 0.03125, %v355_v31 }
 0x227   :  { %v447_v37 = vpack.c.bf16 %v424_v32, %v423_v54  ;;  %2926 = vrsqrt.f32 %v395_v25  ;;  %v425_v30 = vmul.f32 %v2915_v28, %v3387_v14 }
 0x228   :  { %v2917_v27 = vpop.eup %2916  ;;  %v396_v44 = vadd.f32 1e-05, %v380_v33  ;;  %v397_v45 = vadd.f32 1e-05, %v381_v36 }
 0x229   :  { %v426_v46 = vmul.f32 %v2917_v27, %v3387_v14  ;;  %v358_v49 = vpop.xlane.xlu1 %357  ;;  %v361_v50 = vpop.xlane.xlu0 %360  ;;  %v455_v53 = vmul.bf16 %v447_v37, %v439_v11 }
 0x22a   :  { %v2919_v35 = vpop.eup %2918  ;;  %2928 = vrsqrt.f32 %v396_v44  ;;  %v382_v57 = vmul.f32 0.03125, %v358_v49  ;;  %v383_v58 = vmul.f32 0.03125, %v361_v50 }
 0x22b   :  { %v471_v40 = vadd.bf16 %v3394_v38, %v455_v53  ;;  %v448_v59 = vpack.c.bf16 %v426_v46, %v425_v30  ;;  %2930 = vrsqrt.f32 %v397_v45  ;;  %v427_v39 = vmul.f32 %v2919_v35, %v3387_v14 }
 0x22c   :  { %v2921_v61 = vpop.eup %2920  ;;  %v398_v0 = vadd.f32 1e-05, %v382_v57  ;;  %v399_v1 = vadd.f32 1e-05, %v383_v58 }
 0x22d   :  { %v428_v4 = vmul.f32 %v2921_v61, %v3387_v14  ;;  %v364_v7 = vpop.xlane.xlu1 %363  ;;  %v367_v42 = vpop.xlane.xlu0 %366  ;;  %v479_v63 = vmax.bf16 %v3129_v8, %v471_v40  ;;  %v456_v6 = vmul.bf16 %v448_v59, %v440_v9 }
 0x22e   :  { %v2923_v11 = vpop.eup %2922  ;;  %2932 = vrsqrt.f32 %v398_v0  ;;  %v384_v12 = vmul.f32 0.03125, %v364_v7  ;;  %v385_v13 = vmul.f32 0.03125, %v367_v42 }
 0x22f   :  { %2794 = vmatprep.mubr.msk.bf16.mxu1 %vm225_vm1, %v479_v63  ;;  %v472_v47 = vadd.bf16 %v3394_v38, %v456_v6  ;;  %v449_v18 = vpack.c.bf16 %v428_v4, %v427_v39  ;;  %2934 = vrsqrt.f32 %v399_v1  ;;  %v429_v25 = vmul.f32 %v2923_v11, %v3387_v14 }
 0x230   :  { %v2925_v19 = vpop.eup %2924  ;;  %v400_v22 = vadd.f32 1e-05, %v384_v12  ;;  %v401_v51 = vadd.f32 1e-05, %v385_v13 }
 0x231   :  { %v430_v26 = vmul.f32 %v2925_v19, %v3387_v14  ;;  %v370_v31 = vpop.xlane.xlu1 %369  ;;  %v480_v62 = vmax.bf16 %v3129_v8, %v472_v47  ;;  %v457_v5 = vmul.bf16 %v449_v18, %v441_v24  ;;  %v2927_v9 = vpop.eup %2926 }
 0x232   :  { %2936 = vrsqrt.f32 %v400_v22  ;;  %v386_v54 = vmul.f32 0.03125, %v370_v31  ;;  %v431_v37 = vmul.f32 %v2927_v9, %v3387_v14 }
 0x233   :  { %2795 = vmatmul.mubr.msk.bf16.vlgmr.msra.gmra.mrb[0].mxu1 %vm225_vm1, %v480_v62  ;;  %v473_v32 = vadd.bf16 %v3394_v38, %v457_v5  ;;  %v450_v28 = vpack.c.bf16 %v430_v26, %v429_v25  ;;  %2938 = vrsqrt.f32 %v401_v51 }
 0x234   :  { %v2929_v33 = vpop.eup %2928  ;;  %v402_v36 = vadd.f32 1e-05, %v386_v54 }
 0x235   :  { %v432_v27 = vmul.f32 %v2929_v33, %v3387_v14  ;;  %v481_v44 = vmax.bf16 %v3129_v8, %v473_v32  ;;  %v458_v16 = vmul.bf16 %v450_v28, %v442_v41  ;;  %v2931_v21 = vpop.eup %2930 }
 0x236   :  { %2940 = vrsqrt.f32 %v402_v36  ;;  %v433_v46 = vmul.f32 %v2931_v21, %v3387_v14 }
 0x237   :  { %2798 = vmatprep.mubr.msk.bf16.mxu1 %vm225_vm1, %v481_v44  ;;  %v474_v24 = vadd.bf16 %v3394_v38, %v458_v16  ;;  %v451_v45 = vpack.c.bf16 %v432_v27, %v431_v37 }
 0x238   :  { %v2933_v30 = vpop.eup %2932 }
 0x239   :  { %v434_v49 = vmul.f32 %v2933_v30, %v3387_v14  ;;  %v482_v50 = vmax.bf16 %v3129_v8, %v474_v24  ;;  %v459_v53 = vmul.bf16 %v451_v45, %v443_v55  ;;  %v2935_v29 = vpop.eup %2934 }
 0x23a   :  { %v435_v57 = vmul.f32 %v2935_v29, %v3387_v14 }
 0x23b   :  { %2799 = vmatmul.mubr.msk.bf16.gmra.mrb[4].mxu1 %vm225_vm1, %v482_v50  ;;  %v475_v34 = vadd.bf16 %v3394_v38, %v459_v53  ;;  %v452_v41 = vpack.c.bf16 %v434_v49, %v433_v46 }
 0x23c   :  { %v2937_v35 = vpop.eup %2936 }
 0x23d   :  { %v436_v58 = vmul.f32 %v2937_v35, %v3387_v14  ;;  %v483_v40 = vmax.bf16 %v3129_v8, %v475_v34  ;;  %v460_v59 = vmul.bf16 %v452_v41, %v444_v2  ;;  %v2939_v61 = vpop.eup %2938 }
 0x23e   :  { %v437_v0 = vmul.f32 %v2939_v61, %v3387_v14 }
 0x23f   :  { %2802 = vmatprep.mubr.msk.bf16.mxu1 %vm225_vm1, %v483_v40  ;;  %v476_v43 = vadd.bf16 %v3394_v38, %v460_v59  ;;  %v453_v48 = vpack.c.bf16 %v436_v58, %v435_v57 }
 0x240   :  { %v2941_v55 = vpop.eup %2940 }
 0x241   :  { %v438_v1 = vmul.f32 %v2941_v55, %v3387_v14  ;;  %v484_v39 = vmax.bf16 %v3129_v8, %v476_v43  ;;  %v461_v4 = vmul.bf16 %v453_v48, %v445_v15  ;;  %v2903_v43 = vld [vmem:[#allocation2 + $0x10] sm:$0xff]  }
 0x242   :  { %2810 = vmatprep.subr.bf16.mxu0 %v2903_v43 }
 0x243   :  { %2803 = vmatmul.mubr.msk.bf16.gmra.mrb[8].mxu1 %vm225_vm1, %v484_v39  ;;  %v477_v56 = vadd.bf16 %v3394_v38, %v461_v4  ;;  %v454_v60 = vpack.c.bf16 %v438_v1, %v437_v0  ;;  %2811 = vmatpush3.bf16.msra.mxu0 %v2903_v43 }
 0x245   :  { %v485_v2 = vmax.bf16 %v3129_v8, %v477_v56  ;;  %v462_v7 = vmul.bf16 %v454_v60, %v446_v23 }
 0x247   :  { %2806 = vmatprep.mubr.msk.bf16.mxu1 %vm225_vm1, %v485_v2  ;;  %v478_v14 = vadd.bf16 %v3394_v38, %v462_v7 }
 0x249   :  { %v486_v42 = vmax.bf16 %v3129_v8, %v478_v14 }
 0x24b   :  { %2807 = vmatmul.mubr.msk.bf16.gmra.mrb[12].mxu1 %vm225_vm1, %v486_v42 }
 0x306   :  { %v2796_v10 = vpop.f32.mrb[0].mxu1 }
 0x307   :  { %v568_v15 = vpop.f32.mrb[1].mxu1  ;;  %v3463_v17 = vadd.f32 %v2796_v10, %v2653_v3 }
 0x308   :  { %v3461_v63 = vadd.f32 %v2653_v3, %v568_v15  ;;  %v2797_v6 = vpop.f32.mrb[2].mxu1 }
 0x309   :  { %v571_v11 = vpop.f32.mrb[3].mxu1  ;;  %v3469_v38 = vadd.f32 %v2797_v6, %v2653_v3  ;;  %v637_v47 = vsel %vm225_vm1, %v3463_v17, 0.0 }
 0x30a   :  { %v3465_v20 = vadd.f32 %v2653_v3, %v571_v11  ;;  %v631_v23 = vsel %vm225_vm1, %v3461_v63, 0.0 }
 0x30b   :  { %632 = vadd.xlane.f32.xlu0 %v631_v23  ;;  %v640_v51 = vsel %vm225_vm1, %v3469_v38, 0.0 }
 0x30c   :  { %v634_v12 = vsel %vm225_vm1, %v3465_v20, 0.0 }
 0x30d   :  { %635 = vadd.xlane.f32.xlu1 %v634_v12 }
 0x30e   :  { %v2800_v13 = vpop.f32.mrb[4].mxu1 }
 0x30f   :  { %638 = vadd.xlane.f32.xlu0 %v637_v47  ;;  %v584_v18 = vpop.f32.mrb[5].mxu1  ;;  %v3479_v26 = vadd.f32 %v2800_v13, %v2653_v3 }
 0x310   :  { %v3475_v19 = vadd.f32 %v2653_v3, %v584_v18  ;;  %v2801_v22 = vpop.f32.mrb[6].mxu1 }
 0x311   :  { %641 = vadd.xlane.f32.xlu1 %v640_v51  ;;  %v587_v25 = vpop.f32.mrb[7].mxu1  ;;  %v3485_v5 = vadd.f32 %v2801_v22, %v2653_v3  ;;  %v649_v32 = vsel %vm225_vm1, %v3479_v26, 0.0 }
 0x312   :  { %v3481_v31 = vadd.f32 %v2653_v3, %v587_v25  ;;  %v643_v62 = vsel %vm225_vm1, %v3475_v19, 0.0 }
 0x313   :  { %644 = vadd.xlane.f32.xlu0 %v643_v62  ;;  %v652_v37 = vsel %vm225_vm1, %v3485_v5, 0.0 }
 0x314   :  { %v646_v9 = vsel %vm225_vm1, %v3481_v31, 0.0 }
 0x315   :  { %647 = vadd.xlane.f32.xlu1 %v646_v9 }
 0x316   :  { %v2804_v54 = vpop.f32.mrb[8].mxu1 }
 0x317   :  { %650 = vadd.xlane.f32.xlu0 %v649_v32  ;;  %v600_v28 = vpop.f32.mrb[9].mxu1  ;;  %v3495_v44 = vadd.f32 %v2804_v54, %v2653_v3 }
 0x318   :  { %v3491_v33 = vadd.f32 %v2653_v3, %v600_v28  ;;  %v2805_v36 = vpop.f32.mrb[10].mxu1 }
 0x319   :  { %653 = vadd.xlane.f32.xlu1 %v652_v37  ;;  %v603_v27 = vpop.f32.mrb[11].mxu1  ;;  %v3501_v24 = vadd.f32 %v2805_v36, %v2653_v3  ;;  %v661_v46 = vsel %vm225_vm1, %v3495_v44, 0.0 }
 0x31a   :  { %v3497_v16 = vadd.f32 %v2653_v3, %v603_v27  ;;  %v655_v21 = vsel %vm225_vm1, %v3491_v33, 0.0 }
 0x31b   :  { %656 = vadd.xlane.f32.xlu0 %v655_v21  ;;  %v664_v29 = vsel %vm225_vm1, %v3501_v24, 0.0 }
 0x31c   :  { %v658_v45 = vsel %vm225_vm1, %v3497_v16, 0.0 }
 0x31d   :  { %659 = vadd.xlane.f32.xlu1 %v658_v45 }
 0x31e   :  { %v2808_v30 = vpop.f32.mrb[12].mxu1 }
 0x31f   :  { %662 = vadd.xlane.f32.xlu0 %v661_v46  ;;  %v616_v49 = vpop.f32.mrb[13].mxu1  ;;  %v3511_v41 = vadd.f32 %v2808_v30, %v2653_v3 }
 0x320   :  { %v3507_v50 = vadd.f32 %v2653_v3, %v616_v49  ;;  %v2809_v53 = vpop.f32.mrb[14].mxu1 }
 0x321   :  { %665 = vadd.xlane.f32.xlu1 %v664_v29  ;;  %v619_v34 = vpop.f32.mrb[15].mxu1  ;;  %v3517_v58 = vadd.f32 %v2809_v53, %v2653_v3  ;;  %v673_v59 = vsel %vm225_vm1, %v3511_v41, 0.0 }
 0x322   :  { %v3513_v35 = vadd.f32 %v2653_v3, %v619_v34  ;;  %v667_v57 = vsel %vm225_vm1, %v3507_v50, 0.0 }
 0x323   :  { %668 = vadd.xlane.f32.xlu0 %v667_v57  ;;  %v676_v61 = vsel %vm225_vm1, %v3517_v58, 0.0 }
 0x324   :  { %v670_v40 = vsel %vm225_vm1, %v3513_v35, 0.0 }
 0x325   :  { %671 = vadd.xlane.f32.xlu1 %v670_v40 }
 0x327   :  { %674 = vadd.xlane.f32.xlu0 %v673_v59 }
 0x329   :  { %677 = vadd.xlane.f32.xlu1 %v676_v61 }
 0x398   :  { %v633_v48 = vpop.xlane.xlu0 %632 }
 0x399   :  { %v679_v55 = vmul.f32 0.03125, %v633_v48 }
 0x39a   :  { %v636_v0 = vpop.xlane.xlu1 %635 }
 0x39b   :  { %v3526_v1 = vsub.f32 %v3461_v63, %v679_v55  ;;  %v680_v39 = vmul.f32 0.03125, %v636_v0 }
 0x39c   :  { %v639_v4 = vpop.xlane.xlu0 %638 }
 0x39d   :  { %v3529_v56 = vsub.f32 %v3465_v20, %v680_v39  ;;  %v681_v60 = vmul.f32 0.03125, %v639_v4  ;;  %v711_v2 = vmul.f32 %v3526_v1, %v3526_v1 }
 0x39e   :  { %v642_v7 = vpop.xlane.xlu1 %641 }
 0x39f   :  { %v843_v14 = vpack.c.bf16 %v3529_v56, %v3526_v1  ;;  %v3536_v42 = vsub.f32 %v3463_v17, %v681_v60  ;;  %v682_v3 = vmul.f32 0.03125, %v642_v7  ;;  %v727_v10 = vsel %vm225_vm1, %v711_v2, 0.0 }
 0x3a0   :  { %728 = vadd.xlane.f32.xlu0 %v727_v10  ;;  %v645_v15 = vpop.xlane.xlu0 %644  ;;  %v712_v63 = vmul.f32 %v3529_v56, %v3529_v56 }
 0x3a1   :  { %v3542_v6 = vsub.f32 %v3469_v38, %v682_v3  ;;  %v683_v11 = vmul.f32 0.03125, %v645_v15  ;;  %v713_v20 = vmul.f32 %v3536_v42, %v3536_v42 }
 0x3a2   :  { %v648_v23 = vpop.xlane.xlu1 %647  ;;  %v730_v12 = vsel %vm225_vm1, %v712_v63, 0.0 }
 0x3a3   :  { %v844_v17 = vpack.c.bf16 %v3542_v6, %v3536_v42  ;;  %v3550_v13 = vsub.f32 %v3475_v19, %v683_v11  ;;  %v684_v47 = vmul.f32 0.03125, %v648_v23  ;;  %731 = vadd.xlane.f32.xlu1 %v730_v12  ;;  %v733_v18 = vsel %vm225_vm1, %v713_v20, 0.0 }
 0x3a4   :  { %734 = vadd.xlane.f32.xlu0 %v733_v18  ;;  %v651_v38 = vpop.xlane.xlu0 %650  ;;  %v714_v22 = vmul.f32 %v3542_v6, %v3542_v6 }
 0x3a5   :  { %v3556_v51 = vsub.f32 %v3481_v31, %v684_v47  ;;  %v685_v25 = vmul.f32 0.03125, %v651_v38  ;;  %v715_v62 = vmul.f32 %v3550_v13, %v3550_v13 }
 0x3a6   :  { %v654_v9 = vpop.xlane.xlu1 %653  ;;  %v736_v19 = vsel %vm225_vm1, %v714_v22, 0.0 }
 0x3a7   :  { %v845_v54 = vpack.c.bf16 %v3556_v51, %v3550_v13  ;;  %v3564_v32 = vsub.f32 %v3479_v26, %v685_v25  ;;  %v686_v28 = vmul.f32 0.03125, %v654_v9  ;;  %737 = vadd.xlane.f32.xlu1 %v736_v19  ;;  %v739_v36 = vsel %vm225_vm1, %v715_v62, 0.0 }
 0x3a8   :  { %740 = vadd.xlane.f32.xlu0 %v739_v36  ;;  %v657_v31 = vpop.xlane.xlu0 %656  ;;  %v716_v37 = vmul.f32 %v3556_v51, %v3556_v51 }
 0x3a9   :  { %v3570_v27 = vsub.f32 %v3485_v5, %v686_v28  ;;  %v687_v21 = vmul.f32 0.03125, %v657_v31  ;;  %v717_v45 = vmul.f32 %v3564_v32, %v3564_v32 }
 0x3aa   :  { %v660_v30 = vpop.xlane.xlu1 %659  ;;  %v742_v26 = vsel %vm225_vm1, %v716_v37, 0.0 }
 0x3ab   :  { %v846_v46 = vpack.c.bf16 %v3570_v27, %v3564_v32  ;;  %v3578_v49 = vsub.f32 %v3491_v33, %v687_v21  ;;  %v688_v53 = vmul.f32 0.03125, %v660_v30  ;;  %743 = vadd.xlane.f32.xlu1 %v742_v26  ;;  %v745_v29 = vsel %vm225_vm1, %v717_v45, 0.0 }
 0x3ac   :  { %746 = vadd.xlane.f32.xlu0 %v745_v29  ;;  %v663_v5 = vpop.xlane.xlu0 %662  ;;  %v718_v34 = vmul.f32 %v3570_v27, %v3570_v27 }
 0x3ad   :  { %v3584_v57 = vsub.f32 %v3497_v16, %v688_v53  ;;  %v689_v40 = vmul.f32 0.03125, %v663_v5  ;;  %v719_v59 = vmul.f32 %v3578_v49, %v3578_v49 }
 0x3ae   :  { %v666_v61 = vpop.xlane.xlu1 %665  ;;  %v748_v33 = vsel %vm225_vm1, %v718_v34, 0.0 }
 0x3af   :  { %v847_v43 = vpack.c.bf16 %v3584_v57, %v3578_v49  ;;  %v3592_v48 = vsub.f32 %v3495_v44, %v689_v40  ;;  %v690_v55 = vmul.f32 0.03125, %v666_v61  ;;  %749 = vadd.xlane.f32.xlu1 %v748_v33  ;;  %v751_v0 = vsel %vm225_vm1, %v719_v59, 0.0 }
 0x3b0   :  { %752 = vadd.xlane.f32.xlu0 %v751_v0  ;;  %v669_v16 = vpop.xlane.xlu0 %668  ;;  %v720_v39 = vmul.f32 %v3584_v57, %v3584_v57  ;;  %v493_v0 = vld [vmem:[%s4827_s3 + $0x5] sm:$0x1] }
 0x3b1   :  { %v3598_v4 = vsub.f32 %v3501_v24, %v690_v55  ;;  %v691_v60 = vmul.f32 0.03125, %v669_v16  ;;  %v721_v2 = vmul.f32 %v3592_v48, %v3592_v48 }
 0x3b2   :  { %v754_v7 = vsel %vm225_vm1, %v720_v39, 0.0  ;;  %v672_v44 = vpop.xlane.xlu1 %671 }
 0x3b3   :  { %v848_v3 = vpack.c.bf16 %v3598_v4, %v3592_v48  ;;  %v3606_v10 = vsub.f32 %v3507_v50, %v691_v60  ;;  %755 = vadd.xlane.f32.xlu1 %v754_v7  ;;  %v692_v15 = vmul.f32 0.03125, %v672_v44  ;;  %v757_v63 = vsel %vm225_vm1, %v721_v2, 0.0 }
 0x3b4   :  { %758 = vadd.xlane.f32.xlu0 %v757_v63  ;;  %v675_v24 = vpop.xlane.xlu0 %674  ;;  %v722_v11 = vmul.f32 %v3598_v4, %v3598_v4  ;;  %v867_v44 = vpack.c.bf16 %v493_v0, %v493_v0 }
 0x3b5   :  { %v3612_v20 = vsub.f32 %v3513_v35, %v692_v15  ;;  %v693_v23 = vmul.f32 0.03125, %v675_v24  ;;  %v723_v12 = vmul.f32 %v3606_v10, %v3606_v10 }
 0x3b6   :  { %v760_v47 = vsel %vm225_vm1, %v722_v11, 0.0  ;;  %v678_v50 = vpop.xlane.xlu1 %677 }
 0x3b7   :  { %v849_v18 = vpack.c.bf16 %v3612_v20, %v3606_v10  ;;  %v3620_v38 = vsub.f32 %v3511_v41, %v693_v23  ;;  %761 = vadd.xlane.f32.xlu1 %v760_v47  ;;  %v694_v22 = vmul.f32 0.03125, %v678_v50  ;;  %v763_v25 = vsel %vm225_vm1, %v723_v12, 0.0  ;;  %v3643_v23 = vld [vmem:[%s4827_s3 + $0x4] ss:$0 sm:$0xff]  ;;  %v2665_v10 = vld [vmem:[%s4827_s3 + $0x6] ss:$0 sm:$0xff] }
 0x3b8   :  { %764 = vadd.xlane.f32.xlu0 %v763_v25  ;;  %v724_v35 = vmul.f32 %v3612_v20, %v3612_v20 }
 0x3b9   :  { %v3626_v62 = vsub.f32 %v3517_v58, %v694_v22  ;;  %v725_v9 = vmul.f32 %v3620_v38, %v3620_v38  ;;  %v2904_v58 = vld [vmem:[#allocation2 + $0x18] sm:$0xff]   ;;  %v869_v22 = vpack.i.b16 %v867_v44, %v867_v44 }
 0x3ba   :  { %v766_v19 = vsel %vm225_vm1, %v724_v35, 0.0  ;;  %2812 = vmatprep.subr.bf16.mxu0 %v2904_v58 }
 0x3bb   :  { %v850_v41 = vpack.c.bf16 %v3626_v62, %v3620_v38  ;;  %767 = vadd.xlane.f32.xlu1 %v766_v19  ;;  %v769_v28 = vsel %vm225_vm1, %v725_v9, 0.0  ;;  %v726_v36 = vmul.f32 %v3626_v62, %v3626_v62  ;;  %2813 = vmatpush3.bf16.msra.mxu0 %v2904_v58 }
 0x3bc   :  { %770 = vadd.xlane.f32.xlu0 %v769_v28 }
 0x3bd   :  { %v772_v31 = vsel %vm225_vm1, %v726_v36, 0.0 }
 0x3bf   :  { %773 = vadd.xlane.f32.xlu1 %v772_v31 }
 0x42d   :  { %v729_v37 = vpop.xlane.xlu0 %728 }
 0x42e   :  { %v775_v21 = vmul.f32 0.03125, %v729_v37 }
 0x430   :  { %v791_v45 = vadd.f32 1e-05, %v775_v21  ;;  %v732_v30 = vpop.xlane.xlu1 %731 }
 0x431   :  { %v776_v26 = vmul.f32 0.03125, %v732_v30  ;;  %v735_v53 = vpop.xlane.xlu0 %734  ;;  %v3648_v30 = vrot.slane %v869_v22, %v3389_v52 }
 0x432   :  { %v777_v29 = vmul.f32 0.03125, %v735_v53  ;;  %2942 = vrsqrt.f32 %v791_v45 }
 0x433   :  { %v792_v5 = vadd.f32 1e-05, %v776_v26 }
 0x434   :  { %v793_v34 = vadd.f32 1e-05, %v777_v29  ;;  %v738_v40 = vpop.xlane.xlu1 %737 }
 0x435   :  { %2944 = vrsqrt.f32 %v792_v5  ;;  %v778_v59 = vmul.f32 0.03125, %v738_v40  ;;  %v741_v61 = vpop.xlane.xlu0 %740 }
 0x436   :  { %v779_v33 = vmul.f32 0.03125, %v741_v61  ;;  %2946 = vrsqrt.f32 %v793_v34 }
 0x437   :  { %v794_v55 = vadd.f32 1e-05, %v778_v59 }
 0x438   :  { %v795_v16 = vadd.f32 1e-05, %v779_v33  ;;  %v744_v39 = vpop.xlane.xlu1 %743 }
 0x439   :  { %2948 = vrsqrt.f32 %v794_v55  ;;  %v780_v60 = vmul.f32 0.03125, %v744_v39  ;;  %v747_v2 = vpop.xlane.xlu0 %746 }
 0x43a   :  { %2950 = vrsqrt.f32 %v795_v16  ;;  %v781_v7 = vmul.f32 0.03125, %v747_v2 }
 0x43b   :  { %v796_v15 = vadd.f32 1e-05, %v780_v60 }
 0x43c   :  { %v797_v63 = vadd.f32 1e-05, %v781_v7  ;;  %v750_v24 = vpop.xlane.xlu1 %749  ;;  %v2943_v11 = vpop.eup %2942 }
 0x43d   :  { %2952 = vrsqrt.f32 %v796_v15  ;;  %v782_v12 = vmul.f32 0.03125, %v750_v24  ;;  %v753_v47 = vpop.xlane.xlu0 %752  ;;  %v827_v9 = vmul.f32 %v2943_v11, %v3643_v23 }
 0x43e   :  { %2954 = vrsqrt.f32 %v797_v63  ;;  %v783_v50 = vmul.f32 0.03125, %v753_v47 }
 0x43f   :  { %v2945_v25 = vpop.eup %2944  ;;  %v798_v35 = vadd.f32 1e-05, %v782_v12 }
 0x440   :  { %v828_v19 = vmul.f32 %v2945_v25, %v3643_v23  ;;  %v799_v28 = vadd.f32 1e-05, %v783_v50  ;;  %v756_v36 = vpop.xlane.xlu1 %755  ;;  %v2947_v31 = vpop.eup %2946 }
 0x441   :  { %2956 = vrsqrt.f32 %v798_v35  ;;  %v784_v58 = vmul.f32 0.03125, %v756_v36  ;;  %v759_v37 = vpop.xlane.xlu0 %758  ;;  %v829_v5 = vmul.f32 %v2947_v31, %v3643_v23 }
 0x442   :  { %v785_v21 = vmul.f32 0.03125, %v759_v37  ;;  %v851_v45 = vpack.c.bf16 %v828_v19, %v827_v9  ;;  %2958 = vrsqrt.f32 %v799_v28 }
 0x443   :  { %v2949_v26 = vpop.eup %2948  ;;  %v800_v53 = vadd.f32 1e-05, %v784_v58 }
 0x444   :  { %v2951_v29 = vpop.eup %2950  ;;  %v830_v34 = vmul.f32 %v2949_v26, %v3643_v23  ;;  %v801_v40 = vadd.f32 1e-05, %v785_v21  ;;  %v762_v59 = vpop.xlane.xlu1 %761  ;;  %v859_v61 = vmul.bf16 %v851_v45, %v843_v14 }
 0x445   :  { %2960 = vrsqrt.f32 %v800_v53  ;;  %v786_v33 = vmul.f32 0.03125, %v762_v59  ;;  %v765_v55 = vpop.xlane.xlu0 %764  ;;  %v831_v2 = vmul.f32 %v2951_v29, %v3643_v23 }
 0x446   :  { %v852_v0 = vpack.c.bf16 %v830_v34, %v829_v5  ;;  %v787_v16 = vmul.f32 0.03125, %v765_v55  ;;  %v875_v39 = vadd.bf16 %v3648_v30, %v859_v61  ;;  %2962 = vrsqrt.f32 %v801_v40 }
 0x447   :  { %v2953_v60 = vpop.eup %2952  ;;  %v802_v7 = vadd.f32 1e-05, %v786_v33 }
 0x448   :  { %v2955_v44 = vpop.eup %2954  ;;  %v860_v15 = vmul.bf16 %v852_v0, %v844_v17  ;;  %v832_v1 = vmul.f32 %v2953_v60, %v3643_v23  ;;  %v803_v56 = vadd.f32 1e-05, %v787_v16  ;;  %v768_v14 = vpop.xlane.xlu1 %767  ;;  %v883_v63 = vmax.bf16 %v3129_v8, %v875_v39 }
 0x449   :  { %2964 = vrsqrt.f32 %v802_v7  ;;  %v788_v24 = vmul.f32 0.03125, %v768_v14  ;;  %v771_v11 = vpop.xlane.xlu0 %770  ;;  %v833_v25 = vmul.f32 %v2955_v44, %v3643_v23 }
 0x44a   :  { %2814 = vmatprep.mubr.msk.bf16.mxu0 %vm225_vm1, %v883_v63  ;;  %v789_v12 = vmul.f32 0.03125, %v771_v11  ;;  %v876_v47 = vadd.bf16 %v3648_v30, %v860_v15  ;;  %v853_v50 = vpack.c.bf16 %v832_v1, %v831_v2  ;;  %2966 = vrsqrt.f32 %v803_v56 }
 0x44b   :  { %v2957_v22 = vpop.eup %2956  ;;  %v804_v42 = vadd.f32 1e-05, %v788_v24 }
 0x44c   :  { %v834_v6 = vmul.f32 %v2957_v22, %v3643_v23  ;;  %v805_v17 = vadd.f32 1e-05, %v789_v12  ;;  %v774_v35 = vpop.xlane.xlu1 %773  ;;  %v884_v9 = vmax.bf16 %v3129_v8, %v876_v47  ;;  %v861_v19 = vmul.bf16 %v853_v50, %v845_v54  ;;  %v2959_v28 = vpop.eup %2958 }
 0x44d   :  { %2968 = vrsqrt.f32 %v804_v42  ;;  %v790_v36 = vmul.f32 0.03125, %v774_v35  ;;  %v835_v45 = vmul.f32 %v2959_v28, %v3643_v23 }
 0x44e   :  { %2815 = vmatmul.mubr.msk.bf16.vlgmr.msra.gmra.mrb[16].mxu0 %vm225_vm1, %v884_v9  ;;  %v877_v31 = vadd.bf16 %v3648_v30, %v861_v19  ;;  %v854_v58 = vpack.c.bf16 %v834_v6, %v833_v25  ;;  %2970 = vrsqrt.f32 %v805_v17 }
 0x44f   :  { %v2961_v37 = vpop.eup %2960  ;;  %v806_v21 = vadd.f32 1e-05, %v790_v36 }
 0x450   :  { %v836_v26 = vmul.f32 %v2961_v37, %v3643_v23  ;;  %v885_v53 = vmax.bf16 %v3129_v8, %v877_v31  ;;  %v862_v13 = vmul.bf16 %v854_v58, %v846_v46  ;;  %v2963_v51 = vpop.eup %2962 }
 0x451   :  { %2972 = vrsqrt.f32 %v806_v21  ;;  %v837_v34 = vmul.f32 %v2963_v51, %v3643_v23 }
 0x452   :  { %2818 = vmatprep.mubr.msk.bf16.mxu0 %vm225_vm1, %v885_v53  ;;  %v878_v54 = vadd.bf16 %v3648_v30, %v862_v13  ;;  %v855_v29 = vpack.c.bf16 %v836_v26, %v835_v45 }
 0x453   :  { %v2965_v5 = vpop.eup %2964 }
 0x454   :  { %v838_v40 = vmul.f32 %v2965_v5, %v3643_v23  ;;  %v886_v59 = vmax.bf16 %v3129_v8, %v878_v54  ;;  %v863_v61 = vmul.bf16 %v855_v29, %v847_v43  ;;  %v2967_v32 = vpop.eup %2966 }
 0x455   :  { %v839_v55 = vmul.f32 %v2967_v32, %v3643_v23 }
 0x456   :  { %2819 = vmatmul.mubr.msk.bf16.gmra.mrb[20].mxu0 %vm225_vm1, %v886_v59  ;;  %v879_v27 = vadd.bf16 %v3648_v30, %v863_v61  ;;  %v856_v46 = vpack.c.bf16 %v838_v40, %v837_v34 }
 0x457   :  { %v2969_v33 = vpop.eup %2968 }
 0x458   :  { %v840_v0 = vmul.f32 %v2969_v33, %v3643_v23  ;;  %v887_v16 = vmax.bf16 %v3129_v8, %v879_v27  ;;  %v864_v39 = vmul.bf16 %v856_v46, %v848_v3  ;;  %v2971_v60 = vpop.eup %2970 }
 0x459   :  { %v841_v2 = vmul.f32 %v2971_v60, %v3643_v23 }
 0x45a   :  { %2822 = vmatprep.mubr.msk.bf16.mxu0 %vm225_vm1, %v887_v16  ;;  %v880_v49 = vadd.bf16 %v3648_v30, %v864_v39  ;;  %v857_v57 = vpack.c.bf16 %v840_v0, %v839_v55 }
 0x45b   :  { %v2973_v43 = vpop.eup %2972 }
 0x45c   :  { %v842_v7 = vmul.f32 %v2973_v43, %v3643_v23  ;;  %v888_v44 = vmax.bf16 %v3129_v8, %v880_v49  ;;  %v865_v15 = vmul.bf16 %v857_v57, %v849_v18  ;;  %v2905_v49 = vld [vmem:[#allocation2 + $0x20] sm:$0xff]  }
 0x45d   :  { %2830 = vmatprep.subr.bf16.mxu1 %v2905_v49 }
 0x45e   :  { %2823 = vmatmul.mubr.msk.bf16.gmra.mrb[24].mxu0 %vm225_vm1, %v888_v44  ;;  %v881_v48 = vadd.bf16 %v3648_v30, %v865_v15  ;;  %v858_v4 = vpack.c.bf16 %v842_v7, %v841_v2  ;;  %2831 = vmatpush3.bf16.msra.mxu1 %v2905_v49 }
 0x460   :  { %v889_v3 = vmax.bf16 %v3129_v8, %v881_v48  ;;  %v866_v1 = vmul.bf16 %v858_v4, %v850_v41 }
 0x462   :  { %2826 = vmatprep.mubr.msk.bf16.mxu0 %vm225_vm1, %v889_v3  ;;  %v882_v23 = vadd.bf16 %v3648_v30, %v866_v1 }
 0x464   :  { %v890_v56 = vmax.bf16 %v3129_v8, %v882_v23 }
 0x466   :  { %2827 = vmatmul.mubr.msk.bf16.gmra.mrb[28].mxu0 %vm225_vm1, %v890_v56 }
 0x521   :  { %v2816_v20 = vpop.f32.mrb[16].mxu0 }
 0x522   :  { %v973_v18 = vpop.f32.mrb[17].mxu0  ;;  %v3717_v38 = vadd.f32 %v2816_v20, %v2665_v10 }
 0x523   :  { %v3715_v14 = vadd.f32 %v2665_v10, %v973_v18  ;;  %v2817_v63 = vpop.f32.mrb[18].mxu0 }
 0x524   :  { %v976_v24 = vpop.f32.mrb[19].mxu0  ;;  %v3723_v30 = vadd.f32 %v2817_v63, %v2665_v10  ;;  %v1042_v47 = vsel %vm225_vm1, %v3717_v38, 0.0 }
 0x525   :  { %v3719_v62 = vadd.f32 %v2665_v10, %v976_v24  ;;  %v1036_v41 = vsel %vm225_vm1, %v3715_v14, 0.0 }
 0x526   :  { %1037 = vadd.xlane.f32.xlu0 %v1036_v41  ;;  %v1045_v42 = vsel %vm225_vm1, %v3723_v30, 0.0 }
 0x527   :  { %v1039_v11 = vsel %vm225_vm1, %v3719_v62, 0.0 }
 0x528   :  { %1040 = vadd.xlane.f32.xlu1 %v1039_v11 }
 0x529   :  { %v2820_v12 = vpop.f32.mrb[20].mxu0 }
 0x52a   :  { %1043 = vadd.xlane.f32.xlu0 %v1042_v47  ;;  %v989_v50 = vpop.f32.mrb[21].mxu0  ;;  %v3733_v17 = vadd.f32 %v2820_v12, %v2665_v10 }
 0x52b   :  { %v3729_v22 = vadd.f32 %v2665_v10, %v989_v50  ;;  %v2821_v25 = vpop.f32.mrb[22].mxu0 }
 0x52c   :  { %1046 = vadd.xlane.f32.xlu1 %v1045_v42  ;;  %v992_v6 = vpop.f32.mrb[23].mxu0  ;;  %v3739_v19 = vadd.f32 %v2821_v25, %v2665_v10  ;;  %v1054_v31 = vsel %vm225_vm1, %v3733_v17, 0.0 }
 0x52d   :  { %v3735_v35 = vadd.f32 %v2665_v10, %v992_v6  ;;  %v1048_v9 = vsel %vm225_vm1, %v3729_v22, 0.0 }
 0x52e   :  { %1049 = vadd.xlane.f32.xlu0 %v1048_v9  ;;  %v1057_v45 = vsel %vm225_vm1, %v3739_v19, 0.0 }
 0x52f   :  { %v1051_v28 = vsel %vm225_vm1, %v3735_v35, 0.0 }
 0x530   :  { %1052 = vadd.xlane.f32.xlu1 %v1051_v28 }
 0x531   :  { %v2824_v36 = vpop.f32.mrb[24].mxu0 }
 0x532   :  { %1055 = vadd.xlane.f32.xlu0 %v1054_v31  ;;  %v1005_v58 = vpop.f32.mrb[25].mxu0  ;;  %v3749_v53 = vadd.f32 %v2824_v36, %v2665_v10 }
 0x533   :  { %v3745_v37 = vadd.f32 %v2665_v10, %v1005_v58  ;;  %v2825_v21 = vpop.f32.mrb[26].mxu0 }
 0x534   :  { %1058 = vadd.xlane.f32.xlu1 %v1057_v45  ;;  %v1008_v26 = vpop.f32.mrb[27].mxu0  ;;  %v3755_v54 = vadd.f32 %v2825_v21, %v2665_v10  ;;  %v1066_v34 = vsel %vm225_vm1, %v3749_v53, 0.0 }
 0x535   :  { %v3751_v13 = vadd.f32 %v2665_v10, %v1008_v26  ;;  %v1060_v51 = vsel %vm225_vm1, %v3745_v37, 0.0 }
 0x536   :  { %1061 = vadd.xlane.f32.xlu0 %v1060_v51  ;;  %v1069_v32 = vsel %vm225_vm1, %v3755_v54, 0.0 }
 0x537   :  { %v1063_v29 = vsel %vm225_vm1, %v3751_v13, 0.0 }
 0x538   :  { %1064 = vadd.xlane.f32.xlu1 %v1063_v29 }
 0x539   :  { %v2828_v5 = vpop.f32.mrb[28].mxu0 }
 0x53a   :  { %1067 = vadd.xlane.f32.xlu0 %v1066_v34  ;;  %v1021_v40 = vpop.f32.mrb[29].mxu0  ;;  %v3765_v46 = vadd.f32 %v2828_v5, %v2665_v10 }
 0x53b   :  { %v3761_v59 = vadd.f32 %v2665_v10, %v1021_v40  ;;  %v2829_v61 = vpop.f32.mrb[30].mxu0 }
 0x53c   :  { %1070 = vadd.xlane.f32.xlu1 %v1069_v32  ;;  %v1024_v27 = vpop.f32.mrb[31].mxu0  ;;  %v3771_v0 = vadd.f32 %v2829_v61, %v2665_v10  ;;  %v1078_v39 = vsel %vm225_vm1, %v3765_v46, 0.0 }
 0x53d   :  { %v3767_v33 = vadd.f32 %v2665_v10, %v1024_v27  ;;  %v1072_v55 = vsel %vm225_vm1, %v3761_v59, 0.0 }
 0x53e   :  { %1073 = vadd.xlane.f32.xlu0 %v1072_v55  ;;  %v1081_v60 = vsel %vm225_vm1, %v3771_v0, 0.0 }
 0x53f   :  { %v1075_v16 = vsel %vm225_vm1, %v3767_v33, 0.0 }
 0x540   :  { %1076 = vadd.xlane.f32.xlu1 %v1075_v16 }
 0x542   :  { %1079 = vadd.xlane.f32.xlu0 %v1078_v39 }
 0x544   :  { %1082 = vadd.xlane.f32.xlu1 %v1081_v60 }
 0x5b3   :  { %v1038_v57 = vpop.xlane.xlu0 %1037 }
 0x5b4   :  { %v1084_v43 = vmul.f32 0.03125, %v1038_v57 }
 0x5b5   :  { %v1041_v2 = vpop.xlane.xlu1 %1040 }
 0x5b6   :  { %v3780_v7 = vsub.f32 %v3715_v14, %v1084_v43  ;;  %v1085_v44 = vmul.f32 0.03125, %v1041_v2 }
 0x5b7   :  { %v1044_v15 = vpop.xlane.xlu0 %1043 }
 0x5b8   :  { %v3783_v48 = vsub.f32 %v3719_v62, %v1085_v44  ;;  %v1086_v4 = vmul.f32 0.03125, %v1044_v15  ;;  %v1116_v3 = vmul.f32 %v3780_v7, %v3780_v7 }
 0x5b9   :  { %v1047_v1 = vpop.xlane.xlu1 %1046 }
 0x5ba   :  { %v1248_v23 = vpack.c.bf16 %v3783_v48, %v3780_v7  ;;  %v3790_v56 = vsub.f32 %v3717_v38, %v1086_v4  ;;  %v1087_v10 = vmul.f32 0.03125, %v1047_v1  ;;  %v1132_v20 = vsel %vm225_vm1, %v1116_v3, 0.0 }
 0x5bb   :  { %1133 = vadd.xlane.f32.xlu0 %v1132_v20  ;;  %v1050_v18 = vpop.xlane.xlu0 %1049  ;;  %v1117_v14 = vmul.f32 %v3783_v48, %v3783_v48 }
 0x5bc   :  { %v3796_v63 = vsub.f32 %v3723_v30, %v1087_v10  ;;  %v1088_v24 = vmul.f32 0.03125, %v1050_v18  ;;  %v1118_v62 = vmul.f32 %v3790_v56, %v3790_v56 }
 0x5bd   :  { %v1053_v41 = vpop.xlane.xlu1 %1052  ;;  %v1135_v11 = vsel %vm225_vm1, %v1117_v14, 0.0 }
 0x5be   :  { %v1249_v38 = vpack.c.bf16 %v3796_v63, %v3790_v56  ;;  %v3804_v12 = vsub.f32 %v3729_v22, %v1088_v24  ;;  %v1089_v47 = vmul.f32 0.03125, %v1053_v41  ;;  %1136 = vadd.xlane.f32.xlu1 %v1135_v11  ;;  %v1138_v50 = vsel %vm225_vm1, %v1118_v62, 0.0 }
 0x5bf   :  { %1139 = vadd.xlane.f32.xlu0 %v1138_v50  ;;  %v1056_v30 = vpop.xlane.xlu0 %1055  ;;  %v1119_v25 = vmul.f32 %v3796_v63, %v3796_v63 }
 0x5c0   :  { %v3810_v42 = vsub.f32 %v3735_v35, %v1089_v47  ;;  %v1090_v6 = vmul.f32 0.03125, %v1056_v30  ;;  %v1120_v9 = vmul.f32 %v3804_v12, %v3804_v12 }
 0x5c1   :  { %v1059_v28 = vpop.xlane.xlu1 %1058  ;;  %v1141_v22 = vsel %vm225_vm1, %v1119_v25, 0.0 }
 0x5c2   :  { %v1250_v36 = vpack.c.bf16 %v3810_v42, %v3804_v12  ;;  %v3818_v31 = vsub.f32 %v3733_v17, %v1090_v6  ;;  %v1091_v58 = vmul.f32 0.03125, %v1059_v28  ;;  %1142 = vadd.xlane.f32.xlu1 %v1141_v22  ;;  %v1144_v21 = vsel %vm225_vm1, %v1120_v9, 0.0 }
 0x5c3   :  { %1145 = vadd.xlane.f32.xlu0 %v1144_v21  ;;  %v1062_v35 = vpop.xlane.xlu0 %1061  ;;  %v1121_v45 = vmul.f32 %v3810_v42, %v3810_v42 }
 0x5c4   :  { %v3824_v26 = vsub.f32 %v3739_v19, %v1091_v58  ;;  %v1092_v51 = vmul.f32 0.03125, %v1062_v35  ;;  %v1122_v29 = vmul.f32 %v3818_v31, %v3818_v31 }
 0x5c5   :  { %v1065_v5 = vpop.xlane.xlu1 %1064  ;;  %v1147_v17 = vsel %vm225_vm1, %v1121_v45, 0.0 }
 0x5c6   :  { %v1251_v34 = vpack.c.bf16 %v3824_v26, %v3818_v31  ;;  %v3832_v40 = vsub.f32 %v3745_v37, %v1092_v51  ;;  %v1093_v61 = vmul.f32 0.03125, %v1065_v5  ;;  %1148 = vadd.xlane.f32.xlu1 %v1147_v17  ;;  %v1150_v32 = vsel %vm225_vm1, %v1122_v29, 0.0 }
 0x5c7   :  { %1151 = vadd.xlane.f32.xlu0 %v1150_v32  ;;  %v1068_v19 = vpop.xlane.xlu0 %1067  ;;  %v1123_v27 = vmul.f32 %v3824_v26, %v3824_v26 }
 0x5c8   :  { %v3838_v55 = vsub.f32 %v3751_v13, %v1093_v61  ;;  %v1094_v16 = vmul.f32 0.03125, %v1068_v19  ;;  %v1124_v39 = vmul.f32 %v3832_v40, %v3832_v40 }
 0x5c9   :  { %v1071_v60 = vpop.xlane.xlu1 %1070  ;;  %v1153_v37 = vsel %vm225_vm1, %v1123_v27, 0.0 }
 0x5ca   :  { %v1252_v49 = vpack.c.bf16 %v3838_v55, %v3832_v40  ;;  %v3846_v57 = vsub.f32 %v3749_v53, %v1094_v16  ;;  %v1095_v43 = vmul.f32 0.03125, %v1071_v60  ;;  %1154 = vadd.xlane.f32.xlu1 %v1153_v37  ;;  %v1156_v2 = vsel %vm225_vm1, %v1124_v39, 0.0 }
 0x5cb   :  { %1157 = vadd.xlane.f32.xlu0 %v1156_v2  ;;  %v1074_v13 = vpop.xlane.xlu0 %1073  ;;  %v1125_v44 = vmul.f32 %v3838_v55, %v3838_v55  ;;  %v898_v2 = vld [vmem:[%s4827_s3 + $0x8] sm:$0x1] }
 0x5cc   :  { %v3852_v15 = vsub.f32 %v3755_v54, %v1095_v43  ;;  %v1096_v4 = vmul.f32 0.03125, %v1074_v13  ;;  %v1126_v3 = vmul.f32 %v3846_v57, %v3846_v57 }
 0x5cd   :  { %v1159_v1 = vsel %vm225_vm1, %v1125_v44, 0.0  ;;  %v1077_v53 = vpop.xlane.xlu1 %1076 }
 0x5ce   :  { %v1253_v10 = vpack.c.bf16 %v3852_v15, %v3846_v57  ;;  %v3860_v20 = vsub.f32 %v3761_v59, %v1096_v4  ;;  %1160 = vadd.xlane.f32.xlu1 %v1159_v1  ;;  %v1097_v18 = vmul.f32 0.03125, %v1077_v53  ;;  %v1162_v14 = vsel %vm225_vm1, %v1126_v3, 0.0 }
 0x5cf   :  { %1163 = vadd.xlane.f32.xlu0 %v1162_v14  ;;  %v1080_v54 = vpop.xlane.xlu0 %1079  ;;  %v1127_v24 = vmul.f32 %v3852_v15, %v3852_v15  ;;  %v1272_v53 = vpack.c.bf16 %v898_v2, %v898_v2 }
 0x5d0   :  { %v3866_v62 = vsub.f32 %v3767_v33, %v1097_v18  ;;  %v1098_v41 = vmul.f32 0.03125, %v1080_v54  ;;  %v1128_v11 = vmul.f32 %v3860_v20, %v3860_v20 }
 0x5d1   :  { %v1165_v47 = vsel %vm225_vm1, %v1127_v24, 0.0  ;;  %v1083_v59 = vpop.xlane.xlu1 %1082 }
 0x5d2   :  { %v1254_v50 = vpack.c.bf16 %v3866_v62, %v3860_v20  ;;  %v3874_v30 = vsub.f32 %v3765_v46, %v1098_v41  ;;  %1166 = vadd.xlane.f32.xlu1 %v1165_v47  ;;  %v1099_v25 = vmul.f32 0.03125, %v1083_v59  ;;  %v1168_v6 = vsel %vm225_vm1, %v1128_v11, 0.0  ;;  %v3897_v41 = vld [vmem:[%s4827_s3 + $0x7] ss:$0 sm:$0xff]  ;;  %v2677_v20 = vld [vmem:[%s4827_s3 + $0x9] ss:$0 sm:$0xff] }
 0x5d3   :  { %1169 = vadd.xlane.f32.xlu0 %v1168_v6  ;;  %v1129_v33 = vmul.f32 %v3866_v62, %v3866_v62 }
 0x5d4   :  { %v3880_v9 = vsub.f32 %v3771_v0, %v1099_v25  ;;  %v1130_v28 = vmul.f32 %v3874_v30, %v3874_v30  ;;  %v2906_v0 = vld [vmem:[#allocation2 + $0x28] sm:$0xff]   ;;  %v1274_v25 = vpack.i.b16 %v1272_v53, %v1272_v53 }
 0x5d5   :  { %v1171_v22 = vsel %vm225_vm1, %v1129_v33, 0.0  ;;  %2832 = vmatprep.subr.bf16.mxu1 %v2906_v0 }
 0x5d6   :  { %v1255_v46 = vpack.c.bf16 %v3880_v9, %v3874_v30  ;;  %1172 = vadd.xlane.f32.xlu1 %v1171_v22  ;;  %v1174_v58 = vsel %vm225_vm1, %v1130_v28, 0.0  ;;  %v1131_v21 = vmul.f32 %v3880_v9, %v3880_v9  ;;  %2833 = vmatpush3.bf16.msra.mxu1 %v2906_v0 }
 0x5d7   :  { %1175 = vadd.xlane.f32.xlu0 %v1174_v58 }
 0x5d8   :  { %v1177_v35 = vsel %vm225_vm1, %v1131_v21, 0.0 }
 0x5da   :  { %1178 = vadd.xlane.f32.xlu1 %v1177_v35 }
 0x648   :  { %v1134_v45 = vpop.xlane.xlu0 %1133 }
 0x649   :  { %v1180_v51 = vmul.f32 0.03125, %v1134_v45 }
 0x64b   :  { %v1196_v29 = vadd.f32 1e-05, %v1180_v51  ;;  %v1137_v5 = vpop.xlane.xlu1 %1136 }
 0x64c   :  { %v1181_v17 = vmul.f32 0.03125, %v1137_v5  ;;  %v1140_v61 = vpop.xlane.xlu0 %1139  ;;  %v3902_v5 = vrot.slane %v1274_v25, %v3389_v52 }
 0x64d   :  { %v1182_v32 = vmul.f32 0.03125, %v1140_v61  ;;  %2974 = vrsqrt.f32 %v1196_v29 }
 0x64e   :  { %v1197_v19 = vadd.f32 1e-05, %v1181_v17 }
 0x64f   :  { %v1198_v27 = vadd.f32 1e-05, %v1182_v32  ;;  %v1143_v16 = vpop.xlane.xlu1 %1142 }
 0x650   :  { %2976 = vrsqrt.f32 %v1197_v19  ;;  %v1183_v39 = vmul.f32 0.03125, %v1143_v16  ;;  %v1146_v60 = vpop.xlane.xlu0 %1145 }
 0x651   :  { %v1184_v37 = vmul.f32 0.03125, %v1146_v60  ;;  %2978 = vrsqrt.f32 %v1198_v27 }
 0x652   :  { %v1199_v43 = vadd.f32 1e-05, %v1183_v39 }
 0x653   :  { %v1200_v13 = vadd.f32 1e-05, %v1184_v37  ;;  %v1149_v44 = vpop.xlane.xlu1 %1148 }
 0x654   :  { %2980 = vrsqrt.f32 %v1199_v43  ;;  %v1185_v4 = vmul.f32 0.03125, %v1149_v44  ;;  %v1152_v3 = vpop.xlane.xlu0 %1151 }
 0x655   :  { %2982 = vrsqrt.f32 %v1200_v13  ;;  %v1186_v1 = vmul.f32 0.03125, %v1152_v3 }
 0x656   :  { %v1201_v18 = vadd.f32 1e-05, %v1185_v4 }
 0x657   :  { %v1202_v14 = vadd.f32 1e-05, %v1186_v1  ;;  %v1155_v54 = vpop.xlane.xlu1 %1154  ;;  %v2975_v24 = vpop.eup %2974 }
 0x658   :  { %2984 = vrsqrt.f32 %v1201_v18  ;;  %v1187_v11 = vmul.f32 0.03125, %v1155_v54  ;;  %v1158_v47 = vpop.xlane.xlu0 %1157  ;;  %v1232_v28 = vmul.f32 %v2975_v24, %v3897_v41 }
 0x659   :  { %2986 = vrsqrt.f32 %v1202_v14  ;;  %v1188_v59 = vmul.f32 0.03125, %v1158_v47 }
 0x65a   :  { %v2977_v6 = vpop.eup %2976  ;;  %v1203_v33 = vadd.f32 1e-05, %v1187_v11 }
 0x65b   :  { %v1233_v22 = vmul.f32 %v2977_v6, %v3897_v41  ;;  %v1204_v58 = vadd.f32 1e-05, %v1188_v59  ;;  %v1161_v21 = vpop.xlane.xlu1 %1160  ;;  %v2979_v35 = vpop.eup %2978 }
 0x65c   :  { %2988 = vrsqrt.f32 %v1203_v33  ;;  %v1189_v0 = vmul.f32 0.03125, %v1161_v21  ;;  %v1164_v45 = vpop.xlane.xlu0 %1163  ;;  %v1234_v19 = vmul.f32 %v2979_v35, %v3897_v41 }
 0x65d   :  { %v1190_v51 = vmul.f32 0.03125, %v1164_v45  ;;  %v1256_v29 = vpack.c.bf16 %v1233_v22, %v1232_v28  ;;  %2990 = vrsqrt.f32 %v1204_v58 }
 0x65e   :  { %v2981_v17 = vpop.eup %2980  ;;  %v1205_v61 = vadd.f32 1e-05, %v1189_v0 }
 0x65f   :  { %v2983_v32 = vpop.eup %2982  ;;  %v1235_v27 = vmul.f32 %v2981_v17, %v3897_v41  ;;  %v1206_v16 = vadd.f32 1e-05, %v1190_v51  ;;  %v1167_v39 = vpop.xlane.xlu1 %1166  ;;  %v1264_v60 = vmul.bf16 %v1256_v29, %v1248_v23 }
 0x660   :  { %2992 = vrsqrt.f32 %v1205_v61  ;;  %v1191_v37 = vmul.f32 0.03125, %v1167_v39  ;;  %v1170_v43 = vpop.xlane.xlu0 %1169  ;;  %v1236_v3 = vmul.f32 %v2983_v32, %v3897_v41 }
 0x661   :  { %v1257_v2 = vpack.c.bf16 %v1235_v27, %v1234_v19  ;;  %v1192_v13 = vmul.f32 0.03125, %v1170_v43  ;;  %v1280_v44 = vadd.bf16 %v3902_v5, %v1264_v60  ;;  %2994 = vrsqrt.f32 %v1206_v16 }
 0x662   :  { %v2985_v4 = vpop.eup %2984  ;;  %v1207_v1 = vadd.f32 1e-05, %v1191_v37 }
 0x663   :  { %v2987_v53 = vpop.eup %2986  ;;  %v1265_v18 = vmul.bf16 %v1257_v2, %v1249_v38  ;;  %v1237_v7 = vmul.f32 %v2985_v4, %v3897_v41  ;;  %v1208_v48 = vadd.f32 1e-05, %v1192_v13  ;;  %v1173_v23 = vpop.xlane.xlu1 %1172  ;;  %v1288_v14 = vmax.bf16 %v3129_v8, %v1280_v44 }
 0x664   :  { %2996 = vrsqrt.f32 %v1207_v1  ;;  %v1193_v54 = vmul.f32 0.03125, %v1173_v23  ;;  %v1176_v24 = vpop.xlane.xlu0 %1175  ;;  %v1238_v6 = vmul.f32 %v2987_v53, %v3897_v41 }
 0x665   :  { %2834 = vmatprep.mubr.msk.bf16.mxu1 %vm225_vm1, %v1288_v14  ;;  %v1194_v11 = vmul.f32 0.03125, %v1176_v24  ;;  %v1281_v47 = vadd.bf16 %v3902_v5, %v1265_v18  ;;  %v1258_v59 = vpack.c.bf16 %v1237_v7, %v1236_v3  ;;  %2998 = vrsqrt.f32 %v1208_v48 }
 0x666   :  { %v2989_v25 = vpop.eup %2988  ;;  %v1209_v56 = vadd.f32 1e-05, %v1193_v54 }
 0x667   :  { %v1239_v63 = vmul.f32 %v2989_v25, %v3897_v41  ;;  %v1210_v38 = vadd.f32 1e-05, %v1194_v11  ;;  %v1179_v33 = vpop.xlane.xlu1 %1178  ;;  %v1289_v28 = vmax.bf16 %v3129_v8, %v1281_v47  ;;  %v1266_v22 = vmul.bf16 %v1258_v59, %v1250_v36  ;;  %v2991_v58 = vpop.eup %2990 }
 0x668   :  { %3000 = vrsqrt.f32 %v1209_v56  ;;  %v1195_v21 = vmul.f32 0.03125, %v1179_v33  ;;  %v1240_v29 = vmul.f32 %v2991_v58, %v3897_v41 }
 0x669   :  { %2835 = vmatmul.mubr.msk.bf16.vlgmr.msra.gmra.mrb[16].mxu1 %vm225_vm1, %v1289_v28  ;;  %v1282_v35 = vadd.bf16 %v3902_v5, %v1266_v22  ;;  %v1259_v0 = vpack.c.bf16 %v1239_v63, %v1238_v6  ;;  %3002 = vrsqrt.f32 %v1210_v38 }
 0x66a   :  { %v2993_v45 = vpop.eup %2992  ;;  %v1211_v51 = vadd.f32 1e-05, %v1195_v21 }
 0x66b   :  { %v1241_v17 = vmul.f32 %v2993_v45, %v3897_v41  ;;  %v1290_v61 = vmax.bf16 %v3129_v8, %v1282_v35  ;;  %v1267_v12 = vmul.bf16 %v1259_v0, %v1251_v34  ;;  %v2995_v42 = vpop.eup %2994 }
 0x66c   :  { %3004 = vrsqrt.f32 %v1211_v51  ;;  %v1242_v27 = vmul.f32 %v2995_v42, %v3897_v41 }
 0x66d   :  { %2838 = vmatprep.mubr.msk.bf16.mxu1 %vm225_vm1, %v1290_v61  ;;  %v1283_v36 = vadd.bf16 %v3902_v5, %v1267_v12  ;;  %v1260_v32 = vpack.c.bf16 %v1241_v17, %v1240_v29 }
 0x66e   :  { %v2997_v19 = vpop.eup %2996 }
 0x66f   :  { %v1243_v16 = vmul.f32 %v2997_v19, %v3897_v41  ;;  %v1291_v39 = vmax.bf16 %v3129_v8, %v1283_v36  ;;  %v1268_v60 = vmul.bf16 %v1260_v32, %v1252_v49  ;;  %v2999_v31 = vpop.eup %2998 }
 0x670   :  { %v1244_v43 = vmul.f32 %v2999_v31, %v3897_v41 }
 0x671   :  { %2839 = vmatmul.mubr.msk.bf16.gmra.mrb[20].mxu1 %vm225_vm1, %v1291_v39  ;;  %v1284_v26 = vadd.bf16 %v3902_v5, %v1268_v60  ;;  %v1261_v34 = vpack.c.bf16 %v1243_v16, %v1242_v27 }
 0x672   :  { %v3001_v37 = vpop.eup %3000 }
 0x673   :  { %v1245_v2 = vmul.f32 %v3001_v37, %v3897_v41  ;;  %v1292_v13 = vmax.bf16 %v3129_v8, %v1284_v26  ;;  %v1269_v44 = vmul.bf16 %v1261_v34, %v1253_v10  ;;  %v3003_v4 = vpop.eup %3002 }
 0x674   :  { %v1246_v3 = vmul.f32 %v3003_v4, %v3897_v41 }
 0x675   :  { %2842 = vmatprep.mubr.msk.bf16.mxu1 %vm225_vm1, %v1292_v13  ;;  %v1285_v40 = vadd.bf16 %v3902_v5, %v1269_v44  ;;  %v1262_v55 = vpack.c.bf16 %v1245_v2, %v1244_v43 }
 0x676   :  { %v3005_v49 = vpop.eup %3004 }
 0x677   :  { %v1247_v1 = vmul.f32 %v3005_v49, %v3897_v41  ;;  %v1293_v53 = vmax.bf16 %v3129_v8, %v1285_v40  ;;  %v1270_v18 = vmul.bf16 %v1262_v55, %v1254_v50  ;;  %v2907_v40 = vld [vmem:[#allocation2 + $0x30] sm:$0xff]  }
 0x678   :  { %2850 = vmatprep.subr.bf16.mxu0 %v2907_v40 }
 0x679   :  { %2843 = vmatmul.mubr.msk.bf16.gmra.mrb[24].mxu1 %vm225_vm1, %v1293_v53  ;;  %v1286_v57 = vadd.bf16 %v3902_v5, %v1270_v18  ;;  %v1263_v15 = vpack.c.bf16 %v1247_v1, %v1246_v3  ;;  %2851 = vmatpush3.bf16.msra.mxu0 %v2907_v40 }
 0x67b   :  { %v1294_v10 = vmax.bf16 %v3129_v8, %v1286_v57  ;;  %v1271_v7 = vmul.bf16 %v1263_v15, %v1255_v46 }
 0x67d   :  { %2846 = vmatprep.mubr.msk.bf16.mxu1 %vm225_vm1, %v1294_v10  ;;  %v1287_v41 = vadd.bf16 %v3902_v5, %v1271_v7 }
 0x67f   :  { %v1295_v48 = vmax.bf16 %v3129_v8, %v1287_v41 }
 0x681   :  { %2847 = vmatmul.mubr.msk.bf16.gmra.mrb[28].mxu1 %vm225_vm1, %v1295_v48 }
 0x73c   :  { %v2836_v62 = vpop.f32.mrb[16].mxu1 }
 0x73d   :  { %v1378_v50 = vpop.f32.mrb[17].mxu1  ;;  %v3971_v30 = vadd.f32 %v2836_v62, %v2677_v20 }
 0x73e   :  { %v3969_v23 = vadd.f32 %v2677_v20, %v1378_v50  ;;  %v2837_v14 = vpop.f32.mrb[18].mxu1 }
 0x73f   :  { %v1381_v54 = vpop.f32.mrb[19].mxu1  ;;  %v3977_v5 = vadd.f32 %v2837_v14, %v2677_v20  ;;  %v1447_v47 = vsel %vm225_vm1, %v3971_v30, 0.0 }
 0x740   :  { %v3973_v9 = vadd.f32 %v2677_v20, %v1381_v54  ;;  %v1441_v46 = vsel %vm225_vm1, %v3969_v23, 0.0 }
 0x741   :  { %1442 = vadd.xlane.f32.xlu0 %v1441_v46  ;;  %v1450_v56 = vsel %vm225_vm1, %v3977_v5, 0.0 }
 0x742   :  { %v1444_v24 = vsel %vm225_vm1, %v3973_v9, 0.0 }
 0x743   :  { %1445 = vadd.xlane.f32.xlu1 %v1444_v24 }
 0x744   :  { %v2840_v11 = vpop.f32.mrb[20].mxu1 }
 0x745   :  { %1448 = vadd.xlane.f32.xlu0 %v1447_v47  ;;  %v1394_v59 = vpop.f32.mrb[21].mxu1  ;;  %v3987_v38 = vadd.f32 %v2840_v11, %v2677_v20 }
 0x746   :  { %v3983_v25 = vadd.f32 %v2677_v20, %v1394_v59  ;;  %v2841_v6 = vpop.f32.mrb[22].mxu1 }
 0x747   :  { %1451 = vadd.xlane.f32.xlu1 %v1450_v56  ;;  %v1397_v63 = vpop.f32.mrb[23].mxu1  ;;  %v3993_v22 = vadd.f32 %v2841_v6, %v2677_v20  ;;  %v1459_v35 = vsel %vm225_vm1, %v3987_v38, 0.0 }
 0x748   :  { %v3989_v33 = vadd.f32 %v2677_v20, %v1397_v63  ;;  %v1453_v28 = vsel %vm225_vm1, %v3983_v25, 0.0 }
 0x749   :  { %1454 = vadd.xlane.f32.xlu0 %v1453_v28  ;;  %v1462_v29 = vsel %vm225_vm1, %v3993_v22, 0.0 }
 0x74a   :  { %v1456_v58 = vsel %vm225_vm1, %v3989_v33, 0.0 }
 0x74b   :  { %1457 = vadd.xlane.f32.xlu1 %v1456_v58 }
 0x74c   :  { %v2844_v21 = vpop.f32.mrb[24].mxu1 }
 0x74d   :  { %1460 = vadd.xlane.f32.xlu0 %v1459_v35  ;;  %v1410_v0 = vpop.f32.mrb[25].mxu1  ;;  %v4003_v61 = vadd.f32 %v2844_v21, %v2677_v20 }
 0x74e   :  { %v3999_v45 = vadd.f32 %v2677_v20, %v1410_v0  ;;  %v2845_v51 = vpop.f32.mrb[26].mxu1 }
 0x74f   :  { %1463 = vadd.xlane.f32.xlu1 %v1462_v29  ;;  %v1413_v17 = vpop.f32.mrb[27].mxu1  ;;  %v4009_v36 = vadd.f32 %v2845_v51, %v2677_v20  ;;  %v1471_v27 = vsel %vm225_vm1, %v4003_v61, 0.0 }
 0x750   :  { %v4005_v12 = vadd.f32 %v2677_v20, %v1413_v17  ;;  %v1465_v42 = vsel %vm225_vm1, %v3999_v45, 0.0 }
 0x751   :  { %1466 = vadd.xlane.f32.xlu0 %v1465_v42  ;;  %v1474_v31 = vsel %vm225_vm1, %v4009_v36, 0.0 }
 0x752   :  { %v1468_v32 = vsel %vm225_vm1, %v4005_v12, 0.0 }
 0x753   :  { %1469 = vadd.xlane.f32.xlu1 %v1468_v32 }
 0x754   :  { %v2848_v19 = vpop.f32.mrb[28].mxu1 }
 0x755   :  { %1472 = vadd.xlane.f32.xlu0 %v1471_v27  ;;  %v1426_v16 = vpop.f32.mrb[29].mxu1  ;;  %v4019_v34 = vadd.f32 %v2848_v19, %v2677_v20 }
 0x756   :  { %v4015_v39 = vadd.f32 %v2677_v20, %v1426_v16  ;;  %v2849_v60 = vpop.f32.mrb[30].mxu1 }
 0x757   :  { %1475 = vadd.xlane.f32.xlu1 %v1474_v31  ;;  %v1429_v26 = vpop.f32.mrb[31].mxu1  ;;  %v4025_v2 = vadd.f32 %v2849_v60, %v2677_v20  ;;  %v1483_v44 = vsel %vm225_vm1, %v4019_v34, 0.0 }
 0x758   :  { %v4021_v37 = vadd.f32 %v2677_v20, %v1429_v26  ;;  %v1477_v43 = vsel %vm225_vm1, %v4015_v39, 0.0 }
 0x759   :  { %1478 = vadd.xlane.f32.xlu0 %v1477_v43  ;;  %v1486_v4 = vsel %vm225_vm1, %v4025_v2, 0.0 }
 0x75a   :  { %v1480_v13 = vsel %vm225_vm1, %v4021_v37, 0.0 }
 0x75b   :  { %1481 = vadd.xlane.f32.xlu1 %v1480_v13 }
 0x75d   :  { %1484 = vadd.xlane.f32.xlu0 %v1483_v44 }
 0x75f   :  { %1487 = vadd.xlane.f32.xlu1 %v1486_v4 }
 0x7ce   :  { %v1443_v55 = vpop.xlane.xlu0 %1442 }
 0x7cf   :  { %v1489_v49 = vmul.f32 0.03125, %v1443_v55 }
 0x7d0   :  { %v1446_v3 = vpop.xlane.xlu1 %1445 }
 0x7d1   :  { %v4034_v1 = vsub.f32 %v3969_v23, %v1489_v49  ;;  %v1490_v53 = vmul.f32 0.03125, %v1446_v3 }
 0x7d2   :  { %v1449_v18 = vpop.xlane.xlu0 %1448 }
 0x7d3   :  { %v4037_v57 = vsub.f32 %v3973_v9, %v1490_v53  ;;  %v1491_v15 = vmul.f32 0.03125, %v1449_v18  ;;  %v1521_v10 = vmul.f32 %v4034_v1, %v4034_v1 }
 0x7d4   :  { %v1452_v7 = vpop.xlane.xlu1 %1451 }
 0x7d5   :  { %v1653_v41 = vpack.c.bf16 %v4037_v57, %v4034_v1  ;;  %v4044_v48 = vsub.f32 %v3971_v30, %v1491_v15  ;;  %v1492_v20 = vmul.f32 0.03125, %v1452_v7  ;;  %v1537_v62 = vsel %vm225_vm1, %v1521_v10, 0.0 }
 0x7d6   :  { %1538 = vadd.xlane.f32.xlu0 %v1537_v62  ;;  %v1455_v50 = vpop.xlane.xlu0 %1454  ;;  %v1522_v23 = vmul.f32 %v4037_v57, %v4037_v57 }
 0x7d7   :  { %v4050_v14 = vsub.f32 %v3977_v5, %v1492_v20  ;;  %v1493_v54 = vmul.f32 0.03125, %v1455_v50  ;;  %v1523_v9 = vmul.f32 %v4044_v48, %v4044_v48 }
 0x7d8   :  { %v1458_v46 = vpop.xlane.xlu1 %1457  ;;  %v1540_v24 = vsel %vm225_vm1, %v1522_v23, 0.0 }
 0x7d9   :  { %v1654_v30 = vpack.c.bf16 %v4050_v14, %v4044_v48  ;;  %v4058_v11 = vsub.f32 %v3983_v25, %v1493_v54  ;;  %v1494_v47 = vmul.f32 0.03125, %v1458_v46  ;;  %1541 = vadd.xlane.f32.xlu1 %v1540_v24  ;;  %v1543_v59 = vsel %vm225_vm1, %v1523_v9, 0.0 }
 0x7da   :  { %1544 = vadd.xlane.f32.xlu0 %v1543_v59  ;;  %v1461_v5 = vpop.xlane.xlu0 %1460  ;;  %v1524_v6 = vmul.f32 %v4050_v14, %v4050_v14 }
 0x7db   :  { %v4064_v56 = vsub.f32 %v3989_v33, %v1494_v47  ;;  %v1495_v63 = vmul.f32 0.03125, %v1461_v5  ;;  %v1525_v28 = vmul.f32 %v4058_v11, %v4058_v11 }
 0x7dc   :  { %v1464_v58 = vpop.xlane.xlu1 %1463  ;;  %v1546_v25 = vsel %vm225_vm1, %v1524_v6, 0.0 }
 0x7dd   :  { %v1655_v21 = vpack.c.bf16 %v4064_v56, %v4058_v11  ;;  %v4072_v35 = vsub.f32 %v3987_v38, %v1495_v63  ;;  %v1496_v0 = vmul.f32 0.03125, %v1464_v58  ;;  %1547 = vadd.xlane.f32.xlu1 %v1546_v25  ;;  %v1549_v51 = vsel %vm225_vm1, %v1525_v28, 0.0 }
 0x7de   :  { %1550 = vadd.xlane.f32.xlu0 %v1549_v51  ;;  %v1467_v33 = vpop.xlane.xlu0 %1466  ;;  %v1526_v29 = vmul.f32 %v4064_v56, %v4064_v56 }
 0x7df   :  { %v4078_v17 = vsub.f32 %v3993_v22, %v1496_v0  ;;  %v1497_v42 = vmul.f32 0.03125, %v1467_v33  ;;  %v1527_v32 = vmul.f32 %v4072_v35, %v4072_v35 }
 0x7e0   :  { %v1470_v19 = vpop.xlane.xlu1 %1469  ;;  %v1552_v38 = vsel %vm225_vm1, %v1526_v29, 0.0 }
 0x7e1   :  { %v1656_v27 = vpack.c.bf16 %v4078_v17, %v4072_v35  ;;  %v4086_v16 = vsub.f32 %v3999_v45, %v1497_v42  ;;  %v1498_v60 = vmul.f32 0.03125, %v1470_v19  ;;  %1553 = vadd.xlane.f32.xlu1 %v1552_v38  ;;  %v1555_v31 = vsel %vm225_vm1, %v1527_v32, 0.0 }
 0x7e2   :  { %1556 = vadd.xlane.f32.xlu0 %v1555_v31  ;;  %v1473_v22 = vpop.xlane.xlu0 %1472  ;;  %v1528_v26 = vmul.f32 %v4078_v17, %v4078_v17 }
 0x7e3   :  { %v4092_v43 = vsub.f32 %v4005_v12, %v1498_v60  ;;  %v1499_v13 = vmul.f32 0.03125, %v1473_v22  ;;  %v1529_v44 = vmul.f32 %v4086_v16, %v4086_v16 }
 0x7e4   :  { %v1476_v4 = vpop.xlane.xlu1 %1475  ;;  %v1558_v45 = vsel %vm225_vm1, %v1528_v26, 0.0 }
 0x7e5   :  { %v1657_v40 = vpack.c.bf16 %v4092_v43, %v4086_v16  ;;  %v4100_v55 = vsub.f32 %v4003_v61, %v1499_v13  ;;  %v1500_v49 = vmul.f32 0.03125, %v1476_v4  ;;  %1559 = vadd.xlane.f32.xlu1 %v1558_v45  ;;  %v1561_v3 = vsel %vm225_vm1, %v1529_v44, 0.0 }
 0x7e6   :  { %1562 = vadd.xlane.f32.xlu0 %v1561_v3  ;;  %v1479_v12 = vpop.xlane.xlu0 %1478  ;;  %v1530_v53 = vmul.f32 %v4092_v43, %v4092_v43 }
 0x7e7   :  { %v4106_v18 = vsub.f32 %v4009_v36, %v1500_v49  ;;  %v1501_v15 = vmul.f32 0.03125, %v1479_v12  ;;  %v1531_v10 = vmul.f32 %v4100_v55, %v4100_v55  ;;  %v1303_v49 = vld [vmem:[%s4827_s3 + $0xb] sm:$0x1] }
 0x7e8   :  { %v1564_v7 = vsel %vm225_vm1, %v1530_v53, 0.0  ;;  %v1482_v61 = vpop.xlane.xlu1 %1481 }
 0x7e9   :  { %v1658_v20 = vpack.c.bf16 %v4106_v18, %v4100_v55  ;;  %v4114_v62 = vsub.f32 %v4015_v39, %v1501_v15  ;;  %1565 = vadd.xlane.f32.xlu1 %v1564_v7  ;;  %v1502_v50 = vmul.f32 0.03125, %v1482_v61  ;;  %v1567_v23 = vsel %vm225_vm1, %v1531_v10, 0.0 }
 0x7ea   :  { %1568 = vadd.xlane.f32.xlu0 %v1567_v23  ;;  %v1485_v36 = vpop.xlane.xlu0 %1484  ;;  %v1532_v54 = vmul.f32 %v4106_v18, %v4106_v18  ;;  %v1677_v7 = vpack.c.bf16 %v1303_v49, %v1303_v49 }
 0x7eb   :  { %v4120_v9 = vsub.f32 %v4021_v37, %v1502_v50  ;;  %v1503_v46 = vmul.f32 0.03125, %v1485_v36  ;;  %v1533_v24 = vmul.f32 %v4114_v62, %v4114_v62 }
 0x7ec   :  { %v1570_v47 = vsel %vm225_vm1, %v1532_v54, 0.0  ;;  %v1488_v39 = vpop.xlane.xlu1 %1487 }
 0x7ed   :  { %v1659_v59 = vpack.c.bf16 %v4120_v9, %v4114_v62  ;;  %v4128_v5 = vsub.f32 %v4019_v34, %v1503_v46  ;;  %1571 = vadd.xlane.f32.xlu1 %v1570_v47  ;;  %v1504_v6 = vmul.f32 0.03125, %v1488_v39  ;;  %v1573_v63 = vsel %vm225_vm1, %v1533_v24, 0.0  ;;  %v4151_v46 = vld [vmem:[%s4827_s3 + $0xa] ss:$0 sm:$0xff]  ;;  %v2689_v62 = vld [vmem:[%s4827_s3 + $0xc] ss:$0 sm:$0xff] }
 0x7ee   :  { %1574 = vadd.xlane.f32.xlu0 %v1573_v63  ;;  %v1534_v37 = vmul.f32 %v4120_v9, %v4120_v9  ;;  %v1679_v39 = vpack.i.b16 %v1677_v7, %v1677_v7 }
 0x7ef   :  { %v4134_v28 = vsub.f32 %v4025_v2, %v1504_v6  ;;  %v1535_v58 = vmul.f32 %v4128_v5, %v4128_v5  ;;  %v2908_v2 = vld [vmem:[#allocation2 + $0x38] sm:$0xff]  }
 0x7f0   :  { %v1576_v25 = vsel %vm225_vm1, %v1534_v37, 0.0  ;;  %2852 = vmatprep.subr.bf16.mxu0 %v2908_v2 }
 0x7f1   :  { %v1660_v34 = vpack.c.bf16 %v4134_v28, %v4128_v5  ;;  %1577 = vadd.xlane.f32.xlu1 %v1576_v25  ;;  %v1579_v0 = vsel %vm225_vm1, %v1535_v58, 0.0  ;;  %v1536_v51 = vmul.f32 %v4134_v28, %v4134_v28  ;;  %2853 = vmatpush3.bf16.msra.mxu0 %v2908_v2 }
 0x7f2   :  { %1580 = vadd.xlane.f32.xlu0 %v1579_v0 }
 0x7f3   :  { %v1582_v33 = vsel %vm225_vm1, %v1536_v51, 0.0 }
 0x7f5   :  { %1583 = vadd.xlane.f32.xlu1 %v1582_v33 }
 0x863   :  { %v1539_v29 = vpop.xlane.xlu0 %1538 }
 0x864   :  { %v1585_v42 = vmul.f32 0.03125, %v1539_v29 }
 0x866   :  { %v1601_v32 = vadd.f32 1e-05, %v1585_v42  ;;  %v1542_v19 = vpop.xlane.xlu1 %1541  ;;  %v4156_v42 = vrot.slane %v1679_v39, %v3389_v52 }
 0x867   :  { %v1586_v38 = vmul.f32 0.03125, %v1542_v19  ;;  %v1545_v60 = vpop.xlane.xlu0 %1544 }
 0x868   :  { %v1587_v31 = vmul.f32 0.03125, %v1545_v60  ;;  %3006 = vrsqrt.f32 %v1601_v32 }
 0x869   :  { %v1602_v22 = vadd.f32 1e-05, %v1586_v38 }
 0x86a   :  { %v1603_v26 = vadd.f32 1e-05, %v1587_v31  ;;  %v1548_v13 = vpop.xlane.xlu1 %1547 }
 0x86b   :  { %3008 = vrsqrt.f32 %v1602_v22  ;;  %v1588_v44 = vmul.f32 0.03125, %v1548_v13  ;;  %v1551_v4 = vpop.xlane.xlu0 %1550 }
 0x86c   :  { %v1589_v45 = vmul.f32 0.03125, %v1551_v4  ;;  %3010 = vrsqrt.f32 %v1603_v26 }
 0x86d   :  { %v1604_v3 = vadd.f32 1e-05, %v1588_v44 }
 0x86e   :  { %v1605_v12 = vadd.f32 1e-05, %v1589_v45  ;;  %v1554_v53 = vpop.xlane.xlu1 %1553 }
 0x86f   :  { %3012 = vrsqrt.f32 %v1604_v3  ;;  %v1590_v15 = vmul.f32 0.03125, %v1554_v53  ;;  %v1557_v10 = vpop.xlane.xlu0 %1556 }
 0x870   :  { %3014 = vrsqrt.f32 %v1605_v12  ;;  %v1591_v61 = vmul.f32 0.03125, %v1557_v10 }
 0x871   :  { %v1606_v50 = vadd.f32 1e-05, %v1590_v15 }
 0x872   :  { %v1607_v23 = vadd.f32 1e-05, %v1591_v61  ;;  %v1560_v36 = vpop.xlane.xlu1 %1559  ;;  %v3007_v54 = vpop.eup %3006 }
 0x873   :  { %3016 = vrsqrt.f32 %v1606_v50  ;;  %v1592_v24 = vmul.f32 0.03125, %v1560_v36  ;;  %v1563_v47 = vpop.xlane.xlu0 %1562  ;;  %v1637_v58 = vmul.f32 %v3007_v54, %v4151_v46 }
 0x874   :  { %3018 = vrsqrt.f32 %v1607_v23  ;;  %v1593_v6 = vmul.f32 0.03125, %v1563_v47 }
 0x875   :  { %v3009_v63 = vpop.eup %3008  ;;  %v1608_v37 = vadd.f32 1e-05, %v1592_v24 }
 0x876   :  { %v1638_v25 = vmul.f32 %v3009_v63, %v4151_v46  ;;  %v1609_v0 = vadd.f32 1e-05, %v1593_v6  ;;  %v1566_v51 = vpop.xlane.xlu1 %1565  ;;  %v3011_v33 = vpop.eup %3010 }
 0x877   :  { %3020 = vrsqrt.f32 %v1608_v37  ;;  %v1594_v2 = vmul.f32 0.03125, %v1566_v51  ;;  %v1569_v29 = vpop.xlane.xlu0 %1568  ;;  %v1639_v22 = vmul.f32 %v3011_v33, %v4151_v46 }
 0x878   :  { %v1595_v32 = vmul.f32 0.03125, %v1569_v29  ;;  %v1661_v19 = vpack.c.bf16 %v1638_v25, %v1637_v58  ;;  %3022 = vrsqrt.f32 %v1609_v0 }
 0x879   :  { %v3013_v38 = vpop.eup %3012  ;;  %v1610_v60 = vadd.f32 1e-05, %v1594_v2 }
 0x87a   :  { %v3015_v31 = vpop.eup %3014  ;;  %v1640_v26 = vmul.f32 %v3013_v38, %v4151_v46  ;;  %v1611_v13 = vadd.f32 1e-05, %v1595_v32  ;;  %v1572_v44 = vpop.xlane.xlu1 %1571  ;;  %v1669_v4 = vmul.bf16 %v1661_v19, %v1653_v41 }
 0x87b   :  { %3024 = vrsqrt.f32 %v1610_v60  ;;  %v1596_v45 = vmul.f32 0.03125, %v1572_v44  ;;  %v1575_v49 = vpop.xlane.xlu0 %1574  ;;  %v1641_v10 = vmul.f32 %v3015_v31, %v4151_v46 }
 0x87c   :  { %v1662_v3 = vpack.c.bf16 %v1640_v26, %v1639_v22  ;;  %v1597_v12 = vmul.f32 0.03125, %v1575_v49  ;;  %v1685_v53 = vadd.bf16 %v4156_v42, %v1669_v4  ;;  %3026 = vrsqrt.f32 %v1611_v13 }
 0x87d   :  { %v3017_v15 = vpop.eup %3016  ;;  %v1612_v7 = vadd.f32 1e-05, %v1596_v45 }
 0x87e   :  { %v3019_v61 = vpop.eup %3018  ;;  %v1670_v50 = vmul.bf16 %v1662_v3, %v1654_v30  ;;  %v1642_v1 = vmul.f32 %v3017_v15, %v4151_v46  ;;  %v1613_v57 = vadd.f32 1e-05, %v1597_v12  ;;  %v1578_v41 = vpop.xlane.xlu1 %1577  ;;  %v1693_v23 = vmax.bf16 %v3129_v8, %v1685_v53 }
 0x87f   :  { %3028 = vrsqrt.f32 %v1612_v7  ;;  %v1598_v36 = vmul.f32 0.03125, %v1578_v41  ;;  %v1581_v54 = vpop.xlane.xlu0 %1580  ;;  %v1643_v63 = vmul.f32 %v3019_v61, %v4151_v46 }
 0x880   :  { %v1686_v24 = vadd.bf16 %v4156_v42, %v1670_v50  ;;  %2854 = vmatprep.mubr.msk.bf16.mxu0 %vm225_vm1, %v1693_v23  ;;  %v1599_v47 = vmul.f32 0.03125, %v1581_v54  ;;  %v1663_v39 = vpack.c.bf16 %v1642_v1, %v1641_v10  ;;  %3030 = vrsqrt.f32 %v1613_v57 }
 0x881   :  { %v3021_v6 = vpop.eup %3020  ;;  %v1614_v48 = vadd.f32 1e-05, %v1598_v36 }
 0x882   :  { %v1644_v14 = vmul.f32 %v3021_v6, %v4151_v46  ;;  %v1615_v30 = vadd.f32 1e-05, %v1599_v47  ;;  %v1584_v37 = vpop.xlane.xlu1 %1583  ;;  %v1694_v58 = vmax.bf16 %v3129_v8, %v1686_v24  ;;  %v1671_v25 = vmul.bf16 %v1663_v39, %v1655_v21  ;;  %v3023_v0 = vpop.eup %3022 }
 0x883   :  { %3032 = vrsqrt.f32 %v1614_v48  ;;  %v1600_v51 = vmul.f32 0.03125, %v1584_v37  ;;  %v1645_v19 = vmul.f32 %v3023_v0, %v4151_v46 }
 0x884   :  { %2855 = vmatmul.mubr.msk.bf16.vlgmr.msra.gmra.mrb[32].mxu0 %vm225_vm1, %v1694_v58  ;;  %v1687_v33 = vadd.bf16 %v4156_v42, %v1671_v25  ;;  %v1664_v2 = vpack.c.bf16 %v1644_v14, %v1643_v63  ;;  %3034 = vrsqrt.f32 %v1615_v30 }
 0x885   :  { %v3025_v29 = vpop.eup %3024  ;;  %v1616_v32 = vadd.f32 1e-05, %v1600_v51 }
 0x886   :  { %v1646_v38 = vmul.f32 %v3025_v29, %v4151_v46  ;;  %v1695_v60 = vmax.bf16 %v3129_v8, %v1687_v33  ;;  %v1672_v11 = vmul.bf16 %v1664_v2, %v1656_v27  ;;  %v3027_v56 = vpop.eup %3026 }
 0x887   :  { %3036 = vrsqrt.f32 %v1616_v32  ;;  %v1647_v26 = vmul.f32 %v3027_v56, %v4151_v46 }
 0x888   :  { %2858 = vmatprep.mubr.msk.bf16.mxu0 %vm225_vm1, %v1695_v60  ;;  %v1688_v21 = vadd.bf16 %v4156_v42, %v1672_v11  ;;  %v1665_v31 = vpack.c.bf16 %v1646_v38, %v1645_v19 }
 0x889   :  { %v3029_v22 = vpop.eup %3028 }
 0x88a   :  { %v1648_v13 = vmul.f32 %v3029_v22, %v4151_v46  ;;  %v1696_v44 = vmax.bf16 %v3129_v8, %v1688_v21  ;;  %v1673_v4 = vmul.bf16 %v1665_v31, %v1657_v40  ;;  %v3031_v35 = vpop.eup %3030 }
 0x88b   :  { %v1649_v49 = vmul.f32 %v3031_v35, %v4151_v46 }
 0x88c   :  { %2859 = vmatmul.mubr.msk.bf16.gmra.mrb[36].mxu0 %vm225_vm1, %v1696_v44  ;;  %v1689_v17 = vadd.bf16 %v4156_v42, %v1673_v4  ;;  %v1666_v27 = vpack.c.bf16 %v1648_v13, %v1647_v26 }
 0x88d   :  { %v3033_v45 = vpop.eup %3032 }
 0x88e   :  { %v1650_v3 = vmul.f32 %v3033_v45, %v4151_v46  ;;  %v1697_v12 = vmax.bf16 %v3129_v8, %v1689_v17  ;;  %v1674_v53 = vmul.bf16 %v1666_v27, %v1658_v20  ;;  %v3035_v15 = vpop.eup %3034 }
 0x88f   :  { %v1651_v10 = vmul.f32 %v3035_v15, %v4151_v46 }
 0x890   :  { %2862 = vmatprep.mubr.msk.bf16.mxu0 %vm225_vm1, %v1697_v12  ;;  %v1690_v16 = vadd.bf16 %v4156_v42, %v1674_v53  ;;  %v1667_v43 = vpack.c.bf16 %v1650_v3, %v1649_v49 }
 0x891   :  { %v3037_v40 = vpop.eup %3036 }
 0x892   :  { %v1652_v7 = vmul.f32 %v3037_v40, %v4151_v46  ;;  %v1698_v61 = vmax.bf16 %v3129_v8, %v1690_v16  ;;  %v1675_v50 = vmul.bf16 %v1667_v43, %v1659_v59  ;;  %v2909_v16 = vld [vmem:[#allocation2 + $0x40] sm:$0xff]  }
 0x893   :  { %2870 = vmatprep.subr.bf16.mxu1 %v2909_v16 }
 0x894   :  { %2863 = vmatmul.mubr.msk.bf16.gmra.mrb[40].mxu0 %vm225_vm1, %v1698_v61  ;;  %v1691_v55 = vadd.bf16 %v4156_v42, %v1675_v50  ;;  %v1668_v18 = vpack.c.bf16 %v1652_v7, %v1651_v10  ;;  %2871 = vmatpush3.bf16.msra.mxu1 %v2909_v16 }
 0x896   :  { %v1699_v20 = vmax.bf16 %v3129_v8, %v1691_v55  ;;  %v1676_v1 = vmul.bf16 %v1668_v18, %v1660_v34 }
 0x898   :  { %2866 = vmatprep.mubr.msk.bf16.mxu0 %vm225_vm1, %v1699_v20  ;;  %v1692_v46 = vadd.bf16 %v4156_v42, %v1676_v1 }
 0x89a   :  { %v1700_v57 = vmax.bf16 %v3129_v8, %v1692_v46 }
 0x89c   :  { %2867 = vmatmul.mubr.msk.bf16.gmra.mrb[44].mxu0 %vm225_vm1, %v1700_v57 }
 0x957   :  { %v2856_v9 = vpop.f32.mrb[32].mxu0 }
 0x958   :  { %v1783_v59 = vpop.f32.mrb[33].mxu0  ;;  %v4225_v5 = vadd.f32 %v2856_v9, %v2689_v62 }
 0x959   :  { %v4223_v41 = vadd.f32 %v2689_v62, %v1783_v59  ;;  %v2857_v23 = vpop.f32.mrb[34].mxu0 }
 0x95a   :  { %v1786_v36 = vpop.f32.mrb[35].mxu0  ;;  %v4231_v42 = vadd.f32 %v2857_v23, %v2689_v62  ;;  %v1852_v47 = vsel %vm103_vm0, %v4225_v5, 0.0 }
 0x95b   :  { %v4227_v28 = vadd.f32 %v2689_v62, %v1786_v36  ;;  %v1846_v34 = vsel %vm103_vm0, %v4223_v41, 0.0 }
 0x95c   :  { %1847 = vadd.xlane.f32.xlu0 %v1846_v34  ;;  %v1855_v48 = vsel %vm103_vm0, %v4231_v42, 0.0 }
 0x95d   :  { %v1849_v54 = vsel %vm103_vm0, %v4227_v28, 0.0 }
 0x95e   :  { %1850 = vadd.xlane.f32.xlu1 %v1849_v54 }
 0x95f   :  { %v2860_v24 = vpop.f32.mrb[36].mxu0 }
 0x960   :  { %1853 = vadd.xlane.f32.xlu0 %v1852_v47  ;;  %v1799_v39 = vpop.f32.mrb[37].mxu0  ;;  %v4241_v30 = vadd.f32 %v2860_v24, %v2689_v62 }
 0x961   :  { %v4237_v6 = vadd.f32 %v2689_v62, %v1799_v39  ;;  %v2861_v63 = vpop.f32.mrb[38].mxu0 }
 0x962   :  { %1856 = vadd.xlane.f32.xlu1 %v1855_v48  ;;  %v1802_v14 = vpop.f32.mrb[39].mxu0  ;;  %v4247_v25 = vadd.f32 %v2861_v63, %v2689_v62  ;;  %v1864_v33 = vsel %vm103_vm0, %v4241_v30, 0.0 }
 0x963   :  { %v4243_v37 = vadd.f32 %v2689_v62, %v1802_v14  ;;  %v1858_v58 = vsel %vm103_vm0, %v4237_v6, 0.0 }
 0x964   :  { %1859 = vadd.xlane.f32.xlu0 %v1858_v58  ;;  %v1867_v19 = vsel %vm103_vm0, %v4247_v25, 0.0 }
 0x965   :  { %v1861_v0 = vsel %vm103_vm0, %v4243_v37, 0.0 }
 0x966   :  { %1862 = vadd.xlane.f32.xlu1 %v1861_v0 }
 0x967   :  { %v2864_v51 = vpop.f32.mrb[40].mxu0 }
 0x968   :  { %1865 = vadd.xlane.f32.xlu0 %v1864_v33  ;;  %v1815_v2 = vpop.f32.mrb[41].mxu0  ;;  %v4257_v60 = vadd.f32 %v2864_v51, %v2689_v62 }
 0x969   :  { %v4253_v29 = vadd.f32 %v2689_v62, %v1815_v2  ;;  %v2865_v32 = vpop.f32.mrb[42].mxu0 }
 0x96a   :  { %1868 = vadd.xlane.f32.xlu1 %v1867_v19  ;;  %v1818_v38 = vpop.f32.mrb[43].mxu0  ;;  %v4263_v21 = vadd.f32 %v2865_v32, %v2689_v62  ;;  %v1876_v26 = vsel %vm103_vm0, %v4257_v60, 0.0 }
 0x96b   :  { %v4259_v11 = vadd.f32 %v2689_v62, %v1818_v38  ;;  %v1870_v56 = vsel %vm103_vm0, %v4253_v29, 0.0 }
 0x96c   :  { %1871 = vadd.xlane.f32.xlu0 %v1870_v56  ;;  %v1879_v35 = vsel %vm103_vm0, %v4263_v21, 0.0 }
 0x96d   :  { %v1873_v31 = vsel %vm103_vm0, %v4259_v11, 0.0 }
 0x96e   :  { %1874 = vadd.xlane.f32.xlu1 %v1873_v31 }
 0x96f   :  { %v2868_v22 = vpop.f32.mrb[44].mxu0 }
 0x970   :  { %1877 = vadd.xlane.f32.xlu0 %v1876_v26  ;;  %v1831_v13 = vpop.f32.mrb[45].mxu0  ;;  %v4273_v27 = vadd.f32 %v2868_v22, %v2689_v62 }
 0x971   :  { %v4269_v44 = vadd.f32 %v2689_v62, %v1831_v13  ;;  %v2869_v4 = vpop.f32.mrb[46].mxu0 }
 0x972   :  { %1880 = vadd.xlane.f32.xlu1 %v1879_v35  ;;  %v1834_v17 = vpop.f32.mrb[47].mxu0  ;;  %v4279_v3 = vadd.f32 %v2869_v4, %v2689_v62  ;;  %v1888_v53 = vsel %vm103_vm0, %v4273_v27, 0.0 }
 0x973   :  { %v4275_v45 = vadd.f32 %v2689_v62, %v1834_v17  ;;  %v1882_v49 = vsel %vm103_vm0, %v4269_v44, 0.0 }
 0x974   :  { %1883 = vadd.xlane.f32.xlu0 %v1882_v49  ;;  %v1891_v15 = vsel %vm103_vm0, %v4279_v3, 0.0 }
 0x975   :  { %v1885_v12 = vsel %vm103_vm0, %v4275_v45, 0.0 }
 0x976   :  { %1886 = vadd.xlane.f32.xlu1 %v1885_v12 }
 0x978   :  { %1889 = vadd.xlane.f32.xlu0 %v1888_v53 }
 0x97a   :  { %1892 = vadd.xlane.f32.xlu1 %v1891_v15 }
 0x9e9   :  { %v1848_v43 = vpop.xlane.xlu0 %1847 }
 0x9ea   :  { %v1895_v40 = vmul.f32 0.0625, %v1848_v43 }
 0x9eb   :  { %v1851_v10 = vpop.xlane.xlu1 %1850 }
 0x9ec   :  { %v4288_v7 = vsub.f32 %v4223_v41, %v1895_v40  ;;  %v1896_v61 = vmul.f32 0.0625, %v1851_v10 }
 0x9ed   :  { %v1854_v50 = vpop.xlane.xlu0 %1853 }
 0x9ee   :  { %v4291_v55 = vsub.f32 %v4227_v28, %v1896_v61  ;;  %v1897_v18 = vmul.f32 0.0625, %v1854_v50  ;;  %v1927_v20 = vmul.f32 %v4288_v7, %v4288_v7 }
 0x9ef   :  { %v1857_v1 = vpop.xlane.xlu1 %1856 }
 0x9f0   :  { %v2059_v46 = vpack.c.bf16 %v4291_v55, %v4288_v7  ;;  %v4298_v57 = vsub.f32 %v4225_v5, %v1897_v18  ;;  %v1898_v62 = vmul.f32 0.0625, %v1857_v1  ;;  %v1943_v9 = vsel %vm103_vm0, %v1927_v20, 0.0 }
 0x9f1   :  { %1944 = vadd.xlane.f32.xlu0 %v1943_v9  ;;  %v1860_v59 = vpop.xlane.xlu0 %1859  ;;  %v1928_v41 = vmul.f32 %v4291_v55, %v4291_v55 }
 0x9f2   :  { %v4304_v23 = vsub.f32 %v4231_v42, %v1898_v62  ;;  %v1899_v36 = vmul.f32 0.0625, %v1860_v59  ;;  %v1929_v28 = vmul.f32 %v4298_v57, %v4298_v57 }
 0x9f3   :  { %v1863_v34 = vpop.xlane.xlu1 %1862  ;;  %v1946_v54 = vsel %vm103_vm0, %v1928_v41, 0.0 }
 0x9f4   :  { %v2060_v5 = vpack.c.bf16 %v4304_v23, %v4298_v57  ;;  %v4312_v24 = vsub.f32 %v4237_v6, %v1899_v36  ;;  %v1900_v47 = vmul.f32 0.0625, %v1863_v34  ;;  %1947 = vadd.xlane.f32.xlu1 %v1946_v54  ;;  %v1949_v39 = vsel %vm103_vm0, %v1929_v28, 0.0 }
 0x9f5   :  { %1950 = vadd.xlane.f32.xlu0 %v1949_v39  ;;  %v1866_v42 = vpop.xlane.xlu0 %1865  ;;  %v1930_v63 = vmul.f32 %v4304_v23, %v4304_v23 }
 0x9f6   :  { %v4318_v48 = vsub.f32 %v4243_v37, %v1900_v47  ;;  %v1901_v14 = vmul.f32 0.0625, %v1866_v42  ;;  %v1931_v58 = vmul.f32 %v4312_v24, %v4312_v24 }
 0x9f7   :  { %v1869_v0 = vpop.xlane.xlu1 %1868  ;;  %v1952_v6 = vsel %vm103_vm0, %v1930_v63, 0.0 }
 0x9f8   :  { %v2061_v51 = vpack.c.bf16 %v4318_v48, %v4312_v24  ;;  %v4326_v33 = vsub.f32 %v4241_v30, %v1901_v14  ;;  %v1902_v2 = vmul.f32 0.0625, %v1869_v0  ;;  %1953 = vadd.xlane.f32.xlu1 %v1952_v6  ;;  %v1955_v32 = vsel %vm103_vm0, %v1931_v58, 0.0 }
 0x9f9   :  { %1956 = vadd.xlane.f32.xlu0 %v1955_v32  ;;  %v1872_v37 = vpop.xlane.xlu0 %1871  ;;  %v1932_v19 = vmul.f32 %v4318_v48, %v4318_v48 }
 0x9fa   :  { %v4332_v38 = vsub.f32 %v4247_v25, %v1902_v2  ;;  %v1903_v56 = vmul.f32 0.0625, %v1872_v37  ;;  %v1933_v31 = vmul.f32 %v4326_v33, %v4326_v33 }
 0x9fb   :  { %v1875_v22 = vpop.xlane.xlu1 %1874  ;;  %v1958_v30 = vsel %vm103_vm0, %v1932_v19, 0.0 }
 0x9fc   :  { %v2062_v26 = vpack.c.bf16 %v4332_v38, %v4326_v33  ;;  %v4340_v13 = vsub.f32 %v4253_v29, %v1903_v56  ;;  %v1904_v4 = vmul.f32 0.0625, %v1875_v22  ;;  %1959 = vadd.xlane.f32.xlu1 %v1958_v30  ;;  %v1961_v35 = vsel %vm103_vm0, %v1933_v31, 0.0 }
 0x9fd   :  { %1962 = vadd.xlane.f32.xlu0 %v1961_v35  ;;  %v1878_v25 = vpop.xlane.xlu0 %1877  ;;  %v1934_v17 = vmul.f32 %v4332_v38, %v4332_v38 }
 0x9fe   :  { %v4346_v49 = vsub.f32 %v4259_v11, %v1904_v4  ;;  %v1905_v12 = vmul.f32 0.0625, %v1878_v25  ;;  %v1935_v53 = vmul.f32 %v4340_v13, %v4340_v13 }
 0x9ff   :  { %v1881_v15 = vpop.xlane.xlu1 %1880  ;;  %v1964_v29 = vsel %vm103_vm0, %v1934_v17, 0.0 }
 0xa00   :  { %v2063_v16 = vpack.c.bf16 %v4346_v49, %v4340_v13  ;;  %v4354_v43 = vsub.f32 %v4257_v60, %v1905_v12  ;;  %v1906_v40 = vmul.f32 0.0625, %v1881_v15  ;;  %1965 = vadd.xlane.f32.xlu1 %v1964_v29  ;;  %v1967_v10 = vsel %vm103_vm0, %v1935_v53, 0.0  ;;  %v1708_v29 = vld [vmem:[%s4827_s3 + $0xe] sm:$0x1] }
 0xa01   :  { %1968 = vadd.xlane.f32.xlu0 %v1967_v10  ;;  %v1884_v11 = vpop.xlane.xlu0 %1883  ;;  %v1936_v61 = vmul.f32 %v4346_v49, %v4346_v49 }
 0xa02   :  { %v4360_v50 = vsub.f32 %v4263_v21, %v1906_v40  ;;  %v1907_v18 = vmul.f32 0.0625, %v1884_v11  ;;  %v1937_v20 = vmul.f32 %v4354_v43, %v4354_v43 }
 0xa03   :  { %v1970_v1 = vsel %vm103_vm0, %v1936_v61, 0.0  ;;  %v1887_v60 = vpop.xlane.xlu1 %1886 }
 0xa04   :  { %v2064_v62 = vpack.c.bf16 %v4360_v50, %v4354_v43  ;;  %v4368_v9 = vsub.f32 %v4269_v44, %v1907_v18  ;;  %1971 = vadd.xlane.f32.xlu1 %v1970_v1  ;;  %v1908_v59 = vmul.f32 0.0625, %v1887_v60  ;;  %v1973_v41 = vsel %vm103_vm0, %v1937_v20, 0.0 }
 0xa05   :  { %1974 = vadd.xlane.f32.xlu0 %v1973_v41  ;;  %v1890_v21 = vpop.xlane.xlu0 %1889  ;;  %v1938_v36 = vmul.f32 %v4360_v50, %v4360_v50  ;;  %v2083_v20 = vpack.c.bf16 %v1708_v29, %v1708_v29 }
 0xa06   :  { %v4374_v28 = vsub.f32 %v4275_v45, %v1908_v59  ;;  %v1909_v34 = vmul.f32 0.0625, %v1890_v21  ;;  %v1939_v54 = vmul.f32 %v4368_v9, %v4368_v9 }
 0xa07   :  { %v1976_v47 = vsel %vm103_vm0, %v1938_v36, 0.0  ;;  %v1893_v44 = vpop.xlane.xlu1 %1892  ;;  %v4405_v36 = vld [vmem:[%s4827_s3 + $0xd] ss:$0 sm:$0xff] }
 0xa08   :  { %v2065_v39 = vpack.c.bf16 %v4374_v28, %v4368_v9  ;;  %v4382_v42 = vsub.f32 %v4273_v27, %v1909_v34  ;;  %1977 = vadd.xlane.f32.xlu1 %v1976_v47  ;;  %v1910_v63 = vmul.f32 0.0625, %v1893_v44  ;;  %v1979_v14 = vsel %vm103_vm0, %v1939_v54, 0.0  ;;  %v2701_v9 = vld [vmem:[%s4827_s3 + $0xf] ss:$0 sm:$0xff] }
 0xa09   :  { %1980 = vadd.xlane.f32.xlu0 %v1979_v14  ;;  %v1940_v45 = vmul.f32 %v4374_v28, %v4374_v28  ;;  %v2085_v47 = vpack.i.b16 %v2083_v20, %v2083_v20 }
 0xa0a   :  { %v4388_v58 = vsub.f32 %v4279_v3, %v1910_v63  ;;  %v1941_v0 = vmul.f32 %v4382_v42, %v4382_v42 }
 0xa0b   :  { %v1982_v6 = vsel %vm103_vm0, %v1940_v45, 0.0 }
 0xa0c   :  { %v2066_v27 = vpack.c.bf16 %v4388_v58, %v4382_v42  ;;  %1983 = vadd.xlane.f32.xlu1 %v1982_v6  ;;  %v1985_v2 = vsel %vm103_vm0, %v1941_v0, 0.0  ;;  %v1942_v32 = vmul.f32 %v4388_v58, %v4388_v58 }
 0xa0d   :  { %1986 = vadd.xlane.f32.xlu0 %v1985_v2 }
 0xa0e   :  { %v1988_v37 = vsel %vm103_vm0, %v1942_v32, 0.0 }
 0xa10   :  { %1989 = vadd.xlane.f32.xlu1 %v1988_v37 }
 0xa7e   :  { %v1945_v3 = vpop.xlane.xlu0 %1944 }
 0xa7f   :  { %v1991_v19 = vmul.f32 0.0625, %v1945_v3 }
 0xa81   :  { %v2007_v56 = vadd.f32 1e-05, %v1991_v19  ;;  %v1948_v31 = vpop.xlane.xlu1 %1947  ;;  %v4410_v19 = vrot.slane %v2085_v47, %v3389_v52 }
 0xa82   :  { %v1992_v22 = vmul.f32 0.0625, %v1948_v31  ;;  %v1951_v30 = vpop.xlane.xlu0 %1950 }
 0xa83   :  { %v1993_v4 = vmul.f32 0.0625, %v1951_v30  ;;  %3038 = vrsqrt.f32 %v2007_v56 }
 0xa84   :  { %v2008_v35 = vadd.f32 1e-05, %v1992_v22 }
 0xa85   :  { %v2009_v25 = vadd.f32 1e-05, %v1993_v4  ;;  %v1954_v17 = vpop.xlane.xlu1 %1953 }
 0xa86   :  { %3040 = vrsqrt.f32 %v2008_v35  ;;  %v1994_v12 = vmul.f32 0.0625, %v1954_v17  ;;  %v1957_v53 = vpop.xlane.xlu0 %1956 }
 0xa87   :  { %v1995_v15 = vmul.f32 0.0625, %v1957_v53  ;;  %3042 = vrsqrt.f32 %v2009_v25 }
 0xa88   :  { %v2010_v40 = vadd.f32 1e-05, %v1994_v12 }
 0xa89   :  { %v2011_v10 = vadd.f32 1e-05, %v1995_v15  ;;  %v1960_v11 = vpop.xlane.xlu1 %1959 }
 0xa8a   :  { %3044 = vrsqrt.f32 %v2010_v40  ;;  %v1996_v61 = vmul.f32 0.0625, %v1960_v11  ;;  %v1963_v18 = vpop.xlane.xlu0 %1962 }
 0xa8b   :  { %3046 = vrsqrt.f32 %v2011_v10  ;;  %v1997_v1 = vmul.f32 0.0625, %v1963_v18 }
 0xa8c   :  { %v2012_v60 = vadd.f32 1e-05, %v1996_v61 }
 0xa8d   :  { %v2013_v59 = vadd.f32 1e-05, %v1997_v1  ;;  %v1966_v41 = vpop.xlane.xlu1 %1965  ;;  %v3039_v21 = vpop.eup %3038 }
 0xa8e   :  { %3048 = vrsqrt.f32 %v2012_v60  ;;  %v1998_v34 = vmul.f32 0.0625, %v1966_v41  ;;  %v1969_v54 = vpop.xlane.xlu0 %1968  ;;  %v2043_v45 = vmul.f32 %v3039_v21, %v4405_v36 }
 0xa8f   :  { %3050 = vrsqrt.f32 %v2013_v59  ;;  %v1999_v44 = vmul.f32 0.0625, %v1969_v54 }
 0xa90   :  { %v3041_v63 = vpop.eup %3040  ;;  %v2014_v14 = vadd.f32 1e-05, %v1998_v34 }
 0xa91   :  { %v2044_v0 = vmul.f32 %v3041_v63, %v4405_v36  ;;  %v2015_v6 = vadd.f32 1e-05, %v1999_v44  ;;  %v1972_v2 = vpop.xlane.xlu1 %1971  ;;  %v3043_v32 = vpop.eup %3042 }
 0xa92   :  { %3052 = vrsqrt.f32 %v2014_v14  ;;  %v2000_v37 = vmul.f32 0.0625, %v1972_v2  ;;  %v1975_v3 = vpop.xlane.xlu0 %1974  ;;  %v2045_v35 = vmul.f32 %v3043_v32, %v4405_v36 }
 0xa93   :  { %v2001_v56 = vmul.f32 0.0625, %v1975_v3  ;;  %v2067_v31 = vpack.c.bf16 %v2044_v0, %v2043_v45  ;;  %3054 = vrsqrt.f32 %v2015_v6 }
 0xa94   :  { %v3045_v22 = vpop.eup %3044  ;;  %v2016_v30 = vadd.f32 1e-05, %v2000_v37 }
 0xa95   :  { %v3047_v4 = vpop.eup %3046  ;;  %v2046_v25 = vmul.f32 %v3045_v22, %v4405_v36  ;;  %v2017_v17 = vadd.f32 1e-05, %v2001_v56  ;;  %v1978_v12 = vpop.xlane.xlu1 %1977  ;;  %v2075_v53 = vmul.bf16 %v2067_v31, %v2059_v46 }
 0xa96   :  { %3056 = vrsqrt.f32 %v2016_v30  ;;  %v2002_v15 = vmul.f32 0.0625, %v1978_v12  ;;  %v1981_v29 = vpop.xlane.xlu0 %1980  ;;  %v2047_v18 = vmul.f32 %v3047_v4, %v4405_v36 }
 0xa97   :  { %v2068_v40 = vpack.c.bf16 %v2046_v25, %v2045_v35  ;;  %v2003_v10 = vmul.f32 0.0625, %v1981_v29  ;;  %v2091_v11 = vadd.bf16 %v4410_v19, %v2075_v53  ;;  %3058 = vrsqrt.f32 %v2017_v17 }
 0xa98   :  { %v3049_v61 = vpop.eup %3048  ;;  %v2018_v20 = vadd.f32 1e-05, %v2002_v15 }
 0xa99   :  { %v3051_v1 = vpop.eup %3050  ;;  %v2076_v60 = vmul.bf16 %v2068_v40, %v2060_v5  ;;  %v2048_v7 = vmul.f32 %v3049_v61, %v4405_v36  ;;  %v2019_v55 = vadd.f32 1e-05, %v2003_v10  ;;  %v1984_v46 = vpop.xlane.xlu1 %1983  ;;  %v2099_v59 = vmax.bf16 %v3129_v8, %v2091_v11 }
 0xa9a   :  { %3060 = vrsqrt.f32 %v2018_v20  ;;  %v2004_v41 = vmul.f32 0.0625, %v1984_v46  ;;  %v1987_v21 = vpop.xlane.xlu0 %1986  ;;  %v2049_v63 = vmul.f32 %v3051_v1, %v4405_v36 }
 0xa9b   :  { %v2092_v34 = vadd.bf16 %v4410_v19, %v2076_v60  ;;  %2872 = vmatprep.mubr.msk.bf16.mxu1 %vm103_vm0, %v2099_v59  ;;  %v2005_v54 = vmul.f32 0.0625, %v1987_v21  ;;  %v2069_v47 = vpack.c.bf16 %v2048_v7, %v2047_v18  ;;  %3062 = vrsqrt.f32 %v2019_v55 }
 0xa9c   :  { %v3053_v44 = vpop.eup %3052  ;;  %v2020_v57 = vadd.f32 1e-05, %v2004_v41 }
 0xa9d   :  { %v2050_v23 = vmul.f32 %v3053_v44, %v4405_v36  ;;  %v2021_v5 = vadd.f32 1e-05, %v2005_v54  ;;  %v1990_v14 = vpop.xlane.xlu1 %1989  ;;  %v2100_v45 = vmax.bf16 %v3129_v8, %v2092_v34  ;;  %v2077_v0 = vmul.bf16 %v2069_v47, %v2061_v51  ;;  %v3055_v6 = vpop.eup %3054 }
 0xa9e   :  { %3064 = vrsqrt.f32 %v2020_v57  ;;  %v2006_v2 = vmul.f32 0.0625, %v1990_v14  ;;  %v2051_v31 = vmul.f32 %v3055_v6, %v4405_v36 }
 0xa9f   :  { %2873 = vmatmul.mubr.msk.bf16.vlgmr.msra.gmra.mrb[32].mxu1 %vm103_vm0, %v2100_v45  ;;  %v2093_v32 = vadd.bf16 %v4410_v19, %v2077_v0  ;;  %v2070_v37 = vpack.c.bf16 %v2050_v23, %v2049_v63  ;;  %3066 = vrsqrt.f32 %v2021_v5 }
 0xaa0   :  { %v3057_v3 = vpop.eup %3056  ;;  %v2022_v56 = vadd.f32 1e-05, %v2006_v2 }
 0xaa1   :  { %v2052_v22 = vmul.f32 %v3057_v3, %v4405_v36  ;;  %v2101_v30 = vmax.bf16 %v3129_v8, %v2093_v32  ;;  %v2078_v24 = vmul.bf16 %v2070_v37, %v2062_v26  ;;  %v3059_v48 = vpop.eup %3058 }
 0xaa2   :  { %3068 = vrsqrt.f32 %v2022_v56  ;;  %v2053_v25 = vmul.f32 %v3059_v48, %v4405_v36 }
 0xaa3   :  { %2876 = vmatprep.mubr.msk.bf16.mxu1 %vm103_vm0, %v2101_v30  ;;  %v2094_v51 = vadd.bf16 %v4410_v19, %v2078_v24  ;;  %v2071_v4 = vpack.c.bf16 %v2052_v22, %v2051_v31 }
 0xaa4   :  { %v3061_v35 = vpop.eup %3060 }
 0xaa5   :  { %v2054_v17 = vmul.f32 %v3061_v35, %v4405_v36  ;;  %v2102_v12 = vmax.bf16 %v3129_v8, %v2094_v51  ;;  %v2079_v53 = vmul.bf16 %v2071_v4, %v2063_v16  ;;  %v3063_v33 = vpop.eup %3062 }
 0xaa6   :  { %v2055_v29 = vmul.f32 %v3063_v33, %v4405_v36 }
 0xaa7   :  { %2877 = vmatmul.mubr.msk.bf16.gmra.mrb[36].mxu1 %vm103_vm0, %v2102_v12  ;;  %v2095_v38 = vadd.bf16 %v4410_v19, %v2079_v53  ;;  %v2072_v26 = vpack.c.bf16 %v2054_v17, %v2053_v25 }
 0xaa8   :  { %v3065_v15 = vpop.eup %3064 }
 0xaa9   :  { %v2056_v40 = vmul.f32 %v3065_v15, %v4405_v36  ;;  %v2103_v10 = vmax.bf16 %v3129_v8, %v2095_v38  ;;  %v2080_v11 = vmul.bf16 %v2072_v26, %v2064_v62  ;;  %v3067_v61 = vpop.eup %3066 }
 0xaaa   :  { %v2057_v18 = vmul.f32 %v3067_v61, %v4405_v36 }
 0xaab   :  { %2880 = vmatprep.mubr.msk.bf16.mxu1 %vm103_vm0, %v2103_v10  ;;  %v2096_v13 = vadd.bf16 %v4410_v19, %v2080_v11  ;;  %v2073_v49 = vpack.c.bf16 %v2056_v40, %v2055_v29 }
 0xaac   :  { %v3069_v16 = vpop.eup %3068 }
 0xaad   :  { %v2058_v20 = vmul.f32 %v3069_v16, %v4405_v36  ;;  %v2104_v1 = vmax.bf16 %v3129_v8, %v2096_v13  ;;  %v2081_v60 = vmul.bf16 %v2073_v49, %v2065_v39 }
 0xaaf   :  { %2881 = vmatmul.mubr.msk.bf16.gmra.mrb[40].mxu1 %vm103_vm0, %v2104_v1  ;;  %v2097_v43 = vadd.bf16 %v4410_v19, %v2081_v60  ;;  %v2074_v50 = vpack.c.bf16 %v2058_v20, %v2057_v18 }
 0xab1   :  { %v2105_v62 = vmax.bf16 %v3129_v8, %v2097_v43  ;;  %v2082_v7 = vmul.bf16 %v2074_v50, %v2066_v27 }
 0xab3   :  { %2884 = vmatprep.mubr.msk.bf16.mxu1 %vm103_vm0, %v2105_v62  ;;  %v2098_v36 = vadd.bf16 %v4410_v19, %v2082_v7 }
 0xab5   :  { %v2106_v55 = vmax.bf16 %v3129_v8, %v2098_v36 }
 0xab7   :  { %2885 = vmatmul.mubr.msk.bf16.gmra.mrb[44].mxu1 %vm103_vm0, %v2106_v55 }
 0xb72   :  { %v2874_v28 = vpop.f32.mrb[32].mxu1 }
 0xb73   :  { %v4477_v39 = vadd.f32 %v2874_v28, %v2701_v9  ;;  %v2181_v46 = vpop.f32.mrb[33].mxu1 }
 0xb74   :  { %v2875_v59 = vpop.f32.mrb[34].mxu1  ;;  %v4479_v42 = vadd.f32 %v2701_v9, %v2181_v46 }
 0xb75   :  { %v4481_v58 = vadd.f32 %v2875_v59, %v2701_v9  ;;  %v2184_v27 = vpop.f32.mrb[35].mxu1  ;;  %v2251_v19 = vsel %vm2244_vm2, %v4477_v39, 0.0 }
 0xb76   :  { %2252 = vadd.xlane.f32.xlu0 %v2251_v19  ;;  %v4485_v41 = vadd.f32 %v2701_v9, %v2184_v27  ;;  %v2245_v34 = vsel %vm2244_vm2, %v4479_v42, 0.0 }
 0xb77   :  { %v2254_v21 = vsel %vm2244_vm2, %v4481_v58, 0.0 }
 0xb78   :  { %2255 = vadd.xlane.f32.xlu1 %v2254_v21  ;;  %v2248_v63 = vsel %vm2244_vm2, %v4485_v41, 0.0 }
 0xb7a   :  { %2246 = vadd.xlane.f32.xlu0 %v2245_v34  ;;  %v2878_v54 = vpop.f32.mrb[36].mxu1 }
 0xb7b   :  { %v4491_v47 = vadd.f32 %v2878_v54, %v2701_v9  ;;  %v2197_v44 = vpop.f32.mrb[37].mxu1 }
 0xb7c   :  { %2249 = vadd.xlane.f32.xlu1 %v2248_v63  ;;  %v2879_v57 = vpop.f32.mrb[38].mxu1  ;;  %v4495_v23 = vadd.f32 %v2701_v9, %v2197_v44 }
 0xb7d   :  { %v4497_v5 = vadd.f32 %v2879_v57, %v2701_v9  ;;  %v2200_v14 = vpop.f32.mrb[39].mxu1  ;;  %v2263_v45 = vsel %vm2244_vm2, %v4491_v47, 0.0 }
 0xb7e   :  { %2264 = vadd.xlane.f32.xlu0 %v2263_v45  ;;  %v4501_v0 = vadd.f32 %v2701_v9, %v2200_v14  ;;  %v2257_v2 = vsel %vm2244_vm2, %v4495_v23, 0.0 }
 0xb7f   :  { %v2266_v6 = vsel %vm2244_vm2, %v4497_v5, 0.0 }
 0xb80   :  { %2267 = vadd.xlane.f32.xlu1 %v2266_v6  ;;  %v2260_v56 = vsel %vm2244_vm2, %v4501_v0, 0.0 }
 0xb82   :  { %2258 = vadd.xlane.f32.xlu0 %v2257_v2  ;;  %v2882_v32 = vpop.f32.mrb[40].mxu1 }
 0xb83   :  { %v4507_v37 = vadd.f32 %v2882_v32, %v2701_v9  ;;  %v2213_v3 = vpop.f32.mrb[41].mxu1 }
 0xb84   :  { %2261 = vadd.xlane.f32.xlu1 %v2260_v56  ;;  %v2883_v31 = vpop.f32.mrb[42].mxu1  ;;  %v4511_v22 = vadd.f32 %v2701_v9, %v2213_v3 }
 0xb85   :  { %v4513_v30 = vadd.f32 %v2883_v31, %v2701_v9  ;;  %v2216_v24 = vpop.f32.mrb[43].mxu1  ;;  %v2275_v48 = vsel %vm2244_vm2, %v4507_v37, 0.0 }
 0xb86   :  { %2276 = vadd.xlane.f32.xlu0 %v2275_v48  ;;  %v4517_v51 = vadd.f32 %v2701_v9, %v2216_v24  ;;  %v2269_v35 = vsel %vm2244_vm2, %v4511_v22, 0.0 }
 0xb87   :  { %v2278_v4 = vsel %vm2244_vm2, %v4513_v30, 0.0 }
 0xb88   :  { %2279 = vadd.xlane.f32.xlu1 %v2278_v4  ;;  %v2272_v12 = vsel %vm2244_vm2, %v4517_v51, 0.0 }
 0xb8a   :  { %2270 = vadd.xlane.f32.xlu0 %v2269_v35  ;;  %v2886_v25 = vpop.f32.mrb[44].mxu1 }
 0xb8b   :  { %v2229_v17 = vpop.f32.mrb[45].mxu1  ;;  %v4527_v26 = vadd.f32 %v2886_v25, %v2701_v9 }
 0xb8c   :  { %v4525_v53 = vadd.f32 %v2701_v9, %v2229_v17  ;;  %2273 = vadd.xlane.f32.xlu1 %v2272_v12  ;;  %v2887_v33 = vpop.f32.mrb[46].mxu1 }
 0xb8d   :  { %v2232_v38 = vpop.f32.mrb[47].mxu1  ;;  %v4533_v40 = vadd.f32 %v2887_v33, %v2701_v9  ;;  %v2287_v11 = vsel %vm2244_vm2, %v4527_v26, 0.0 }
 0xb8e   :  { %v4529_v15 = vadd.f32 %v2701_v9, %v2232_v38  ;;  %v2281_v29 = vsel %vm2244_vm2, %v4525_v53, 0.0 }
 0xb8f   :  { %2282 = vadd.xlane.f32.xlu0 %v2281_v29  ;;  %v2290_v61 = vsel %vm2244_vm2, %v4533_v40, 0.0 }
 0xb90   :  { %v2284_v10 = vsel %vm2244_vm2, %v4529_v15, 0.0 }
 0xb91   :  { %2285 = vadd.xlane.f32.xlu1 %v2284_v10 }
 0xb93   :  { %2288 = vadd.xlane.f32.xlu0 %v2287_v11 }
 0xb95   :  { %2291 = vadd.xlane.f32.xlu1 %v2290_v61 }
 0xc03   :  { %v2253_v13 = vpop.xlane.xlu0 %2252 }
 0xc04   :  { %v2296_v49 = vmul.f32 0.125, %v2253_v13 }
 0xc05   :  { %v2256_v16 = vpop.xlane.xlu1 %2255 }
 0xc06   :  { %v4542_v18 = vsub.f32 %v4477_v39, %v2296_v49  ;;  %v2297_v20 = vmul.f32 0.125, %v2256_v16 }
 0xc07   :  { %v2247_v1 = vpop.xlane.xlu0 %2246 }
 0xc08   :  { %v4545_v60 = vsub.f32 %v4481_v58, %v2297_v20  ;;  %v2294_v43 = vmul.f32 0.125, %v2247_v1  ;;  %v2328_v50 = vmul.f32 %v4542_v18, %v4542_v18 }
 0xc09   :  { %v2250_v62 = vpop.xlane.xlu1 %2249 }
 0xc0a   :  { %v2459_v7 = vpack.c.bf16 %v4545_v60, %v4542_v18  ;;  %v4552_v36 = vsub.f32 %v4479_v42, %v2294_v43  ;;  %v2295_v55 = vmul.f32 0.125, %v2250_v62  ;;  %v2348_v9 = vsel %vm2244_vm2, %v2328_v50, 0.0 }
 0xc0b   :  { %2349 = vadd.xlane.f32.xlu0 %v2348_v9  ;;  %v2265_v28 = vpop.xlane.xlu0 %2264  ;;  %v2329_v39 = vmul.f32 %v4545_v60, %v4545_v60 }
 0xc0c   :  { %v4558_v46 = vsub.f32 %v4485_v41, %v2295_v55  ;;  %v2300_v59 = vmul.f32 0.125, %v2265_v28  ;;  %v2326_v58 = vmul.f32 %v4552_v36, %v4552_v36 }
 0xc0d   :  { %v2268_v27 = vpop.xlane.xlu1 %2267  ;;  %v2351_v19 = vsel %vm2244_vm2, %v2329_v39, 0.0 }
 0xc0e   :  { %v2458_v42 = vpack.c.bf16 %v4558_v46, %v4552_v36  ;;  %v4566_v21 = vsub.f32 %v4491_v47, %v2300_v59  ;;  %v2301_v34 = vmul.f32 0.125, %v2268_v27  ;;  %2352 = vadd.xlane.f32.xlu1 %v2351_v19  ;;  %v2342_v54 = vsel %vm2244_vm2, %v2326_v58, 0.0 }
 0xc0f   :  { %2343 = vadd.xlane.f32.xlu0 %v2342_v54  ;;  %v2259_v41 = vpop.xlane.xlu0 %2258  ;;  %v2327_v44 = vmul.f32 %v4558_v46, %v4558_v46 }
 0xc10   :  { %v4572_v63 = vsub.f32 %v4497_v5, %v2301_v34  ;;  %v2298_v57 = vmul.f32 0.125, %v2259_v41  ;;  %v2332_v14 = vmul.f32 %v4566_v21, %v4566_v21 }
 0xc11   :  { %v2262_v45 = vpop.xlane.xlu1 %2261  ;;  %v2345_v47 = vsel %vm2244_vm2, %v2327_v44, 0.0 }
 0xc12   :  { %v2461_v6 = vpack.c.bf16 %v4572_v63, %v4566_v21  ;;  %v4580_v2 = vsub.f32 %v4495_v23, %v2298_v57  ;;  %v2299_v32 = vmul.f32 0.125, %v2262_v45  ;;  %2346 = vadd.xlane.f32.xlu1 %v2345_v47  ;;  %v2360_v3 = vsel %vm2244_vm2, %v2332_v14, 0.0 }
 0xc13   :  { %2361 = vadd.xlane.f32.xlu0 %v2360_v3  ;;  %v2277_v5 = vpop.xlane.xlu0 %2276  ;;  %v2333_v56 = vmul.f32 %v4572_v63, %v4572_v63 }
 0xc14   :  { %v4586_v31 = vsub.f32 %v4501_v0, %v2299_v32  ;;  %v2304_v24 = vmul.f32 0.125, %v2277_v5  ;;  %v2330_v48 = vmul.f32 %v4580_v2, %v4580_v2 }
 0xc15   :  { %v2280_v4 = vpop.xlane.xlu1 %2279  ;;  %v2363_v23 = vsel %vm2244_vm2, %v2333_v56, 0.0 }
 0xc16   :  { %v2460_v35 = vpack.c.bf16 %v4586_v31, %v4580_v2  ;;  %v4594_v25 = vsub.f32 %v4507_v37, %v2304_v24  ;;  %v2305_v17 = vmul.f32 0.125, %v2280_v4  ;;  %2364 = vadd.xlane.f32.xlu1 %v2363_v23  ;;  %v2354_v12 = vsel %vm2244_vm2, %v2330_v48, 0.0 }
 0xc17   :  { %2355 = vadd.xlane.f32.xlu0 %v2354_v12  ;;  %v2271_v0 = vpop.xlane.xlu0 %2270  ;;  %v2331_v33 = vmul.f32 %v4586_v31, %v4586_v31 }
 0xc18   :  { %v4600_v38 = vsub.f32 %v4513_v30, %v2305_v17  ;;  %v2302_v29 = vmul.f32 0.125, %v2271_v0  ;;  %v2336_v10 = vmul.f32 %v4594_v25, %v4594_v25 }
 0xc19   :  { %v2274_v11 = vpop.xlane.xlu1 %2273  ;;  %v2357_v37 = vsel %vm2244_vm2, %v2331_v33, 0.0 }
 0xc1a   :  { %v2463_v61 = vpack.c.bf16 %v4600_v38, %v4594_v25  ;;  %v4608_v13 = vsub.f32 %v4511_v22, %v2302_v29  ;;  %v2303_v49 = vmul.f32 0.125, %v2274_v11  ;;  %2358 = vadd.xlane.f32.xlu1 %v2357_v37  ;;  %v2372_v16 = vsel %vm2244_vm2, %v2336_v10, 0.0 }
 0xc1b   :  { %2373 = vadd.xlane.f32.xlu0 %v2372_v16  ;;  %v2337_v30 = vmul.f32 %v4600_v38, %v4600_v38 }
 0xc1c   :  { %v4614_v20 = vsub.f32 %v4517_v51, %v2303_v49  ;;  %v2283_v1 = vpop.xlane.xlu0 %2282  ;;  %v2334_v43 = vmul.f32 %v4608_v13, %v4608_v13  ;;  %v2112_v49 = vld [vmem:[%s4827_s3 + $0x11] sm:$0x1] }
 0xc1d   :  { %v2306_v50 = vmul.f32 0.125, %v2283_v1  ;;  %v2375_v62 = vsel %vm2244_vm2, %v2337_v30, 0.0 }
 0xc1e   :  { %v2462_v22 = vpack.c.bf16 %v4614_v20, %v4608_v13  ;;  %2376 = vadd.xlane.f32.xlu1 %v2375_v62  ;;  %v2286_v55 = vpop.xlane.xlu1 %2285  ;;  %v2366_v9 = vsel %vm2244_vm2, %v2334_v43, 0.0  ;;  %v2335_v28 = vmul.f32 %v4614_v20, %v4614_v20  ;;  %v2482_v62 = vpack.c.bf16 %v2112_v49, %v2112_v49 }
 0xc1f   :  { %v4625_v51 = vsub.f32 %v4525_v53, %v2306_v50  ;;  %v2307_v39 = vmul.f32 0.125, %v2286_v55  ;;  %2367 = vadd.xlane.f32.xlu0 %v2366_v9 }
 0xc20   :  { %v2289_v59 = vpop.xlane.xlu0 %2288  ;;  %v2369_v58 = vsel %vm2244_vm2, %v2335_v28, 0.0 }
 0xc21   :  { %v4629_v27 = vsub.f32 %v4529_v15, %v2307_v39  ;;  %v2308_v19 = vmul.f32 0.125, %v2289_v59  ;;  %v2338_v34 = vmul.f32 %v4625_v51, %v4625_v51  ;;  %v4659_v59 = vld [vmem:[%s4827_s3 + $0x10] ss:$0 sm:$0xff] }
 0xc22   :  { %2370 = vadd.xlane.f32.xlu1 %v2369_v58  ;;  %v2292_v54 = vpop.xlane.xlu1 %2291 }
 0xc23   :  { %v2464_v41 = vpack.c.bf16 %v4629_v27, %v4625_v51  ;;  %v4636_v53 = vsub.f32 %v4527_v26, %v2308_v19  ;;  %v2309_v44 = vmul.f32 0.125, %v2292_v54  ;;  %v2378_v57 = vsel %vm2244_vm2, %v2338_v34, 0.0 }
 0xc24   :  { %2379 = vadd.xlane.f32.xlu0 %v2378_v57  ;;  %v2339_v15 = vmul.f32 %v4629_v27, %v4629_v27  ;;  %v2484_v54 = vpack.i.b16 %v2482_v62, %v2482_v62 }
 0xc25   :  { %v4642_v14 = vsub.f32 %v4533_v40, %v2309_v44  ;;  %v2340_v45 = vmul.f32 %v4636_v53, %v4636_v53 }
 0xc26   :  { %v2381_v47 = vsel %vm2244_vm2, %v2339_v15, 0.0 }
 0xc27   :  { %v2465_v32 = vpack.c.bf16 %v4642_v14, %v4636_v53  ;;  %2382 = vadd.xlane.f32.xlu1 %v2381_v47  ;;  %v2384_v26 = vsel %vm2244_vm2, %v2340_v45, 0.0  ;;  %v2341_v3 = vmul.f32 %v4642_v14, %v4642_v14 }
 0xc28   :  { %2385 = vadd.xlane.f32.xlu0 %v2384_v26 }
 0xc29   :  { %v2387_v5 = vsel %vm2244_vm2, %v2341_v3, 0.0 }
 0xc2b   :  { %2388 = vadd.xlane.f32.xlu1 %v2387_v5 }
 0xc98   :  { %v2350_v40 = vpop.xlane.xlu0 %2349 }
 0xc99   :  { %v2392_v56 = vmul.f32 0.125, %v2350_v40 }
 0xc9b   :  { %v2408_v24 = vadd.f32 1e-05, %v2392_v56  ;;  %v2353_v48 = vpop.xlane.xlu1 %2352 }
 0xc9c   :  { %v2393_v4 = vmul.f32 0.125, %v2353_v48  ;;  %v2344_v23 = vpop.xlane.xlu0 %2343  ;;  %v4664_v48 = vrot.slane %v2484_v54, %v3389_v52 }
 0xc9d   :  { %v2390_v17 = vmul.f32 0.125, %v2344_v23  ;;  %3070 = vrsqrt.f32 %v2408_v24 }
 0xc9e   :  { %v2409_v12 = vadd.f32 1e-05, %v2393_v4 }
 0xc9f   :  { %v2406_v0 = vadd.f32 1e-05, %v2390_v17  ;;  %v2347_v33 = vpop.xlane.xlu1 %2346 }
 0xca0   :  { %3072 = vrsqrt.f32 %v2409_v12  ;;  %v2391_v29 = vmul.f32 0.125, %v2347_v33  ;;  %v2362_v10 = vpop.xlane.xlu0 %2361 }
 0xca1   :  { %v2396_v11 = vmul.f32 0.125, %v2362_v10  ;;  %3074 = vrsqrt.f32 %v2406_v0 }
 0xca2   :  { %v2407_v37 = vadd.f32 1e-05, %v2391_v29 }
 0xca3   :  { %v2412_v16 = vadd.f32 1e-05, %v2396_v11  ;;  %v2365_v30 = vpop.xlane.xlu1 %2364 }
 0xca4   :  { %3076 = vrsqrt.f32 %v2407_v37  ;;  %v2397_v1 = vmul.f32 0.125, %v2365_v30  ;;  %v2356_v43 = vpop.xlane.xlu0 %2355 }
 0xca5   :  { %v2394_v50 = vmul.f32 0.125, %v2356_v43  ;;  %3078 = vrsqrt.f32 %v2412_v16 }
 0xca6   :  { %v2413_v55 = vadd.f32 1e-05, %v2397_v1 }
 0xca7   :  { %v2410_v9 = vadd.f32 1e-05, %v2394_v50  ;;  %v2359_v28 = vpop.xlane.xlu1 %2358  ;;  %v3071_v39 = vpop.eup %3070 }
 0xca8   :  { %3080 = vrsqrt.f32 %v2413_v55  ;;  %v2395_v58 = vmul.f32 0.125, %v2359_v28  ;;  %v2374_v19 = vpop.xlane.xlu0 %2373  ;;  %v2444_v15 = vmul.f32 %v3071_v39, %v4659_v59  ;;  %v4681_v55 = vld [vmem:[%s4827_s3 + $0x13] ss:$0 sm:$0xff] }
 0xca9   :  { %v2400_v34 = vmul.f32 0.125, %v2374_v19  ;;  %3082 = vrsqrt.f32 %v2410_v9 }
 0xcaa   :  { %v3073_v44 = vpop.eup %3072  ;;  %v2411_v57 = vadd.f32 1e-05, %v2395_v58 }
 0xcab   :  { %v2445_v45 = vmul.f32 %v3073_v44, %v4659_v59  ;;  %v2416_v47 = vadd.f32 1e-05, %v2400_v34  ;;  %v2377_v26 = vpop.xlane.xlu1 %2376  ;;  %v3075_v3 = vpop.eup %3074 }
 0xcac   :  { %3084 = vrsqrt.f32 %v2411_v57  ;;  %v2401_v5 = vmul.f32 0.125, %v2377_v26  ;;  %v2368_v40 = vpop.xlane.xlu0 %2367  ;;  %v2442_v17 = vmul.f32 %v3075_v3, %v4659_v59 }
 0xcad   :  { %v2398_v56 = vmul.f32 0.125, %v2368_v40  ;;  %v2467_v24 = vpack.c.bf16 %v2445_v45, %v2444_v15  ;;  %3086 = vrsqrt.f32 %v2416_v47 }
 0xcae   :  { %v3077_v4 = vpop.eup %3076  ;;  %v2417_v23 = vadd.f32 1e-05, %v2401_v5 }
 0xcaf   :  { %v2443_v12 = vmul.f32 %v3077_v4, %v4659_v59  ;;  %v2414_v0 = vadd.f32 1e-05, %v2398_v56  ;;  %v2371_v33 = vpop.xlane.xlu1 %2370  ;;  %v2475_v29 = vmul.bf16 %v2467_v24, %v2459_v7  ;;  %v3079_v11 = vpop.eup %3078 }
 0xcb0   :  { %3088 = vrsqrt.f32 %v2417_v23  ;;  %v2399_v10 = vmul.f32 0.125, %v2371_v33  ;;  %v2448_v60 = vmul.f32 %v3079_v11, %v4659_v59 }
 0xcb1   :  { %3090 = vrsqrt.f32 %v2414_v0  ;;  %v2380_v37 = vpop.xlane.xlu0 %2379  ;;  %v2491_v52 = vadd.bf16 %v4664_v48, %v2475_v29  ;;  %v2466_v49 = vpack.c.bf16 %v2443_v12, %v2442_v17 }
 0xcb2   :  { %v3081_v16 = vpop.eup %3080  ;;  %v2415_v30 = vadd.f32 1e-05, %v2399_v10  ;;  %v2402_v1 = vmul.f32 0.125, %v2380_v37 }
 0xcb3   :  { %v2449_v43 = vmul.f32 %v3081_v16, %v4659_v59  ;;  %v2499_v50 = vmax.bf16 %v3129_v8, %v2491_v52  ;;  %v2474_v18 = vmul.bf16 %v2466_v49, %v2458_v42  ;;  %v3083_v9 = vpop.eup %3082 }
 0xcb4   :  { %3092 = vrsqrt.f32 %v2415_v30  ;;  %v2418_v7 = vadd.f32 1e-05, %v2402_v1  ;;  %v2383_v62 = vpop.xlane.xlu1 %2382  ;;  %v2446_v47 = vmul.f32 %v3083_v9, %v4659_v59 }
 0xcb5   :  { %v2403_v28 = vmul.f32 0.125, %v2383_v62  ;;  %v2386_v39 = vpop.xlane.xlu0 %2385  ;;  %v2511_v58 = vunpack.c.h.bf16 %v2499_v50  ;;  %v2510_v19 = vunpack.c.l.bf16 %v2499_v50  ;;  %v2490_v34 = vadd.bf16 %v4664_v48, %v2474_v18 }
 0xcb6   :  { %v3085_v54 = vpop.eup %3084  ;;  %3094 = vrsqrt.f32 %v2418_v7  ;;  %v2404_v36 = vmul.f32 0.125, %v2386_v39  ;;  %v2469_v46 = vpack.c.bf16 %v2449_v43, %v2448_v60 }
 0xcb7   :  { %v2447_v42 = vmul.f32 %v3085_v54, %v4659_v59  ;;  %v2419_v44 = vadd.f32 1e-05, %v2403_v28  ;;  %v2531_v57 = vmul.f32 %v4681_v55, %v2511_v58  ;;  %v2530_v15 = vmul.f32 %v4681_v55, %v2510_v19  ;;  %v3087_v45 = vpop.eup %3086 }
 0xcb8   :  { %v2420_v26 = vadd.f32 1e-05, %v2404_v36  ;;  %v2389_v3 = vpop.xlane.xlu1 %2388  ;;  %v2498_v5 = vmax.bf16 %v3129_v8, %v2490_v34  ;;  %v2477_v40 = vmul.bf16 %v2469_v46, %v2461_v6  ;;  %v2452_v29 = vmul.f32 %v3087_v45, %v4659_v59 }
 0xcb9   :  { %3096 = vrsqrt.f32 %v2419_v44  ;;  %v2405_v56 = vmul.f32 0.125, %v2389_v3  ;;  %v2553_v24 = vsel %vm2244_vm2, %v2531_v57, 0.0  ;;  %v2550_v4 = vsel %vm2244_vm2, %v2530_v15, 0.0 }
 0xcba   :  { %v3089_v23 = vpop.eup %3088  ;;  %3098 = vrsqrt.f32 %v2420_v26  ;;  %2554 = vadd.xlane.f32.xlu1 %v2553_v24  ;;  %2551 = vadd.xlane.f32.xlu0 %v2550_v4  ;;  %v2509_v17 = vunpack.c.h.bf16 %v2498_v5  ;;  %v2508_v12 = vunpack.c.l.bf16 %v2498_v5  ;;  %v2493_v0 = vadd.bf16 %v4664_v48, %v2477_v40 }
 0xcbb   :  { %v3091_v33 = vpop.eup %3090  ;;  %v2453_v21 = vmul.f32 %v3089_v23, %v4659_v59  ;;  %v2421_v63 = vadd.f32 1e-05, %v2405_v56  ;;  %v2468_v6 = vpack.c.bf16 %v2447_v42, %v2446_v47 }
 0xcbc   :  { %v2529_v10 = vmul.f32 %v4681_v55, %v2509_v17  ;;  %v2528_v11 = vmul.f32 %v4681_v55, %v2508_v12  ;;  %v2501_v37 = vmax.bf16 %v3129_v8, %v2493_v0  ;;  %v2450_v52 = vmul.f32 %v3091_v33, %v4659_v59 }
 0xcbd   :  { %3100 = vrsqrt.f32 %v2421_v63  ;;  %v2476_v49 = vmul.bf16 %v2468_v6, %v2460_v35  ;;  %v2471_v16 = vpack.c.bf16 %v2453_v21, %v2452_v29 }
 0xcbe   :  { %v3093_v30 = vpop.eup %3092  ;;  %v2547_v1 = vsel %vm2244_vm2, %v2529_v10, 0.0  ;;  %v2544_v43 = vsel %vm2244_vm2, %v2528_v11, 0.0  ;;  %v2515_v50 = vunpack.c.h.bf16 %v2501_v37  ;;  %v2514_v18 = vunpack.c.l.bf16 %v2501_v37 }
 0xcbf   :  { %v2451_v60 = vmul.f32 %v3093_v30, %v4659_v59  ;;  %2548 = vadd.xlane.f32.xlu1 %v2547_v1  ;;  %2545 = vadd.xlane.f32.xlu0 %v2544_v43  ;;  %v2492_v7 = vadd.bf16 %v4664_v48, %v2476_v49  ;;  %v2479_v62 = vmul.bf16 %v2471_v16, %v2463_v61  ;;  %v2713_v43 = vld [vmem:[%s4827_s3 + $0x12] ss:$0 sm:$0xff] }
 0xcc0   :  { %v3095_v2 = vpop.eup %3094  ;;  %v2535_v31 = vmul.f32 %v4681_v55, %v2515_v50  ;;  %v2534_v35 = vmul.f32 %v4681_v55, %v2514_v18 }
 0xcc1   :  { %v2500_v9 = vmax.bf16 %v3129_v8, %v2492_v7  ;;  %v2495_v28 = vadd.bf16 %v4664_v48, %v2479_v62  ;;  %v2470_v39 = vpack.c.bf16 %v2451_v60, %v2450_v52  ;;  %v2454_v46 = vmul.f32 %v3095_v2, %v4659_v59 }
 0xcc2   :  { %v2565_v58 = vsel %vm2244_vm2, %v2535_v31, 0.0  ;;  %v2562_v19 = vsel %vm2244_vm2, %v2534_v35, 0.0 }
 0xcc3   :  { %v3097_v34 = vpop.eup %3096  ;;  %2566 = vadd.xlane.f32.xlu1 %v2565_v58  ;;  %2563 = vadd.xlane.f32.xlu0 %v2562_v19  ;;  %v2513_v54 = vunpack.c.h.bf16 %v2500_v9  ;;  %v2512_v25 = vunpack.c.l.bf16 %v2500_v9  ;;  %v2503_v38 = vmax.bf16 %v3129_v8, %v2495_v28  ;;  %v2478_v61 = vmul.bf16 %v2470_v39, %v2462_v22 }
 0xcc4   :  { %v3099_v36 = vpop.eup %3098  ;;  %v2455_v42 = vmul.f32 %v3097_v34, %v4659_v59 }
 0xcc5   :  { %v2533_v44 = vmul.f32 %v4681_v55, %v2513_v54  ;;  %v2532_v57 = vmul.f32 %v4681_v55, %v2512_v25  ;;  %v2519_v15 = vunpack.c.h.bf16 %v2503_v38  ;;  %v2518_v45 = vunpack.c.l.bf16 %v2503_v38 }
 0xcc6   :  { %v2494_v47 = vadd.bf16 %v4664_v48, %v2478_v61  ;;  %v2472_v26 = vpack.c.bf16 %v2455_v42, %v2454_v46  ;;  %v2456_v5 = vmul.f32 %v3099_v36, %v4659_v59 }
 0xcc7   :  { %v3101_v3 = vpop.eup %3100  ;;  %v2559_v13 = vsel %vm2244_vm2, %v2533_v44, 0.0  ;;  %v2556_v20 = vsel %vm2244_vm2, %v2532_v57, 0.0  ;;  %v2539_v22 = vmul.f32 %v4681_v55, %v2519_v15  ;;  %v2538_v56 = vmul.f32 %v4681_v55, %v2518_v45 }
 0xcc8   :  { %v2457_v40 = vmul.f32 %v3101_v3, %v4659_v59  ;;  %2560 = vadd.xlane.f32.xlu1 %v2559_v13  ;;  %2557 = vadd.xlane.f32.xlu0 %v2556_v20  ;;  %v2502_v24 = vmax.bf16 %v3129_v8, %v2494_v47  ;;  %v2480_v23 = vmul.bf16 %v2472_v26, %v2464_v41 }
 0xcc9   :  { %v2577_v4 = vsel %vm2244_vm2, %v2539_v22, 0.0  ;;  %v2574_v17 = vsel %vm2244_vm2, %v2538_v56, 0.0 }
 0xcca   :  { %v2517_v12 = vunpack.c.h.bf16 %v2502_v24  ;;  %v2516_v0 = vunpack.c.l.bf16 %v2502_v24  ;;  %v2473_v33 = vpack.c.bf16 %v2457_v40, %v2456_v5  ;;  %v2496_v29 = vadd.bf16 %v4664_v48, %v2480_v23 }
 0xccc   :  { %2578 = vadd.xlane.f32.xlu1 %v2577_v4  ;;  %2575 = vadd.xlane.f32.xlu0 %v2574_v17  ;;  %v2537_v59 = vmul.f32 %v4681_v55, %v2517_v12  ;;  %v2536_v21 = vmul.f32 %v4681_v55, %v2516_v0  ;;  %v2481_v63 = vmul.bf16 %v2473_v33, %v2465_v32 }
 0xccd   :  { %v2504_v51 = vmax.bf16 %v3129_v8, %v2496_v29 }
 0xcce   :  { %v2571_v27 = vsel %vm2244_vm2, %v2537_v59, 0.0  ;;  %v2568_v41 = vsel %vm2244_vm2, %v2536_v21, 0.0  ;;  %v2497_v6 = vadd.bf16 %v4664_v48, %v2481_v63 }
 0xccf   :  { %v2521_v10 = vunpack.c.h.bf16 %v2504_v51  ;;  %v2520_v11 = vunpack.c.l.bf16 %v2504_v51 }
 0xcd0   :  { %2572 = vadd.xlane.f32.xlu1 %v2571_v27  ;;  %2569 = vadd.xlane.f32.xlu0 %v2568_v41  ;;  %v2505_v37 = vmax.bf16 %v3129_v8, %v2497_v6 }
 0xcd1   :  { %v2541_v52 = vmul.f32 %v4681_v55, %v2521_v10  ;;  %v2540_v49 = vmul.f32 %v4681_v55, %v2520_v11 }
 0xcd2   :  { %v2523_v53 = vunpack.c.h.bf16 %v2505_v37  ;;  %v2522_v14 = vunpack.c.l.bf16 %v2505_v37 }
 0xcd3   :  { %v2583_v32 = vsel %vm2244_vm2, %v2541_v52, 0.0  ;;  %v2580_v16 = vsel %vm2244_vm2, %v2540_v49, 0.0 }
 0xcd4   :  { %2584 = vadd.xlane.f32.xlu1 %v2583_v32  ;;  %2581 = vadd.xlane.f32.xlu0 %v2580_v16  ;;  %v2543_v48 = vmul.f32 %v4681_v55, %v2523_v53  ;;  %v2542_v30 = vmul.f32 %v4681_v55, %v2522_v14 }
 0xcd6   :  { %v2589_v1 = vsel %vm2244_vm2, %v2543_v48, 0.0  ;;  %v2586_v8 = vsel %vm2244_vm2, %v2542_v30, 0.0 }
 0xcd8   :  { %2590 = vadd.xlane.f32.xlu1 %v2589_v1  ;;  %2587 = vadd.xlane.f32.xlu0 %v2586_v8 }
 0xd47   :  { %v2555_v50 = vpop.xlane.xlu1 %2554  ;;  %v2552_v18 = vpop.xlane.xlu0 %2551 }
 0xd48   :  { %v2599_v60 = vadd.f32 %v2713_v43, %v2555_v50  ;;  %v2598_v7 = vadd.f32 %v2713_v43, %v2552_v18 }
 0xd4a   :  { %2616 = vst.msk [vmem:[%s4828_s4 + $0x18] sm:$0xff] %vm2612_vm3, %v2599_v60  ;;  %2615 = vst.msk [vmem:[%s4828_s4 + $0x10] sm:$0xff] %vm2612_vm3, %v2598_v7 }
 0xd4c   :  { %v2549_v55 = vpop.xlane.xlu1 %2548  ;;  %v2546_v62 = vpop.xlane.xlu0 %2545 }
 0xd4d   :  { %v2597_v2 = vadd.f32 %v2713_v43, %v2549_v55  ;;  %v2596_v31 = vadd.f32 %v2713_v43, %v2546_v62 }
 0xd4f   :  { %2614 = vst.msk [vmem:[%s4828_s4 + $0x8] sm:$0xff] %vm2612_vm3, %v2597_v2  ;;  %2613 = vst.msk [vmem:[%s4828_s4] sm:$0xff] %vm2612_vm3, %v2596_v31 }
 0xd50   :  { %v2567_v35 = vpop.xlane.xlu1 %2566  ;;  %v2564_v9 = vpop.xlane.xlu0 %2563 }
 0xd51   :  { %v2603_v28 = vadd.f32 %v2713_v43, %v2567_v35  ;;  %v2602_v39 = vadd.f32 %v2713_v43, %v2564_v9 }
 0xd53   :  { %2620 = vst.msk [vmem:[%s4828_s4 + $0x38] sm:$0xff] %vm2612_vm3, %v2603_v28  ;;  %2619 = vst.msk [vmem:[%s4828_s4 + $0x30] sm:$0xff] %vm2612_vm3, %v2602_v39 }
 0xd55   :  { %v2561_v58 = vpop.xlane.xlu1 %2560  ;;  %v2558_v19 = vpop.xlane.xlu0 %2557 }
 0xd56   :  { %v2601_v34 = vadd.f32 %v2713_v43, %v2561_v58  ;;  %v2600_v54 = vadd.f32 %v2713_v43, %v2558_v19 }
 0xd58   :  { %2618 = vst.msk [vmem:[%s4828_s4 + $0x28] sm:$0xff] %vm2612_vm3, %v2601_v34  ;;  %2617 = vst.msk [vmem:[%s4828_s4 + $0x20] sm:$0xff] %vm2612_vm3, %v2600_v54 }
 0xd59   :  { %v2579_v25 = vpop.xlane.xlu1 %2578  ;;  %v2576_v38 = vpop.xlane.xlu0 %2575 }
 0xd5a   :  { %v2607_v61 = vadd.f32 %v2713_v43, %v2579_v25  ;;  %v2606_v36 = vadd.f32 %v2713_v43, %v2576_v38 }
 0xd5c   :  { %2624 = vst.msk [vmem:[%s4828_s4 + $0x58] sm:$0xff] %vm2612_vm3, %v2607_v61  ;;  %2623 = vst.msk [vmem:[%s4828_s4 + $0x50] sm:$0xff] %vm2612_vm3, %v2606_v36 }
 0xd5d   :  { %v2573_v46 = vpop.xlane.xlu1 %2572  ;;  %v2570_v42 = vpop.xlane.xlu0 %2569 }
 0xd5e   :  { %v2605_v44 = vadd.f32 %v2713_v43, %v2573_v46  ;;  %v2604_v57 = vadd.f32 %v2713_v43, %v2570_v42 }
 0xd60   :  { %2622 = vst.msk [vmem:[%s4828_s4 + $0x48] sm:$0xff] %vm2612_vm3, %v2605_v44  ;;  %2621 = vst.msk [vmem:[%s4828_s4 + $0x40] sm:$0xff] %vm2612_vm3, %v2604_v57 }
 0xd61   :  { %v2585_v15 = vpop.xlane.xlu1 %2584  ;;  %v2582_v45 = vpop.xlane.xlu0 %2581 }
 0xd62   :  { %v2609_v47 = vadd.f32 %v2713_v43, %v2585_v15  ;;  %v2608_v26 = vadd.f32 %v2713_v43, %v2582_v45 }
 0xd64   :  { %2626 = vst.msk [vmem:[%s4828_s4 + $0x68] sm:$0xff] %vm2612_vm3, %v2609_v47  ;;  %2625 = vst.msk [vmem:[%s4828_s4 + $0x60] sm:$0xff] %vm2612_vm3, %v2608_v26 }
 0xd65   :  { %v2591_v3 = vpop.xlane.xlu1 %2590  ;;  %v2588_v5 = vpop.xlane.xlu0 %2587 }
 0xd66   :  { %v2611_v13 = vadd.f32 %v2713_v43, %v2591_v3  ;;  %v2610_v20 = vadd.f32 %v2713_v43, %v2588_v5 }
 0xd68   :  { %2628 = vst.msk [vmem:[%s4828_s4 + $0x78] sm:$0xff] %vm2612_vm3, %v2611_v13  ;;  %2627 = vst.msk [vmem:[%s4828_s4 + $0x70] sm:$0xff] %vm2612_vm3, %v2610_v20 }
 0xd69   :  { %2633 = vsyncpa [#allocation3], 1 }

</bundles_post_ra>
